<compile_context>
chip_gen: v7x
topology: tpu7x:2x2x1
jax: 0.10.0
libtpu: 0.0.40
codegen_flags: <defaults>
</compile_context>

<pallas_src>
import jax
import jax.numpy as jnp
from jax.experimental import pallas as pl
from jax.experimental.pallas import tpu as pltpu

NUM_NEURONAS = 200
IN_FEATURES = 3
OUT_FEATURES = 1

HIDDEN_PAD = 256   # 200 -> 256 (lane aligned for the contraction dim)
IN_PAD = 8         # 3   -> 8   (sublane aligned)
ACT_ROWS = 208     # 200 rounded up to 16 (bf16 sublane packing granule)
N_HIDDEN = 4       # hidden-to-hidden layers (layers 2..5)


def _mlp_kernel(xT_ref,
                w1_ref, b1_ref,
                wh_ref, bh_ref,
                wo_ref, bo_ref,
                o_ref,
                h_ref):
    """Transposed MLP: activations are (features, tile_b); weights are W^T."""
    cdt = wh_ref.dtype                      # matmul operand dtype (bf16 / f32)
    tb = h_ref.shape[1]

    # Keep the padded activation rows at exactly zero.  Scratch VMEM is
    # uninitialised (could hold NaN, and NaN*0=NaN downstream), and with
    # megacore each core owns its own scratch, so init every grid step.
    h_ref[ACT_ROWS:, :] = jnp.zeros((HIDDEN_PAD - ACT_ROWS, tb), cdt)

    # Layer 1: (HIDDEN_PAD, IN_PAD) @ (IN_PAD, TB)
    z = jnp.dot(w1_ref[...], xT_ref[...].astype(cdt),
                preferred_element_type=jnp.float32) + b1_ref[...]
    h_ref[:ACT_ROWS, :] = jnp.tanh(z[:ACT_ROWS, :]).astype(cdt)

    # Hidden layers 2..5 (folded weights packed as (N_HIDDEN, H, H)).
    for l in range(N_HIDDEN):               # static unroll
        z = jnp.dot(wh_ref[l], h_ref[...],
                    preferred_element_type=jnp.float32) + bh_ref[l]
        h_ref[:ACT_ROWS, :] = jnp.tanh(z[:ACT_ROWS, :]).astype(cdt)

    # Output layer: (1, HIDDEN_PAD) @ (HIDDEN_PAD, TB) -> lane-dense (1, TB).
    o_ref[...] = jnp.dot(wo_ref[...], h_ref[...],
                         preferred_element_type=jnp.float32) + bo_ref[...]


def _prepare_params(params, use_bf16):
    """Fold the sigmoid affine into the weights, zero-pad, pack, cast.

    sigmoid(z) = 0.5*tanh(z/2) + 0.5 is folded so the kernel only runs tanh.
    All folding is done in f32; padded rows/cols and padded bias entries are
    zero, so padded activations are exactly tanh(0)=0 and never contribute.
    """
    wdt = jnp.bfloat16 if use_bf16 else jnp.float32
    (w1, b1, w2, b2, w3, b3, w4, b4, w5, b5, wo, bo) = [
        jnp.asarray(p, jnp.float32) for p in params]

    def fold_first(w, b):        # w: (in, out), b: (1, out) -> (W^T', b_col')
        return 0.5 * w.T, 0.5 * b.T

    def fold_hidden(w, b):
        wt = w.T                                          # (out, in)
        return 0.25 * wt, 0.5 * b.T + 0.25 * wt.sum(axis=1, keepdims=True)

    def fold_out(w, b):
        wt = w.T
        return 0.5 * wt, b.T + 0.5 * wt.sum(axis=1, keepdims=True)

    w1t, b1c = fold_first(w1, b1)
    hidden = [fold_hidden(w, b) for (w, b) in ((w2, b2), (w3, b3),
                                               (w4, b4), (w5, b5))]
    wot, boc = fold_out(wo, bo)

    def pad_w(wt, rows, cols):
        out = jnp.zeros((rows, cols), jnp.float32)
        return out.at[:wt.shape[0], :wt.shape[1]].set(wt)

    def pad_b(bc, rows):
        out = jnp.zeros((rows, 1), jnp.float32)
        return out.at[:bc.shape[0], :].set(bc)

    w1p = pad_w(w1t, HIDDEN_PAD, IN_PAD).astype(wdt)
    b1p = pad_b(b1c, HIDDEN_PAD)                                   # f32 bias
    whp = jnp.stack([pad_w(wt, HIDDEN_PAD, HIDDEN_PAD)
                     for wt, _ in hidden]).astype(wdt)             # (4,256,256)
    bhp = jnp.stack([pad_b(bc, HIDDEN_PAD) for _, bc in hidden])   # (4,256,1)
    wop = pad_w(wot, OUT_FEATURES, HIDDEN_PAD).astype(wdt)
    bop = pad_b(boc, OUT_FEATURES)
    return (w1p, b1p, whp, bhp, wop, bop)


def _choose_tile_b(n):
    """Batch tile: as large as 2048, but keep >=2 grid steps when possible
    (v7x has 2 TensorCores and the batch grid axis is "parallel")."""
    tile = 2048
    while tile > 256 and n <= tile:
        tile //= 2
    return tile


def _invariant_spec(shape):
    ndim = len(shape)

    def idx(i):
        return (0,) * ndim

    return pl.BlockSpec(shape, idx)


def net_forward(x, y, t, params, *, tile_b=None, use_bf16=True):
    """Pallas forward pass. x, y, t: (N, 1) float32. Returns (N, 1) float32."""
    n = x.shape[0]
    if tile_b is None:
        tile_b = _choose_tile_b(n)
    n_pad = pl.cdiv(n, tile_b) * tile_b

    # Transposed, zero-padded input (IN_PAD, n_pad) built directly (no
    # (N,3) concat + transpose + scatter round-trip in the wrapper HLO).
    xT = jnp.concatenate(
        [x.astype(jnp.float32).T,
         y.astype(jnp.float32).T,
         t.astype(jnp.float32).T,
         jnp.zeros((IN_PAD - IN_FEATURES, n), jnp.float32)], axis=0)
    xT = jnp.pad(xT, ((0, 0), (0, n_pad - n)))

    w1p, b1p, whp, bhp, wop, bop = _prepare_params(params, use_bf16)
    packed = (w1p, b1p, whp, bhp, wop, bop)

    grid = (n_pad // tile_b,)
    in_specs = [pl.BlockSpec((IN_PAD, tile_b), lambda i: (0, i))] + \
               [_invariant_spec(p.shape) for p in packed]
    # Lane-dense output row slab (last dim = tile_b, multiple of 128).
    out_spec = pl.BlockSpec((1, tile_b), lambda i: (0, i))

    weight_bytes = sum(int(p.size) * int(p.dtype.itemsize) for p in packed)
    flops = 2 * n_pad * (IN_PAD * HIDDEN_PAD
                         + N_HIDDEN * HIDDEN_PAD * HIDDEN_PAD
                         + HIDDEN_PAD * OUT_FEATURES)
    transcendentals = (1 + N_HIDDEN) * ACT_ROWS * n_pad
    cost = pl.CostEstimate(
        flops=flops,
        transcendentals=transcendentals,
        bytes_accessed=weight_bytes + int(xT.size) * 4 + n_pad * 4)

    out_row = pl.pallas_call(
        _mlp_kernel,
        out_shape=jax.ShapeDtypeStruct((1, n_pad), jnp.float32),
        grid_spec=pltpu.PrefetchScalarGridSpec(
            num_scalar_prefetch=0,
            grid=grid,
            in_specs=in_specs,
            out_specs=out_spec,
            scratch_shapes=[pltpu.VMEM(
                (HIDDEN_PAD, tile_b),
                jnp.bfloat16 if use_bf16 else jnp.float32)]),
        compiler_params=pltpu.CompilerParams(
            dimension_semantics=("parallel",)),
        cost_estimate=cost,
    )(xT, *packed)

    return out_row[0, :n].reshape(n, OUT_FEATURES)


def init_params(key):
    """PyTorch-Linear-style init: U(-1/sqrt(fan_in), 1/sqrt(fan_in)).
    Weights stored as (in_features, out_features)."""
    dims = [(IN_FEATURES, NUM_NEURONAS)] + \
           [(NUM_NEURONAS, NUM_NEURONAS)] * 4 + \
           [(NUM_NEURONAS, OUT_FEATURES)]
    params = []
    for (fan_in, fan_out) in dims:
        key, kw, kb = jax.random.split(key, 3)
        bound = 1.0 / jnp.sqrt(jnp.float32(fan_in))
        w = jax.random.uniform(kw, (fan_in, fan_out), jnp.float32, -bound, bound)
        b = jax.random.uniform(kb, (1, fan_out), jnp.float32, -bound, bound)
        params += [w, b]
    return tuple(params)


def _reference_forward(x, y, t, params):
    inputs = jnp.concatenate([x, y, t], axis=1)
    (w1, b1, w2, b2, w3, b3, w4, b4, w5, b5, wo, bo) = params
    h = jax.nn.sigmoid(inputs @ w1 + b1)
    h = jax.nn.sigmoid(h @ w2 + b2)
    h = jax.nn.sigmoid(h @ w3 + b3)
    h = jax.nn.sigmoid(h @ w4 + b4)
    h = jax.nn.sigmoid(h @ w5 + b5)
    return h @ wo + bo


if __name__ == "__main__":
    key = jax.random.PRNGKey(0)
    k_x, k_y, k_t, k_p = jax.random.split(key, 4)

    N = 512  # collocation points (tile chooser -> tile_b=256, 2 grid steps)
    x = jax.random.uniform(k_x, (N, 1), jnp.float32)
    y = jax.random.uniform(k_y, (N, 1), jnp.float32)
    t = jax.random.uniform(k_t, (N, 1), jnp.float32)

    params = init_params(k_p)
    ref = _reference_forward(x, y, t, params)

    # f32 matmul path (selectable, e.g. if this forward is differentiated for
    # PINN residuals): must match the JAX reference tightly.
    out_f32 = jax.block_until_ready(net_forward(x, y, t, params, use_bf16=False))
    assert out_f32.shape == (N, 1)
    assert jnp.allclose(out_f32, ref, atol=1e-4, rtol=1e-4), "f32 mismatch vs reference"

    # Default bf16-operand path (MXU peak rates); looser tolerance.
    out = jax.block_until_ready(net_forward(x, y, t, params))
    assert out.shape == (N, 1)
    assert jnp.allclose(out, ref, atol=5e-2, rtol=5e-2), "bf16 mismatch vs reference"

    print("KERNEL_OK")
</pallas_src>

<mosaic_0001>
module attributes {stable_mosaic.version = 11 : i64} {
  func.func @_mlp_kernel(%arg0: i32, %arg1: memref<8x256xf32, #tpu.memory_space<vmem>>, %arg2: memref<256x8xf32, #tpu.memory_space<vmem>>, %arg3: memref<256x1xf32, #tpu.memory_space<vmem>>, %arg4: memref<4x256x256xf32, #tpu.memory_space<vmem>>, %arg5: memref<4x256x1xf32, #tpu.memory_space<vmem>>, %arg6: memref<1x256xf32, #tpu.memory_space<vmem>>, %arg7: memref<1x1xf32, #tpu.memory_space<vmem>>, %arg8: memref<1x256xf32, #tpu.memory_space<vmem>>, %arg9: memref<256x256xf32, #tpu.memory_space<vmem>>) attributes {dimension_semantics = [#tpu.dimension_semantics<parallel>], iteration_bounds = array<i64: 2>, scalar_prefetch = 0 : i64, scratch_operands = 1 : i64, tpu.core_type = #tpu.core_type<tc>, window_params = [{transform_indices = @transform_0, window_bounds = array<i64: 8, 256>}, {pipeline_mode = #tpu.pipeline_mode<synchronous>, transform_indices = @transform_1, window_bounds = array<i64: 256, 8>}, {pipeline_mode = #tpu.pipeline_mode<synchronous>, transform_indices = @transform_2, window_bounds = array<i64: 256, 1>}, {pipeline_mode = #tpu.pipeline_mode<synchronous>, transform_indices = @transform_3, window_bounds = array<i64: 4, 256, 256>}, {pipeline_mode = #tpu.pipeline_mode<synchronous>, transform_indices = @transform_4, window_bounds = array<i64: 4, 256, 1>}, {pipeline_mode = #tpu.pipeline_mode<synchronous>, transform_indices = @transform_5, window_bounds = array<i64: 1, 256>}, {pipeline_mode = #tpu.pipeline_mode<synchronous>, transform_indices = @transform_6, window_bounds = array<i64: 1, 1>}, {transform_indices = @transform_7, window_bounds = array<i64: 1, 256>}]} {
    %cst = arith.constant 0.000000e+00 : f32
    %0 = vector.broadcast %cst : f32 to vector<48x256xf32>
    %c208 = arith.constant 208 : index
    %c0 = arith.constant 0 : index
    %1 = vector.load %arg9[%c208, %c0] : memref<256x256xf32, #tpu.memory_space<vmem>>, vector<48x256xf32>
    tpu.vector_store %arg9[%c208, %c0], %0 {strides = array<i32>} : memref<256x256xf32, #tpu.memory_space<vmem>>, vector<48x256xf32>,
    %c0_0 = arith.constant 0 : index
    %c0_1 = arith.constant 0 : index
    %2 = vector.load %arg2[%c0_0, %c0_1] : memref<256x8xf32, #tpu.memory_space<vmem>>, vector<256x8xf32>
    %c0_2 = arith.constant 0 : index
    %c0_3 = arith.constant 0 : index
    %3 = vector.load %arg1[%c0_2, %c0_3] : memref<8x256xf32, #tpu.memory_space<vmem>>, vector<8x256xf32>
    %cst_4 = arith.constant dense<0.000000e+00> : vector<256x256xf32>
    %4 = tpu.matmul %2, %3, %cst_4 {dimension_numbers = #tpu.dot_dimension_numbers<[1], [0], [0], [1], [0, 0, 1, 1], [], []>} : vector<256x8xf32>, vector<8x256xf32>, vector<256x256xf32> -> vector<256x256xf32>
    %c0_5 = arith.constant 0 : index
    %c0_6 = arith.constant 0 : index
    %5 = vector.load %arg3[%c0_5, %c0_6] : memref<256x1xf32, #tpu.memory_space<vmem>>, vector<256x1xf32>
    %6 = vector.broadcast %5 : vector<256x1xf32> to vector<256x256xf32>
    %7 = arith.addf %4, %6 : vector<256x256xf32>
    %8 = vector.extract_strided_slice %7 {offsets = [0, 0], sizes = [208, 256], strides = [1, 1]} : vector<256x256xf32> to vector<208x256xf32>
    %9 = math.tanh %8 : vector<208x256xf32>
    %c0_7 = arith.constant 0 : index
    %c0_8 = arith.constant 0 : index
    %10 = vector.load %arg9[%c0_7, %c0_8] : memref<256x256xf32, #tpu.memory_space<vmem>>, vector<208x256xf32>
    tpu.vector_store %arg9[%c0_7, %c0_8], %9 {strides = array<i32>} : memref<256x256xf32, #tpu.memory_space<vmem>>, vector<208x256xf32>,
    %c0_9 = arith.constant 0 : index
    %c0_10 = arith.constant 0 : index
    %c0_11 = arith.constant 0 : index
    %11 = vector.load %arg4[%c0_9, %c0_10, %c0_11] : memref<4x256x256xf32, #tpu.memory_space<vmem>>, vector<1x256x256xf32>
    %12 = vector.shape_cast %11 : vector<1x256x256xf32> to vector<256x256xf32>
    %c0_12 = arith.constant 0 : index
    %c0_13 = arith.constant 0 : index
    %13 = vector.load %arg9[%c0_12, %c0_13] : memref<256x256xf32, #tpu.memory_space<vmem>>, vector<256x256xf32>
    %cst_14 = arith.constant dense<0.000000e+00> : vector<256x256xf32>
    %14 = tpu.matmul %12, %13, %cst_14 {dimension_numbers = #tpu.dot_dimension_numbers<[1], [0], [0], [1], [0, 0, 1, 1], [], []>} : vector<256x256xf32>, vector<256x256xf32>, vector<256x256xf32> -> vector<256x256xf32>
    %c0_15 = arith.constant 0 : index
    %c0_16 = arith.constant 0 : index
    %c0_17 = arith.constant 0 : index
    %15 = vector.load %arg5[%c0_15, %c0_16, %c0_17] : memref<4x256x1xf32, #tpu.memory_space<vmem>>, vector<1x256x1xf32>
    %16 = vector.shape_cast %15 : vector<1x256x1xf32> to vector<256x1xf32>
    %17 = vector.broadcast %16 : vector<256x1xf32> to vector<256x256xf32>
    %18 = arith.addf %14, %17 : vector<256x256xf32>
    %19 = vector.extract_strided_slice %18 {offsets = [0, 0], sizes = [208, 256], strides = [1, 1]} : vector<256x256xf32> to vector<208x256xf32>
    %20 = math.tanh %19 : vector<208x256xf32>
    %c0_18 = arith.constant 0 : index
    %c0_19 = arith.constant 0 : index
    %21 = vector.load %arg9[%c0_18, %c0_19] : memref<256x256xf32, #tpu.memory_space<vmem>>, vector<208x256xf32>
    tpu.vector_store %arg9[%c0_18, %c0_19], %20 {strides = array<i32>} : memref<256x256xf32, #tpu.memory_space<vmem>>, vector<208x256xf32>,
    %c1 = arith.constant 1 : index
    %c0_20 = arith.constant 0 : index
    %c0_21 = arith.constant 0 : index
    %22 = vector.load %arg4[%c1, %c0_20, %c0_21] : memref<4x256x256xf32, #tpu.memory_space<vmem>>, vector<1x256x256xf32>
    %23 = vector.shape_cast %22 : vector<1x256x256xf32> to vector<256x256xf32>
    %c0_22 = arith.constant 0 : index
    %c0_23 = arith.constant 0 : index
    %24 = vector.load %arg9[%c0_22, %c0_23] : memref<256x256xf32, #tpu.memory_space<vmem>>, vector<256x256xf32>
    %cst_24 = arith.constant dense<0.000000e+00> : vector<256x256xf32>
    %25 = tpu.matmul %23, %24, %cst_24 {dimension_numbers = #tpu.dot_dimension_numbers<[1], [0], [0], [1], [0, 0, 1, 1], [], []>} : vector<256x256xf32>, vector<256x256xf32>, vector<256x256xf32> -> vector<256x256xf32>
    %c1_25 = arith.constant 1 : index
    %c0_26 = arith.constant 0 : index
    %c0_27 = arith.constant 0 : index
    %26 = vector.load %arg5[%c1_25, %c0_26, %c0_27] : memref<4x256x1xf32, #tpu.memory_space<vmem>>, vector<1x256x1xf32>
    %27 = vector.shape_cast %26 : vector<1x256x1xf32> to vector<256x1xf32>
    %28 = vector.broadcast %27 : vector<256x1xf32> to vector<256x256xf32>
    %29 = arith.addf %25, %28 : vector<256x256xf32>
    %30 = vector.extract_strided_slice %29 {offsets = [0, 0], sizes = [208, 256], strides = [1, 1]} : vector<256x256xf32> to vector<208x256xf32>
    %31 = math.tanh %30 : vector<208x256xf32>
    %c0_28 = arith.constant 0 : index
    %c0_29 = arith.constant 0 : index
    %32 = vector.load %arg9[%c0_28, %c0_29] : memref<256x256xf32, #tpu.memory_space<vmem>>, vector<208x256xf32>
    tpu.vector_store %arg9[%c0_28, %c0_29], %31 {strides = array<i32>} : memref<256x256xf32, #tpu.memory_space<vmem>>, vector<208x256xf32>,
    %c2 = arith.constant 2 : index
    %c0_30 = arith.constant 0 : index
    %c0_31 = arith.constant 0 : index
    %33 = vector.load %arg4[%c2, %c0_30, %c0_31] : memref<4x256x256xf32, #tpu.memory_space<vmem>>, vector<1x256x256xf32>
    %34 = vector.shape_cast %33 : vector<1x256x256xf32> to vector<256x256xf32>
    %c0_32 = arith.constant 0 : index
    %c0_33 = arith.constant 0 : index
    %35 = vector.load %arg9[%c0_32, %c0_33] : memref<256x256xf32, #tpu.memory_space<vmem>>, vector<256x256xf32>
    %cst_34 = arith.constant dense<0.000000e+00> : vector<256x256xf32>
    %36 = tpu.matmul %34, %35, %cst_34 {dimension_numbers = #tpu.dot_dimension_numbers<[1], [0], [0], [1], [0, 0, 1, 1], [], []>} : vector<256x256xf32>, vector<256x256xf32>, vector<256x256xf32> -> vector<256x256xf32>
    %c2_35 = arith.constant 2 : index
    %c0_36 = arith.constant 0 : index
    %c0_37 = arith.constant 0 : index
    %37 = vector.load %arg5[%c2_35, %c0_36, %c0_37] : memref<4x256x1xf32, #tpu.memory_space<vmem>>, vector<1x256x1xf32>
    %38 = vector.shape_cast %37 : vector<1x256x1xf32> to vector<256x1xf32>
    %39 = vector.broadcast %38 : vector<256x1xf32> to vector<256x256xf32>
    %40 = arith.addf %36, %39 : vector<256x256xf32>
    %41 = vector.extract_strided_slice %40 {offsets = [0, 0], sizes = [208, 256], strides = [1, 1]} : vector<256x256xf32> to vector<208x256xf32>
    %42 = math.tanh %41 : vector<208x256xf32>
    %c0_38 = arith.constant 0 : index
    %c0_39 = arith.constant 0 : index
    %43 = vector.load %arg9[%c0_38, %c0_39] : memref<256x256xf32, #tpu.memory_space<vmem>>, vector<208x256xf32>
    tpu.vector_store %arg9[%c0_38, %c0_39], %42 {strides = array<i32>} : memref<256x256xf32, #tpu.memory_space<vmem>>, vector<208x256xf32>,
    %c3 = arith.constant 3 : index
    %c0_40 = arith.constant 0 : index
    %c0_41 = arith.constant 0 : index
    %44 = vector.load %arg4[%c3, %c0_40, %c0_41] : memref<4x256x256xf32, #tpu.memory_space<vmem>>, vector<1x256x256xf32>
    %45 = vector.shape_cast %44 : vector<1x256x256xf32> to vector<256x256xf32>
    %c0_42 = arith.constant 0 : index
    %c0_43 = arith.constant 0 : index
    %46 = vector.load %arg9[%c0_42, %c0_43] : memref<256x256xf32, #tpu.memory_space<vmem>>, vector<256x256xf32>
    %cst_44 = arith.constant dense<0.000000e+00> : vector<256x256xf32>
    %47 = tpu.matmul %45, %46, %cst_44 {dimension_numbers = #tpu.dot_dimension_numbers<[1], [0], [0], [1], [0, 0, 1, 1], [], []>} : vector<256x256xf32>, vector<256x256xf32>, vector<256x256xf32> -> vector<256x256xf32>
    %c3_45 = arith.constant 3 : index
    %c0_46 = arith.constant 0 : index
    %c0_47 = arith.constant 0 : index
    %48 = vector.load %arg5[%c3_45, %c0_46, %c0_47] : memref<4x256x1xf32, #tpu.memory_space<vmem>>, vector<1x256x1xf32>
    %49 = vector.shape_cast %48 : vector<1x256x1xf32> to vector<256x1xf32>
    %50 = vector.broadcast %49 : vector<256x1xf32> to vector<256x256xf32>
    %51 = arith.addf %47, %50 : vector<256x256xf32>
    %52 = vector.extract_strided_slice %51 {offsets = [0, 0], sizes = [208, 256], strides = [1, 1]} : vector<256x256xf32> to vector<208x256xf32>
    %53 = math.tanh %52 : vector<208x256xf32>
    %c0_48 = arith.constant 0 : index
    %c0_49 = arith.constant 0 : index
    %54 = vector.load %arg9[%c0_48, %c0_49] : memref<256x256xf32, #tpu.memory_space<vmem>>, vector<208x256xf32>
    tpu.vector_store %arg9[%c0_48, %c0_49], %53 {strides = array<i32>} : memref<256x256xf32, #tpu.memory_space<vmem>>, vector<208x256xf32>,
    %c0_50 = arith.constant 0 : index
    %c0_51 = arith.constant 0 : index
    %55 = vector.load %arg6[%c0_50, %c0_51] : memref<1x256xf32, #tpu.memory_space<vmem>>, vector<1x256xf32>
    %c0_52 = arith.constant 0 : index
    %c0_53 = arith.constant 0 : index
    %56 = vector.load %arg9[%c0_52, %c0_53] : memref<256x256xf32, #tpu.memory_space<vmem>>, vector<256x256xf32>
    %cst_54 = arith.constant dense<0.000000e+00> : vector<1x256xf32>
    %57 = tpu.matmul %55, %56, %cst_54 {dimension_numbers = #tpu.dot_dimension_numbers<[1], [0], [0], [1], [0, 0, 1, 1], [], []>} : vector<1x256xf32>, vector<256x256xf32>, vector<1x256xf32> -> vector<1x256xf32>
    %c0_55 = arith.constant 0 : index
    %c0_56 = arith.constant 0 : index
    %58 = vector.load %arg7[%c0_55, %c0_56] : memref<1x1xf32, #tpu.memory_space<vmem>>, vector<1x1xf32>
    %59 = vector.broadcast %58 : vector<1x1xf32> to vector<1x256xf32>
    %60 = arith.addf %57, %59 : vector<1x256xf32>
    %c0_57 = arith.constant 0 : index
    %c0_58 = arith.constant 0 : index
    %61 = vector.load %arg8[%c0_57, %c0_58] : memref<1x256xf32, #tpu.memory_space<vmem>>, vector<1x256xf32>
    tpu.vector_store %arg8[%c0_57, %c0_58], %60 {strides = array<i32>} : memref<1x256xf32, #tpu.memory_space<vmem>>, vector<1x256xf32>,
    return
  }
  func.func @transform_0(%arg0: i32) -> (i32, i32) {
    %c0_i32 = arith.constant 0 : i32
    %c0_i32_0 = arith.constant 0 : i32
    return %c0_i32, %arg0 : i32, i32
  }
  func.func @transform_1(%arg0: i32) -> (i32, i32) {
    %c0_i32 = arith.constant 0 : i32
    %c0_i32_0 = arith.constant 0 : i32
    %c0_i32_1 = arith.constant 0 : i32
    return %c0_i32, %c0_i32_0 : i32, i32
  }
  func.func @transform_2(%arg0: i32) -> (i32, i32) {
    %c0_i32 = arith.constant 0 : i32
    %c0_i32_0 = arith.constant 0 : i32
    %c0_i32_1 = arith.constant 0 : i32
    return %c0_i32, %c0_i32_0 : i32, i32
  }
  func.func @transform_3(%arg0: i32) -> (i32, i32, i32) {
    %c0_i32 = arith.constant 0 : i32
    %c0_i32_0 = arith.constant 0 : i32
    %c0_i32_1 = arith.constant 0 : i32
    %c0_i32_2 = arith.constant 0 : i32
    return %c0_i32, %c0_i32_0, %c0_i32_1 : i32, i32, i32
  }
  func.func @transform_4(%arg0: i32) -> (i32, i32, i32) {
    %c0_i32 = arith.constant 0 : i32
    %c0_i32_0 = arith.constant 0 : i32
    %c0_i32_1 = arith.constant 0 : i32
    %c0_i32_2 = arith.constant 0 : i32
    return %c0_i32, %c0_i32_0, %c0_i32_1 : i32, i32, i32
  }
  func.func @transform_5(%arg0: i32) -> (i32, i32) {
    %c0_i32 = arith.constant 0 : i32
    %c0_i32_0 = arith.constant 0 : i32
    %c0_i32_1 = arith.constant 0 : i32
    return %c0_i32, %c0_i32_0 : i32, i32
  }
  func.func @transform_6(%arg0: i32) -> (i32, i32) {
    %c0_i32 = arith.constant 0 : i32
    %c0_i32_0 = arith.constant 0 : i32
    %c0_i32_1 = arith.constant 0 : i32
    return %c0_i32, %c0_i32_0 : i32, i32
  }
  func.func @transform_7(%arg0: i32) -> (i32, i32) {
    %c0_i32 = arith.constant 0 : i32
    %c0_i32_0 = arith.constant 0 : i32
    return %c0_i32, %arg0 : i32, i32
  }
}

</mosaic_0001>

<bundles_post_ra>
// kernel: tpu_custom_call.1
= control target key start
LH: loop header
LB: loop body
LE: loop exit
PB: predicated region body
PF: predicated region fallthrough
CT: control target
= control target key end

     0   :  { %s5911_s0 = inlined_call_operand.vmem [shape: f32[8,512], index: 0, kind: input, shape index: {}]   ;;  %s5912_s1 = inlined_call_operand.vmem [shape: f32[256,8], index: 1, kind: input, shape index: {}]   ;;  %s5913_s2 = inlined_call_operand.vmem [shape: f32[256,1], index: 2, kind: input, shape index: {}]   ;;  %s5914_s3 = inlined_call_operand.hbm [shape: f32[4,256,256], index: 3, kind: input, shape index: {}]   ;;  %s5915_s4 = inlined_call_operand.vmem [shape: f32[4,256,1], index: 4, kind: input, shape index: {}]   ;;  %s5916_s5 = inlined_call_operand.vmem [shape: f32[1,256], index: 5, kind: input, shape index: {}]   ;;  %s5917_s6 = inlined_call_operand.<no memory space> [shape: f32[1,1], index: 6, kind: input, shape index: {}]   ;;  %s5918_s7 = inlined_call_operand.hbm [shape: f32[1,512], index: 7, kind: output, shape index: {}]  }
   0x1   :  { %v12_v0 = vstv %s5917_s6 }
   0x2   :  { %13 = vst [vmem:[#allocation3] sm:$0x1] %v12_v0 }
   0x3   :  { %14 = vsyncpa [#allocation5], 0 }
   0x4   :  { %15 = vsyncpa [#allocation6], 0 }
   0x5   :  { %17 = vsyncpa [#allocation6 + $0x1], 0  ;;  %s5027_s26 = smov 0   ;;  %s5029_s27 = smov 0  }
   0x6   :  { %s5031_s28 = smov 0   ;;  %s5033_s29 = smov 0  }
   0x7 LB: > { %s5048_s6 = sadd.s32 4294967295, %s4975_s29   ;;  %s3899_s30 = sadd.s32 4294967294, %s4975_s29   ;;  %s4975_s29 = sphi %s5033_s29, %s5934_s29   ;;  %s4971_s28 = sphi %s5031_s28, %s5933_s28   ;;  %s4967_s27 = sphi %s5029_s27, %s5932_s27   ;;  %s4963_s26 = sphi %s5027_s26, %s5931_s26  }
   0x8   : > { %s5052_s8 = sadd.s32 1, %s4975_s29   ;;  %s182_s9 = sadd.s32 1, %s4971_s28 }
   0x9   : > { %s179_s10 = ssub.s32 %s4975_s29, %s5052_s8  ;;  %p192_p0 = scmp.ne.s32.totalorder %s4971_s28, %s4967_s27 }
   0xa   : > { %p180_p1 = scmp.eq.s32.totalorder %s179_s10, 0  ;;  %p193_p2 = scmp.eq.s32.totalorder %s5048_s6, 1 }
   0xb   : > { %p198_p3 = scmp.ne.s32.totalorder %s4967_s27, %s4963_s26  ;;  %p199_p4 = scmp.eq.s32.totalorder %s3899_s30, 1 }
   0xc   : > { %s5063_s11 = scalar_select %p180_p1, %s4971_s28, %s182_s9  }
   0xd   : > { %p5065_p5 = por %p193_p2, %p192_p0  ;;  %p5069_p6 = por %p199_p4, %p198_p3 }
   0xe   : > { %p3900_p7 = scmp.ge.s32.totalorder %s4975_s29, 1  ;;  %p206_p8 = scmp.lt.s32.totalorder %s4975_s29, 3 }
   0xf   : > { %s5922_s12 = scalar_select %p5065_p5, 1, 0 }
  0x10   : > { %s5923_s13 = scalar_select %p5069_p6, 1, 0 }
  0x11   : > { %p5919_p9 = scmp.eq.s32.totalorder %s5048_s6, 0  ;;  %p5076_p10 = pnand %p3900_p7, %p206_p8 }
  0x12   : > { %s4977_s15 = smov [#allocation4]   ;;  %s4881_s20 = scalar_lea.hbm %s5914_s3, 32768 }
  0x13   : > { %s5924_s14 = scalar_select %p5076_p10, 1, 0 }
  0x14   : > { %s224_s16 = sshll.u32 %s4977_s15, 4  ;;  %p4310_p11 = pneg %p5076_p10  ;;  %s225_s16 = int_to_ptr.vmem [resolvable:$true] %s224_s16 }
  0x15   : > { %p4882_p13 = scmp.ne.s32.totalorder %s5914_s3, %s4881_s20  ;;  %p4888_p3 = scmp.lt.u32.totalorder %s4881_s20, %s5914_s3 }
  0x16   : > { %p5084_p12 = pnand %p5919_p9, %p4310_p11 }
  0x18   : > { %p4883_p0 = pneg %p5084_p12 }
  0x1a   : > { %p4884_p1 = pnand %p4883_p0, %p4882_p13 }
  0x1c   : > { %p4885_p2 = pneg %p4884_p1 }
  0x1e   : > { %p4890_p4 = pnand %p4888_p3, %p4885_p2 }
  0x20   : > { %4893 = shalt.err (!%p4890_p4)
}
  0x21   : > { %s4894_s25 = scalar_lea.vmem %s225_s16, 32768  ;;  %p4902_p9 = scmp.lt.s32.totalorder %s225_s16, %s225_s16 }
  0x22   : > { %p4895_p7 = scmp.ne.s32.totalorder %s225_s16, %s4894_s25  ;;  %p4903_p6 = scmp.lt.s32.totalorder %s4894_s25, %s4894_s25 }
  0x24   : > { %p4897_p8 = pnand %p4895_p7, %p4883_p0  ;;  %p4904_p5 = por %p4903_p6, %p4902_p9 }
  0x26   : > { %p4898_p11 = pneg %p4897_p8 }
  0x28   : > { %p4905_p10 = pnand %p4904_p5, %p4898_p11 }
  0x2a   : > { %4908 = shalt.err (!%p4905_p10)
}
  0x2b   : > { %s4978_s30 = smov 256   ;;  %s4979_s9 = smov 16  }
  0x2c   : > { %4313 = dma.hbm_to_vmem [thread:$0]  (!%p5084_p12), %s5914_s3, 32768, %s225_s16, [#allocation5], %s4978_s30, %s4978_s30, %s4979_s9  }
  0x2d   : > { %p5926_p13 = scmp.ne.s32.totalorder %s5924_s14, 0 }
  0x2e   : > { %p5927_p1 = scmp.eq.s32.totalorder (!%p5926_p13), %s5048_s6, 0 }
  0x2f   : > { %258 = sbr.rel (%p5926_p13) target bundleno = 1939 (0x793), region = 48 }
  0x36   : > { %4954 = dma.done.wait (%p5927_p1), [#allocation5], 32768   ;;  %p5928_p0 = pmov %p5927_p1 }
  0x37   : > { %s3906_s18 = sshll.u32 %s5048_s6, 1  ;;  %v4980_v1 = vmov 0   ;;  %v4981_v2 = vmov 0.0   ;;  %v345_v3 = vld [vmem:[%s5913_s2 + $0x10] sm:$0xff]  ;;  %v343_v4 = vld [vmem:[%s5913_s2] sm:$0xff]  ;;  %vm529_vm0 = vcmask 64512  }
  0x38   : > { %4956 = vsyncadd (%p5928_p0), [#allocation5], 4294934528  ;;  %4360 = vset.pattern.permute.xlu1 %v4980_v1  ;;  %4359 = vset.pattern.permute.xlu0 %v4980_v1  ;;  %p291_p5 = scmp.lt.s32.totalorder %s3906_s18, 3  ;;  %v309_v7 = vld [vmem:[%s5912_s1] sm:$0xff]  ;;  %v326_v8 = vld [vmem:[%s5912_s1 + $0x88] sm:$0xff]  ;;  %s4041_s17 = sshll.u32 %s5048_s6, 5 }
  0x39   : > { %690 = vmatprep.mubr.f32.mxu0 %v4981_v2  ;;  %792 = vmatprep.mubr.f32.mxu1 %v4981_v2  ;;  %v346_v9 = vld [vmem:[%s5913_s2 + $0x18] sm:$0xff]  ;;  %v344_v10 = vld [vmem:[%s5913_s2 + $0x8] sm:$0xff]  ;;  %v327_v12 = vld [vmem:[%s5912_s1 + $0x90] sm:$0xff]  ;;  %s5869_s23 = scalar_lea.hbm %s5918_s7, %s4041_s17  ;;  %p5929_p9 = scmp.ne.s32.totalorder %s5922_s12, 0 }
  0x3a   : > { %s5936_s18 = smov (!%p291_p5, %s3906_s18), 3  ;;  %387 = vperm.xlu1 %4360, %v345_v3   ;;  %377 = vperm.xlu0 %4359, %v343_v4   ;;  %v310_v11 = vld [vmem:[%s5912_s1 + $0x8] sm:$0xff]  ;;  %v347_v14 = vld [vmem:[%s5913_s2 + $0x20] sm:$0xff]  ;;  %v311_v15 = vld [vmem:[%s5912_s1 + $0x10] sm:$0xff]  ;;  %s4983_s6 = smov [#allocation7]  }
  0x3b   : > { %s3907_s14 = sshll.u32 %s5936_s18, 3  ;;  %v348_v13 = vld [vmem:[%s5913_s2 + $0x28] sm:$0xff]  ;;  %v328_v16 = vld [vmem:[%s5912_s1 + $0x98] sm:$0xff]  ;;  %v349_v18 = vld [vmem:[%s5913_s2 + $0x30] sm:$0xff]  ;;  %s4913_s30 = sshll.u32 %s4983_s6, 4  ;;  %s4914_s30 = int_to_ptr.vmem [resolvable:$false] %s4913_s30 }
  0x3c   : > { %s294_s19 = scalar_lea.vmem %s5911_s0, %s3907_s14  ;;  %v350_v17 = vld [vmem:[%s5913_s2 + $0x38] sm:$0xff]  ;;  %v329_v20 = vld [vmem:[%s5912_s1 + $0xa0] sm:$0xff]  ;;  %v352_v21 = vld [vmem:[%s5913_s2 + $0x48] sm:$0xff]  ;;  %s287_s14 = sand.u32 1, %s4967_s27  }
  0x3d   : > { %v342_v5 = vld [vmem:[%s294_s19 + $0x8] sm:$0xff]  ;;  %v341_v6 = vld [vmem:[%s294_s19] sm:$0xff]  ;;  %v312_v19 = vld [vmem:[%s5912_s1 + $0x18] sm:$0xff]  ;;  %s3905_s16 = sshll.u32 %s287_s14, 1  ;;  %s3814_s24 = scalar_lea.sflag [#allocation6], %s287_s14 }
  0x3e   : > { %626 = vmatprep.subr.mxu0 %v342_v5  ;;  %4302 = vmatprep.subr.mxu1 %v342_v5  ;;  %v351_v22 = vld [vmem:[%s5913_s2 + $0x40] sm:$0xff]  ;;  %v330_v24 = vld [vmem:[%s5912_s1 + $0xa8] sm:$0xff]  ;;  %v354_v25 = vld [vmem:[%s5913_s2 + $0x58] sm:$0xff]  ;;  %s289_s19 = scalar_lea.vmem [#allocation7], %s3905_s16  ;;  %s4915_s9 = scalar_lea.vmem %s4914_s30, 64 }
  0x3f   : > { %627 = vmatpush1.msra.mxu0 %v341_v6  ;;  %4303 = vmatpush1.msra.mxu1 %v341_v6  ;;  %v313_v23 = vld [vmem:[%s5912_s1 + $0x20] sm:$0xff]  ;;  %v353_v26 = vld [vmem:[%s5913_s2 + $0x50] sm:$0xff]  ;;  %v314_v27 = vld [vmem:[%s5912_s1 + $0x28] sm:$0xff]  ;;  %s3828_s20 = sshll.u32 %s289_s19, 4  ;;  %s5871_s20 = int_to_ptr.vmem [resolvable:$true] %s3828_s20 }
  0x40   : > { %3908 = vmatmul.mubr.msk.f32.vlgmr.msra.gmra.mrb[0].mxu0 %vm529_vm0, %v309_v7  ;;  %3925 = vmatmul.mubr.msk.f32.vlgmr.msra.gmra.mrb[0].mxu1 %vm529_vm0, %v326_v8  ;;  %v331_v28 = vld [vmem:[%s5912_s1 + $0xb0] sm:$0xff]  ;;  %v356_v29 = vld [vmem:[%s5913_s2 + $0x68] sm:$0xff]  ;;  %v355_v30 = vld [vmem:[%s5913_s2 + $0x60] sm:$0xff]  ;;  %s4909_s25 = scalar_lea.vmem %s5871_s20, 32  ;;  %p4916_p2 = scmp.lt.s32.totalorder %s5871_s20, %s4914_s30 }
  0x41   : > { %392 = vperm.xlu1 %4360, %v346_v9   ;;  %382 = vperm.xlu0 %4359, %v344_v10   ;;  %v315_v31 = vld [vmem:[%s5912_s1 + $0x30] sm:$0xff]  ;;  %v332_v32 = vld [vmem:[%s5912_s1 + $0xb8] sm:$0xff]  ;;  %v333_v36 = vld [vmem:[%s5912_s1 + $0xc0] sm:$0xff]  ;;  %p4910_p6 = scmp.ne.s32.totalorder %s5871_s20, %s4909_s25  ;;  %p4917_p3 = scmp.lt.s32.totalorder %s4915_s9, %s4909_s25 }
  0x42   : > { %696 = vmatprep.mubr.f32.mxu0 %v4981_v2  ;;  %798 = vmatprep.mubr.f32.mxu1 %v4981_v2  ;;  %v358_v33 = vld [vmem:[%s5913_s2 + $0x78] sm:$0xff]  ;;  %v357_v34 = vld [vmem:[%s5913_s2 + $0x70] sm:$0xff]  ;;  %v360_v37 = vld [vmem:[%s5913_s2 + $0x88] sm:$0xff] }
  0x43   : > { %v316_v35 = vld [vmem:[%s5912_s1 + $0x38] sm:$0xff]  ;;  %v359_v38 = vld [vmem:[%s5913_s2 + $0x80] sm:$0xff]  ;;  %v334_v40 = vld [vmem:[%s5912_s1 + $0xc8] sm:$0xff]  ;;  %p4911_p10 = pnand %p4910_p6, %p5929_p9  ;;  %p4918_p4 = por %p4917_p3, %p4916_p2 }
  0x44   : > { %3909 = vmatmul.mubr.msk.f32.gmra.mrb[2].mxu0 %vm529_vm0, %v310_v11  ;;  %3926 = vmatmul.mubr.msk.f32.gmra.mrb[2].mxu1 %vm529_vm0, %v327_v12  ;;  %v317_v39 = vld [vmem:[%s5912_s1 + $0x40] sm:$0xff]  ;;  %v362_v41 = vld [vmem:[%s5913_s2 + $0x98] sm:$0xff]  ;;  %v361_v42 = vld [vmem:[%s5913_s2 + $0x90] sm:$0xff] }
  0x45   : > { %402 = vperm.xlu1 %4360, %v348_v13   ;;  %397 = vperm.xlu0 %4359, %v347_v14   ;;  %v318_v43 = vld [vmem:[%s5912_s1 + $0x48] sm:$0xff]  ;;  %v363_v45 = vld [vmem:[%s5913_s2 + $0xa0] sm:$0xff]  ;;  %v319_v46 = vld [vmem:[%s5912_s1 + $0x50] sm:$0xff]  ;;  %p4912_p12 = pneg %p4911_p10 }
  0x46   : > { %702 = vmatprep.mubr.f32.mxu0 %v4981_v2  ;;  %804 = vmatprep.mubr.f32.mxu1 %v4981_v2  ;;  %v364_v44 = vld [vmem:[%s5913_s2 + $0xa8] sm:$0xff]  ;;  %v366_v47 = vld [vmem:[%s5913_s2 + $0xb8] sm:$0xff]  ;;  %v365_v48 = vld [vmem:[%s5913_s2 + $0xb0] sm:$0xff] }
  0x47   : > { %v320_v49 = vld [vmem:[%s5912_s1 + $0x58] sm:$0xff]  ;;  %v368_v50 = vld [vmem:[%s5913_s2 + $0xc8] sm:$0xff]  ;;  %v367_v51 = vld [vmem:[%s5913_s2 + $0xc0] sm:$0xff]  ;;  %p4919_p7 = pnand %p4918_p4, %p4912_p12 }
  0x48   : > { %3910 = vmatmul.mubr.msk.f32.gmra.mrb[4].mxu0 %vm529_vm0, %v311_v15  ;;  %3927 = vmatmul.mubr.msk.f32.gmra.mrb[4].mxu1 %vm529_vm0, %v328_v16  ;;  %v321_v52 = vld [vmem:[%s5912_s1 + $0x60] sm:$0xff]  ;;  %v1104_v53 = vld [vmem:[%s5915_s4 + $0x8] sm:$0xff]  ;;  %v1106_v56 = vld [vmem:[%s5915_s4 + $0x18] sm:$0xff] }
  0x49   : > { %412 = vperm.xlu1 %4360, %v350_v17   ;;  %407 = vperm.xlu0 %4359, %v349_v18   ;;  %v1103_v54 = vld [vmem:[%s5915_s4] sm:$0xff]  ;;  %v322_v55 = vld [vmem:[%s5912_s1 + $0x68] sm:$0xff]  ;;  %v1105_v57 = vld [vmem:[%s5915_s4 + $0x10] sm:$0xff] }
  0x4a   : > { %708 = vmatprep.mubr.f32.mxu0 %v4981_v2  ;;  %810 = vmatprep.mubr.f32.mxu1 %v4981_v2  ;;  %v323_v58 = vld [vmem:[%s5912_s1 + $0x70] sm:$0xff]  ;;  %v1108_v59 = vld [vmem:[%s5915_s4 + $0x28] sm:$0xff]  ;;  %v1107_v60 = vld [vmem:[%s5915_s4 + $0x20] sm:$0xff] }
  0x4b   : > { %v324_v61 = vld [vmem:[%s5912_s1 + $0x78] sm:$0xff]  ;;  %v1109_v63 = vld [vmem:[%s5915_s4 + $0x30] sm:$0xff]  ;;  %v325_v0 = vld [vmem:[%s5912_s1 + $0x80] sm:$0xff] }
  0x4c   : > { %3911 = vmatmul.mubr.msk.f32.gmra.mrb[6].mxu0 %vm529_vm0, %v312_v19  ;;  %3928 = vmatmul.mubr.msk.f32.gmra.mrb[6].mxu1 %vm529_vm0, %v329_v20  ;;  %v1110_v62 = vld [vmem:[%s5915_s4 + $0x38] sm:$0xff]  ;;  %v1112_v1 = vld [vmem:[%s5915_s4 + $0x48] sm:$0xff]  ;;  %v1111_v3 = vld [vmem:[%s5915_s4 + $0x40] sm:$0xff] }
  0x4d   : > { %422 = vperm.xlu1 %4360, %v352_v21   ;;  %417 = vperm.xlu0 %4359, %v351_v22   ;;  %v1114_v4 = vld [vmem:[%s5915_s4 + $0x58] sm:$0xff]  ;;  %v1113_v5 = vld [vmem:[%s5915_s4 + $0x50] sm:$0xff]  ;;  %v1116_v6 = vld [vmem:[%s5915_s4 + $0x68] sm:$0xff] }
  0x4e   : > { %714 = vmatprep.mubr.f32.mxu0 %v4981_v2  ;;  %816 = vmatprep.mubr.f32.mxu1 %v4981_v2  ;;  %v1115_v7 = vld [vmem:[%s5915_s4 + $0x60] sm:$0xff]  ;;  %v1118_v8 = vld [vmem:[%s5915_s4 + $0x78] sm:$0xff]  ;;  %v1117_v9 = vld [vmem:[%s5915_s4 + $0x70] sm:$0xff] }
  0x4f   : > { %v1120_v10 = vld [vmem:[%s5915_s4 + $0x88] sm:$0xff]  ;;  %v1119_v11 = vld [vmem:[%s5915_s4 + $0x80] sm:$0xff]  ;;  %v1122_v12 = vld [vmem:[%s5915_s4 + $0x98] sm:$0xff] }
  0x50   : > { %3912 = vmatmul.mubr.msk.f32.gmra.mrb[8].mxu0 %vm529_vm0, %v313_v23  ;;  %3929 = vmatmul.mubr.msk.f32.gmra.mrb[8].mxu1 %vm529_vm0, %v330_v24  ;;  %v1121_v13 = vld [vmem:[%s5915_s4 + $0x90] sm:$0xff]  ;;  %v1124_v14 = vld [vmem:[%s5915_s4 + $0xa8] sm:$0xff]  ;;  %v1123_v15 = vld [vmem:[%s5915_s4 + $0xa0] sm:$0xff] }
  0x51   : > { %432 = vperm.xlu1 %4360, %v354_v25   ;;  %427 = vperm.xlu0 %4359, %v353_v26   ;;  %v1126_v16 = vld [vmem:[%s5915_s4 + $0xb8] sm:$0xff]  ;;  %v1125_v17 = vld [vmem:[%s5915_s4 + $0xb0] sm:$0xff]  ;;  %v1128_v18 = vld [vmem:[%s5915_s4 + $0xc8] sm:$0xff] }
  0x52   : > { %720 = vmatprep.mubr.f32.mxu0 %v4981_v2  ;;  %822 = vmatprep.mubr.f32.mxu1 %v4981_v2  ;;  %v1127_v19 = vld [vmem:[%s5915_s4 + $0xc0] sm:$0xff]  ;;  %v3941_v20 = vld [vmem:[%s5915_s4 + $0x108] sm:$0xff]  ;;  %v3943_v22 = vld [vmem:[%s5915_s4 + $0x118] sm:$0xff] }
  0x53   : > { %v3940_v21 = vld [vmem:[%s5915_s4 + $0x100] sm:$0xff]  ;;  %v3942_v23 = vld [vmem:[%s5915_s4 + $0x110] sm:$0xff]  ;;  %v3945_v24 = vld [vmem:[%s5915_s4 + $0x128] sm:$0xff] }
  0x54   : > { %3913 = vmatmul.mubr.msk.f32.gmra.mrb[10].mxu0 %vm529_vm0, %v314_v27  ;;  %3930 = vmatmul.mubr.msk.f32.gmra.mrb[10].mxu1 %vm529_vm0, %v331_v28  ;;  %v3944_v25 = vld [vmem:[%s5915_s4 + $0x120] sm:$0xff]  ;;  %v3947_v26 = vld [vmem:[%s5915_s4 + $0x138] sm:$0xff]  ;;  %v3946_v27 = vld [vmem:[%s5915_s4 + $0x130] sm:$0xff] }
  0x55   : > { %442 = vperm.xlu1 %4360, %v356_v29   ;;  %437 = vperm.xlu0 %4359, %v355_v30   ;;  %v3949_v28 = vld [vmem:[%s5915_s4 + $0x148] sm:$0xff]  ;;  %v3948_v29 = vld [vmem:[%s5915_s4 + $0x140] sm:$0xff]  ;;  %v3951_v30 = vld [vmem:[%s5915_s4 + $0x158] sm:$0xff] }
  0x56   : > { %726 = vmatprep.mubr.f32.mxu0 %v4981_v2  ;;  %828 = vmatprep.mubr.f32.mxu1 %v4981_v2 }
  0x58   : > { %3914 = vmatmul.mubr.msk.f32.gmra.mrb[12].mxu0 %vm529_vm0, %v315_v31  ;;  %3931 = vmatmul.mubr.msk.f32.gmra.mrb[12].mxu1 %vm529_vm0, %v332_v32  ;;  %v3950_v31 = vld [vmem:[%s5915_s4 + $0x150] sm:$0xff]  ;;  %v3953_v32 = vld [vmem:[%s5915_s4 + $0x168] sm:$0xff] }
  0x59   : > { %452 = vperm.xlu1 %4360, %v358_v33   ;;  %447 = vperm.xlu0 %4359, %v357_v34   ;;  %v3952_v33 = vld [vmem:[%s5915_s4 + $0x160] sm:$0xff]  ;;  %v3955_v34 = vld [vmem:[%s5915_s4 + $0x178] sm:$0xff] }
  0x5a   : > { %732 = vmatprep.mubr.f32.mxu0 %v4981_v2  ;;  %834 = vmatprep.mubr.f32.mxu1 %v4981_v2 }
  0x5c   : > { %3915 = vmatmul.mubr.msk.f32.gmra.mrb[14].mxu0 %vm529_vm0, %v316_v35  ;;  %3932 = vmatmul.mubr.msk.f32.gmra.mrb[14].mxu1 %vm529_vm0, %v333_v36  ;;  %v3954_v35 = vld [vmem:[%s5915_s4 + $0x170] sm:$0xff]  ;;  %v3957_v36 = vld [vmem:[%s5915_s4 + $0x188] sm:$0xff] }
  0x5d   : > { %462 = vperm.xlu1 %4360, %v360_v37   ;;  %457 = vperm.xlu0 %4359, %v359_v38   ;;  %v3956_v37 = vld [vmem:[%s5915_s4 + $0x180] sm:$0xff]  ;;  %v3959_v38 = vld [vmem:[%s5915_s4 + $0x198] sm:$0xff] }
  0x5e   : > { %738 = vmatprep.mubr.f32.mxu0 %v4981_v2  ;;  %840 = vmatprep.mubr.f32.mxu1 %v4981_v2 }
  0x60   : > { %3916 = vmatmul.mubr.msk.f32.gmra.mrb[16].mxu0 %vm529_vm0, %v317_v39  ;;  %3933 = vmatmul.mubr.msk.f32.gmra.mrb[16].mxu1 %vm529_vm0, %v334_v40  ;;  %v3958_v39 = vld [vmem:[%s5915_s4 + $0x190] sm:$0xff]  ;;  %v3961_v40 = vld [vmem:[%s5915_s4 + $0x1a8] sm:$0xff] }
  0x61   : > { %472 = vperm.xlu1 %4360, %v362_v41   ;;  %467 = vperm.xlu0 %4359, %v361_v42   ;;  %v3960_v41 = vld [vmem:[%s5915_s4 + $0x1a0] sm:$0xff]  ;;  %v3963_v42 = vld [vmem:[%s5915_s4 + $0x1b8] sm:$0xff] }
  0x62   : > { %744 = vmatprep.mubr.f32.mxu0 %v4981_v2  ;;  %846 = vmatprep.mubr.f32.mxu1 %v4981_v2 }
  0x64   : > { %3917 = vmatmul.mubr.msk.f32.gmra.mrb[18].mxu0 %vm529_vm0, %v318_v43  ;;  %v3962_v43 = vld [vmem:[%s5915_s4 + $0x1b0] sm:$0xff] }
  0x65   : > { %482 = vperm.xlu1 %4360, %v364_v44   ;;  %477 = vperm.xlu0 %4359, %v363_v45   ;;  %v3965_v44 = vld [vmem:[%s5915_s4 + $0x1c8] sm:$0xff]  ;;  %v3964_v45 = vld [vmem:[%s5915_s4 + $0x1c0] sm:$0xff] }
  0x66   : > { %750 = vmatprep.mubr.f32.mxu0 %v4981_v2 }
  0x68   : > { %3918 = vmatmul.mubr.msk.f32.gmra.mrb[20].mxu0 %vm529_vm0, %v319_v46  ;;  %v3973_v46 = vld [vmem:[%s5915_s4 + $0x208] sm:$0xff] }
  0x69   : > { %492 = vperm.xlu1 %4360, %v366_v47   ;;  %487 = vperm.xlu0 %4359, %v365_v48   ;;  %v3972_v47 = vld [vmem:[%s5915_s4 + $0x200] sm:$0xff]  ;;  %v3975_v48 = vld [vmem:[%s5915_s4 + $0x218] sm:$0xff] }
  0x6a   : > { %756 = vmatprep.mubr.f32.mxu0 %v4981_v2 }
  0x6c   : > { %3919 = vmatmul.mubr.msk.f32.gmra.mrb[22].mxu0 %vm529_vm0, %v320_v49  ;;  %v3974_v49 = vld [vmem:[%s5915_s4 + $0x210] sm:$0xff] }
  0x6d   : > { %502 = vperm.xlu1 %4360, %v368_v50   ;;  %497 = vperm.xlu0 %4359, %v367_v51   ;;  %v335_v50 = vld [vmem:[%s5912_s1 + $0xd0] sm:$0xff]  ;;  %v3977_v51 = vld [vmem:[%s5915_s4 + $0x228] sm:$0xff] }
  0x6e   : > { %762 = vmatprep.mubr.f32.mxu0 %v4981_v2  ;;  %3934 = vmatmul.mubr.msk.f32.gmra.mrb[18].mxu1 %vm529_vm0, %v335_v50 }
  0x6f   : > { %850 = vmatprep.mubr.f32.mxu1 %v4981_v2 }
  0x70   : > { %3920 = vmatmul.mubr.msk.f32.gmra.mrb[24].mxu0 %vm529_vm0, %v321_v52  ;;  %v3976_v52 = vld [vmem:[%s5915_s4 + $0x220] sm:$0xff] }
  0x71   : > { %1142 = vperm.xlu1 %4360, %v1104_v53   ;;  %1137 = vperm.xlu0 %4359, %v1103_v54   ;;  %v336_v54 = vld [vmem:[%s5912_s1 + $0xd8] sm:$0xff] }
  0x72   : > { %768 = vmatprep.mubr.f32.mxu0 %v4981_v2  ;;  %3935 = vmatmul.mubr.msk.f32.gmra.mrb[20].mxu1 %vm529_vm0, %v336_v54 }
  0x73   : > { %854 = vmatprep.mubr.f32.mxu1 %v4981_v2 }
  0x74   : > { %3921 = vmatmul.mubr.msk.f32.gmra.mrb[26].mxu0 %vm529_vm0, %v322_v55 }
  0x75   : > { %1152 = vperm.xlu1 %4360, %v1106_v56   ;;  %1147 = vperm.xlu0 %4359, %v1105_v57   ;;  %v3979_v56 = vld [vmem:[%s5915_s4 + $0x238] sm:$0xff]  ;;  %v3978_v57 = vld [vmem:[%s5915_s4 + $0x230] sm:$0xff] }
  0x76   : > { %774 = vmatprep.mubr.f32.mxu0 %v4981_v2 }
  0x78   : > { %3922 = vmatmul.mubr.msk.f32.gmra.mrb[28].mxu0 %vm529_vm0, %v323_v58 }
  0x79   : > { %1162 = vperm.xlu1 %4360, %v1108_v59   ;;  %1157 = vperm.xlu0 %4359, %v1107_v60   ;;  %v3981_v59 = vld [vmem:[%s5915_s4 + $0x248] sm:$0xff]  ;;  %v3980_v60 = vld [vmem:[%s5915_s4 + $0x240] sm:$0xff] }
  0x7a   : > { %780 = vmatprep.mubr.f32.mxu0 %v4981_v2 }
  0x7c   : > { %3923 = vmatmul.mubr.msk.f32.gmra.mrb[30].mxu0 %vm529_vm0, %v324_v61  ;;  %v337_v61 = vld [vmem:[%s5912_s1 + $0xe0] sm:$0xff] }
  0x7d   : > { %1172 = vperm.xlu1 %4360, %v1110_v62   ;;  %1167 = vperm.xlu0 %4359, %v1109_v63   ;;  %v3983_v63 = vld [vmem:[%s5915_s4 + $0x258] sm:$0xff] }
  0x7e   : > { %786 = vmatprep.mubr.f32.mxu0 %v4981_v2  ;;  %3936 = vmatmul.mubr.msk.f32.gmra.mrb[22].mxu1 %vm529_vm0, %v337_v61 }
  0x7f   : > { %858 = vmatprep.mubr.f32.mxu1 %v4981_v2 }
  0x80   : > { %3924 = vmatmul.mubr.msk.f32.gmra.mrb[32].mxu0 %vm529_vm0, %v325_v0  ;;  %v3982_v0 = vld [vmem:[%s5915_s4 + $0x250] sm:$0xff] }
  0x81   : > { %1182 = vperm.xlu1 %4360, %v1112_v1   ;;  %1177 = vperm.xlu0 %4359, %v1111_v3   ;;  %v338_v1 = vld [vmem:[%s5912_s1 + $0xe8] sm:$0xff] }
  0x82   : > { %3937 = vmatmul.mubr.msk.f32.gmra.mrb[24].mxu1 %vm529_vm0, %v338_v1 }
  0x83   : > { %862 = vmatprep.mubr.f32.mxu1 %v4981_v2 }
  0x85   : > { %1192 = vperm.xlu1 %4360, %v1114_v4   ;;  %1187 = vperm.xlu0 %4359, %v1113_v5   ;;  %v3985_v5 = vld [vmem:[%s5915_s4 + $0x268] sm:$0xff] }
  0x89   : > { %1202 = vperm.xlu1 %4360, %v1116_v6   ;;  %1197 = vperm.xlu0 %4359, %v1115_v7   ;;  %v3984_v6 = vld [vmem:[%s5915_s4 + $0x260] sm:$0xff]  ;;  %v339_v7 = vld [vmem:[%s5912_s1 + $0xf0] sm:$0xff] }
  0x8a   : > { %3938 = vmatmul.mubr.msk.f32.gmra.mrb[26].mxu1 %vm529_vm0, %v339_v7 }
  0x8b   : > { %866 = vmatprep.mubr.f32.mxu1 %v4981_v2  ;;  %v976_v2 = vld [vmem:[#allocation4 + $0x8] sm:$0xff] }
  0x8d   : > { %1212 = vperm.xlu1 %4360, %v1118_v8   ;;  %1207 = vperm.xlu0 %4359, %v1117_v9   ;;  %v3987_v9 = vld [vmem:[%s5915_s4 + $0x278] sm:$0xff] }
  0x91   : > { %1222 = vperm.xlu1 %4360, %v1120_v10   ;;  %1217 = vperm.xlu0 %4359, %v1119_v11   ;;  %v3986_v10 = vld [vmem:[%s5915_s4 + $0x270] sm:$0xff]  ;;  %v340_v11 = vld [vmem:[%s5912_s1 + $0xf8] sm:$0xff] }
  0x92   : > { %3939 = vmatmul.mubr.msk.f32.gmra.mrb[28].mxu1 %vm529_vm0, %v340_v11  ;;  %v4014_v11 = vld [vmem:[%s5915_s4 + $0x350] sm:$0xff] }
  0x93   : > { %1353 = vmatprep.mubr.f32.mxu1 %v976_v2 }
  0x95   : > { %1232 = vperm.xlu1 %4360, %v1122_v12   ;;  %1227 = vperm.xlu0 %4359, %v1121_v13   ;;  %v3989_v13 = vld [vmem:[%s5915_s4 + $0x288] sm:$0xff] }
  0x99   : > { %1242 = vperm.xlu1 %4360, %v1124_v14   ;;  %1237 = vperm.xlu0 %4359, %v1123_v15   ;;  %v3988_v14 = vld [vmem:[%s5915_s4 + $0x280] sm:$0xff] }
  0x9d   : > { %1252 = vperm.xlu1 %4360, %v1126_v16   ;;  %1247 = vperm.xlu0 %4359, %v1125_v17   ;;  %v3991_v17 = vld [vmem:[%s5915_s4 + $0x298] sm:$0xff] }
  0xa1   : > { %1262 = vperm.xlu1 %4360, %v1128_v18   ;;  %1257 = vperm.xlu0 %4359, %v1127_v19   ;;  %v3990_v18 = vld [vmem:[%s5915_s4 + $0x290] sm:$0xff] }
  0xa5   : > { %1807 = vperm.xlu1 %4360, %v3941_v20   ;;  %1802 = vperm.xlu0 %4359, %v3940_v21   ;;  %v3993_v20 = vld [vmem:[%s5915_s4 + $0x2a8] sm:$0xff]  ;;  %v3992_v21 = vld [vmem:[%s5915_s4 + $0x2a0] sm:$0xff] }
  0xa9   : > { %1817 = vperm.xlu1 %4360, %v3943_v22   ;;  %1812 = vperm.xlu0 %4359, %v3942_v23   ;;  %v3995_v23 = vld [vmem:[%s5915_s4 + $0x2b8] sm:$0xff] }
  0xad   : > { %1827 = vperm.xlu1 %4360, %v3945_v24   ;;  %1822 = vperm.xlu0 %4359, %v3944_v25   ;;  %v3994_v24 = vld [vmem:[%s5915_s4 + $0x2b0] sm:$0xff] }
  0xb1   : > { %1837 = vperm.xlu1 %4360, %v3947_v26   ;;  %1832 = vperm.xlu0 %4359, %v3946_v27   ;;  %v3997_v27 = vld [vmem:[%s5915_s4 + $0x2c8] sm:$0xff] }
  0xb5   : > { %1847 = vperm.xlu1 %4360, %v3949_v28   ;;  %1842 = vperm.xlu0 %4359, %v3948_v29   ;;  %v3996_v28 = vld [vmem:[%s5915_s4 + $0x2c0] sm:$0xff] }
  0xb9   : > { %1857 = vperm.xlu1 %4360, %v3951_v30   ;;  %1852 = vperm.xlu0 %4359, %v3950_v31   ;;  %v5502_v53 = vpop.permute.xlu0 %377  ;;  %v5507_v55 = vpop.permute.xlu1 %387  ;;  %v4005_v30 = vld [vmem:[%s5915_s4 + $0x308] sm:$0xff]  ;;  %v4004_v31 = vld [vmem:[%s5915_s4 + $0x300] sm:$0xff] }
  0xbd   : > { %1867 = vperm.xlu1 %4360, %v3953_v32   ;;  %1862 = vperm.xlu0 %4359, %v3952_v33   ;;  %v4007_v33 = vld [vmem:[%s5915_s4 + $0x318] sm:$0xff] }
  0xc0   : > { %v5517_v58 = vpop.permute.xlu0 %382  ;;  %v5529_v62 = vpop.permute.xlu1 %392 }
  0xc1   : > { %1877 = vperm.xlu1 %4360, %v3955_v34   ;;  %1872 = vperm.xlu0 %4359, %v3954_v35   ;;  %v4006_v34 = vld [vmem:[%s5915_s4 + $0x310] sm:$0xff] }
  0xc4   : > { %v5542_v3 = vpop.permute.xlu0 %397  ;;  %v5545_v4 = vpop.permute.xlu1 %402 }
  0xc5   : > { %1887 = vperm.xlu1 %4360, %v3957_v36   ;;  %1882 = vperm.xlu0 %4359, %v3956_v37   ;;  %v4009_v37 = vld [vmem:[%s5915_s4 + $0x328] sm:$0xff] }
  0xc8   : > { %v5558_v8 = vpop.permute.xlu0 %407  ;;  %v5570_v12 = vpop.permute.xlu1 %412 }
  0xc9   : > { %1897 = vperm.xlu1 %4360, %v3959_v38   ;;  %1892 = vperm.xlu0 %4359, %v3958_v39   ;;  %v4008_v38 = vld [vmem:[%s5915_s4 + $0x320] sm:$0xff] }
  0xcc   : > { %v5578_v15 = vpop.permute.xlu0 %417  ;;  %v5580_v16 = vpop.permute.xlu1 %422 }
  0xcd   : > { %1907 = vperm.xlu1 %4360, %v3961_v40   ;;  %1902 = vperm.xlu0 %4359, %v3960_v41  }
  0xd0   : > { %v5588_v19 = vpop.permute.xlu0 %427  ;;  %v5596_v22 = vpop.permute.xlu1 %432 }
  0xd1   : > { %1917 = vperm.xlu1 %4360, %v3963_v42   ;;  %1912 = vperm.xlu0 %4359, %v3962_v43  }
  0xd4   : > { %v5604_v25 = vpop.permute.xlu0 %437  ;;  %v5606_v26 = vpop.permute.xlu1 %442 }
  0xd5   : > { %1927 = vperm.xlu1 %4360, %v3965_v44   ;;  %1922 = vperm.xlu0 %4359, %v3964_v45  }
  0xd8   : > { %v5614_v29 = vpop.permute.xlu0 %447  ;;  %v5622_v32 = vpop.permute.xlu1 %452 }
  0xd9   : > { %2472 = vperm.xlu1 %4360, %v3973_v46   ;;  %2467 = vperm.xlu0 %4359, %v3972_v47   ;;  %v4011_v46 = vld [vmem:[%s5915_s4 + $0x338] sm:$0xff]  ;;  %v4010_v47 = vld [vmem:[%s5915_s4 + $0x330] sm:$0xff] }
  0xdc   : > { %v5630_v35 = vpop.permute.xlu0 %457  ;;  %v5632_v36 = vpop.permute.xlu1 %462 }
  0xdd   : > { %2482 = vperm.xlu1 %4360, %v3975_v48   ;;  %2477 = vperm.xlu0 %4359, %v3974_v49  }
  0xe0   : > { %v468_v45 = vpop.permute.xlu0 %467  ;;  %v473_v50 = vpop.permute.xlu1 %472 }
  0xe1   : > { %2492 = vperm.xlu1 %4360, %v3977_v51   ;;  %2487 = vperm.xlu0 %4359, %v3976_v52  }
  0xe5   : > { %2502 = vperm.xlu1 %4360, %v3979_v56   ;;  %2497 = vperm.xlu0 %4359, %v3978_v57   ;;  %v4013_v57 = vld [vmem:[%s5915_s4 + $0x348] sm:$0xff] }
  0xe9   : > { %2512 = vperm.xlu1 %4360, %v3981_v59   ;;  %2507 = vperm.xlu0 %4359, %v3980_v60   ;;  %v4012_v59 = vld [vmem:[%s5915_s4 + $0x340] sm:$0xff] }
  0xed   : > { %2522 = vperm.xlu1 %4360, %v3983_v63   ;;  %2517 = vperm.xlu0 %4359, %v3982_v0   ;;  %v478_v0 = vpop.permute.xlu0 %477 }
  0xf1   : > { %2532 = vperm.xlu1 %4360, %v3985_v5   ;;  %2527 = vperm.xlu0 %4359, %v3984_v6  }
  0xf5   : > { %2542 = vperm.xlu1 %4360, %v3987_v9   ;;  %2537 = vperm.xlu0 %4359, %v3986_v10   ;;  %v483_v9 = vpop.permute.xlu1 %482  ;;  %v4015_v10 = vld [vmem:[%s5915_s4 + $0x358] sm:$0xff] }
  0xf9   : > { %2552 = vperm.xlu1 %4360, %v3989_v13   ;;  %2547 = vperm.xlu0 %4359, %v3988_v14  }
  0xfd   : > { %2562 = vperm.xlu1 %4360, %v3991_v17   ;;  %2557 = vperm.xlu0 %4359, %v3990_v18  }
 0x101   : > { %2572 = vperm.xlu1 %4360, %v3993_v20   ;;  %2567 = vperm.xlu0 %4359, %v3992_v21  }
 0x105   : > { %2582 = vperm.xlu1 %4360, %v3995_v23   ;;  %2577 = vperm.xlu0 %4359, %v3994_v24   ;;  %v488_v24 = vpop.permute.xlu0 %487 }
 0x109   : > { %2592 = vperm.xlu1 %4360, %v3997_v27   ;;  %2587 = vperm.xlu0 %4359, %v3996_v28   ;;  %v4017_v27 = vld [vmem:[%s5915_s4 + $0x368] sm:$0xff]  ;;  %v4016_v28 = vld [vmem:[%s5915_s4 + $0x360] sm:$0xff] }
 0x10d   : > { %3137 = vperm.xlu1 %4360, %v4005_v30   ;;  %3132 = vperm.xlu0 %4359, %v4004_v31  }
 0x111   : > { %3147 = vperm.xlu1 %4360, %v4007_v33   ;;  %3142 = vperm.xlu0 %4359, %v4006_v34  }
 0x113   : > { %v692_v39 = vpop.f32.mrb[0].mxu0  ;;  %v5640_v40 = vpop.f32.mrb[0].mxu1 }
 0x114   : > { %v693_v41 = vadd.f32 %v692_v39, %v5502_v53  ;;  %v694_v42 = vpop.f32.mrb[1].mxu0  ;;  %v5644_v44 = vpop.f32.mrb[1].mxu1 }
 0x115   : > { %v695_v43 = vadd.f32 %v694_v42, %v5502_v53  ;;  %3157 = vperm.xlu1 %4360, %v4009_v37   ;;  %3152 = vperm.xlu0 %4359, %v4008_v38   ;;  %v5676_v37 = vpop.permute.xlu1 %492 }
 0x116   : > { %4361 = vtanh.f32 %v693_v41 }
 0x117   : > { %v698_v48 = vpop.f32.mrb[2].mxu0  ;;  %v800_v49 = vpop.f32.mrb[2].mxu1  ;;  %4363 = vtanh.f32 %v695_v43 }
 0x118   : > { %v699_v51 = vadd.f32 %v698_v48, %v5517_v58  ;;  %v700_v52 = vpop.f32.mrb[3].mxu0  ;;  %v801_v53 = vadd.f32 %v800_v49, %v468_v45  ;;  %v802_v56 = vpop.f32.mrb[3].mxu1  ;;  %v4019_v49 = vld [vmem:[%s5915_s4 + $0x378] sm:$0xff] }
 0x119   : > { %v701_v54 = vadd.f32 %v700_v52, %v5517_v58  ;;  %3167 = vperm.xlu1 %4360, %v4011_v46   ;;  %3162 = vperm.xlu0 %4359, %v4010_v47   ;;  %v803_v60 = vadd.f32 %v802_v56, %v468_v45  ;;  %v498_v56 = vpop.permute.xlu0 %497 }
 0x11a   : > { %4365 = vtanh.f32 %v699_v51 }
 0x11b   : > { %4367 = vtanh.f32 %v701_v54  ;;  %v704_v61 = vpop.f32.mrb[4].mxu0  ;;  %v806_v63 = vpop.f32.mrb[4].mxu1 }
 0x11c   : > { %v705_v1 = vadd.f32 %v704_v61, %v5507_v55  ;;  %v706_v58 = vpop.f32.mrb[5].mxu0  ;;  %4369 = vtanh.f32 %v801_v53  ;;  %v807_v5 = vadd.f32 %v806_v63, %v473_v50  ;;  %v808_v7 = vpop.f32.mrb[5].mxu1 }
 0x11d   : > { %v707_v6 = vadd.f32 %v706_v58, %v5507_v55  ;;  %3177 = vperm.xlu1 %4360, %v4013_v57   ;;  %3172 = vperm.xlu0 %4359, %v4012_v59   ;;  %4371 = vtanh.f32 %v803_v60  ;;  %v809_v2 = vadd.f32 %v808_v7, %v473_v50  ;;  %v5694_v58 = vpop.permute.xlu1 %502 }
 0x11e   : > { %4373 = vtanh.f32 %v705_v1 }
 0x11f   : > { %4375 = vtanh.f32 %v707_v6  ;;  %v710_v13 = vpop.f32.mrb[6].mxu0  ;;  %v812_v14 = vpop.f32.mrb[6].mxu1  ;;  %v4021_v6 = vld [vmem:[%s5915_s4 + $0x388] sm:$0xff] }
 0x120   : > { %v711_v55 = vadd.f32 %v710_v13, %v5529_v62  ;;  %v712_v17 = vpop.f32.mrb[7].mxu0  ;;  %4377 = vtanh.f32 %v807_v5  ;;  %v813_v18 = vadd.f32 %v812_v14, %v478_v0  ;;  %v814_v21 = vpop.f32.mrb[7].mxu1 }
 0x121   : > { %v713_v20 = vadd.f32 %v712_v17, %v5529_v62  ;;  %3187 = vperm.xlu1 %4360, %v4015_v10   ;;  %3182 = vperm.xlu0 %4359, %v4014_v11   ;;  %4379 = vtanh.f32 %v809_v2  ;;  %v4362_v23 = vpop.eup %4361  ;;  %v815_v30 = vadd.f32 %v814_v21, %v478_v0  ;;  %v4020_v10 = vld [vmem:[%s5915_s4 + $0x380] sm:$0xff] }
 0x122   : > { %4381 = vtanh.f32 %v711_v55  ;;  %v4364_v31 = vpop.eup %4363 }
 0x123   : > { %4383 = vtanh.f32 %v713_v20  ;;  %v716_v33 = vpop.f32.mrb[8].mxu0  ;;  %v818_v62 = vpop.f32.mrb[8].mxu1 }
 0x124   : > { %v4366_v34 = vpop.eup %4365  ;;  %v717_v38 = vadd.f32 %v716_v33, %v5542_v3  ;;  %v718_v39 = vpop.f32.mrb[9].mxu0  ;;  %4385 = vtanh.f32 %v813_v18  ;;  %v819_v41 = vadd.f32 %v818_v62, %v483_v9 }
 0x125   : > { %v4368_v42 = vpop.eup %4367  ;;  %v719_v43 = vadd.f32 %v718_v39, %v5542_v3  ;;  %3197 = vperm.xlu1 %4360, %v4017_v27   ;;  %3192 = vperm.xlu0 %4359, %v4016_v28   ;;  %4387 = vtanh.f32 %v815_v30  ;;  %v4044_v45 = vpack.c.bf16 %v4366_v34, %v4362_v23  ;;  %v820_v46 = vpop.f32.mrb[9].mxu1  ;;  %v4018_v3 = vld [vmem:[%s5915_s4 + $0x370] sm:$0xff] }
 0x126   : > { %v5680_v47 = vpop.eup %4369  ;;  %4389 = vtanh.f32 %v717_v38  ;;  %v4042_v48 = vpack.c.bf16 %v4368_v42, %v4364_v31  ;;  %v821_v50 = vadd.f32 %v820_v46, %v483_v9  ;;  %v5713_v27 = vpop.permute.xlu0 %1137  ;;  %v4023_v31 = vld [vmem:[%s5915_s4 + $0x398] sm:$0xff]  ;;  %v4022_v34 = vld [vmem:[%s5915_s4 + $0x390] sm:$0xff] }
 0x127   : > { %v5685_v51 = vpop.eup %4371  ;;  %4391 = vtanh.f32 %v719_v43  ;;  %v722_v52 = vpop.f32.mrb[10].mxu0 }
 0x128   : > { %v824_v53 = vpop.f32.mrb[10].mxu1  ;;  %v4374_v54 = vpop.eup %4373  ;;  %v723_v57 = vadd.f32 %v722_v52, %v5545_v4  ;;  %4043 = vmatprep.subr.bf16.mxu1 %v4042_v48  ;;  %4393 = vtanh.f32 %v819_v41 }
 0x129   : > { %v724_v59 = vpop.f32.mrb[11].mxu0  ;;  %v825_v60 = vadd.f32 %v824_v53, %v488_v24  ;;  %v4376_v61 = vpop.eup %4375  ;;  %4045 = vmatpush1.bf16.msra.mxu1 %v4044_v45  ;;  %3207 = vperm.xlu1 %4360, %v4019_v49   ;;  %4395 = vtanh.f32 %v821_v50  ;;  %v4025_v50 = vld [vmem:[%s5915_s4 + $0x3a8] sm:$0xff] }
 0x12a   : > { %v725_v63 = vadd.f32 %v724_v59, %v5545_v4  ;;  %v826_v0 = vpop.f32.mrb[11].mxu1  ;;  %v5692_v1 = vpop.eup %4377  ;;  %4397 = vtanh.f32 %v723_v57  ;;  %3202 = vperm.xlu0 %4359, %v4018_v3  }
 0x12b   : > { %v827_v5 = vadd.f32 %v826_v0, %v488_v24  ;;  %v5699_v7 = vpop.eup %4379  ;;  %v728_v9 = vpop.f32.mrb[12].mxu0  ;;  %v4080_v11 = vpack.c.bf16 %v5692_v1, %v5680_v47  ;;  %v975_v47 = vld [vmem:[#allocation4] sm:$0xff]  ;;  %v977_v1 = vld [vmem:[#allocation4 + $0x10] sm:$0xff] }
 0x12c   : > { %4399 = vtanh.f32 %v725_v63  ;;  %v830_v4 = vpop.f32.mrb[12].mxu1  ;;  %v4382_v2 = vpop.eup %4381  ;;  %v729_v13 = vadd.f32 %v728_v9, %v5558_v8  ;;  %v4078_v17 = vpack.c.bf16 %v5699_v7, %v5685_v51  ;;  %v978_v51 = vld [vmem:[#allocation4 + $0x18] sm:$0xff]  ;;  %v980_v7 = vld [vmem:[#allocation4 + $0x28] sm:$0xff] }
 0x12d   : > { %4401 = vtanh.f32 %v825_v60  ;;  %v730_v14 = vpop.f32.mrb[13].mxu0  ;;  %v831_v55 = vadd.f32 %v830_v4, %v5676_v37  ;;  %v4384_v18 = vpop.eup %4383  ;;  %3217 = vperm.xlu1 %4360, %v4021_v6   ;;  %v4048_v23 = vpack.c.bf16 %v4382_v2, %v4374_v54 }
 0x12e   : > { %v731_v20 = vadd.f32 %v730_v14, %v5558_v8  ;;  %4403 = vtanh.f32 %v827_v5  ;;  %v832_v21 = vpop.f32.mrb[13].mxu1  ;;  %v5711_v24 = vpop.eup %4385  ;;  %3212 = vperm.xlu0 %4359, %v4020_v10   ;;  %v4046_v30 = vpack.c.bf16 %v4384_v18, %v4376_v61 }
 0x12f   : > { %4405 = vtanh.f32 %v729_v13  ;;  %v833_v28 = vadd.f32 %v832_v21, %v5676_v37  ;;  %v5719_v33 = vpop.eup %4387  ;;  %v734_v8 = vpop.f32.mrb[14].mxu0  ;;  %v4027_v13 = vld [vmem:[%s5915_s4 + $0x3b8] sm:$0xff] }
 0x130   : > { %4407 = vtanh.f32 %v731_v20  ;;  %v836_v62 = vpop.f32.mrb[14].mxu1  ;;  %v4390_v38 = vpop.eup %4389  ;;  %v735_v39 = vadd.f32 %v734_v8, %v5570_v12  ;;  %4047 = vmatprep.subr.bf16.mxu1 %v4046_v30 }
 0x131   : > { %4409 = vtanh.f32 %v831_v55  ;;  %v837_v41 = vadd.f32 %v836_v62, %v498_v56  ;;  %v736_v37 = vpop.f32.mrb[15].mxu0  ;;  %v838_v42 = vpop.f32.mrb[15].mxu1  ;;  %4049 = vmatpush1.bf16.msra.mxu1 %v4048_v23  ;;  %3227 = vperm.xlu1 %4360, %v4023_v31   ;;  %v4029_v31 = vld [vmem:[%s5915_s4 + $0x3c8] sm:$0xff] }
 0x132   : > { %v4392_v43 = vpop.eup %4391  ;;  %v5725_v45 = vpop.permute.xlu1 %1142  ;;  %4411 = vtanh.f32 %v833_v28  ;;  %v737_v46 = vadd.f32 %v736_v37, %v5570_v12  ;;  %v839_v48 = vadd.f32 %v838_v42, %v498_v56  ;;  %3222 = vperm.xlu0 %4359, %v4022_v34   ;;  %v4024_v12 = vld [vmem:[%s5915_s4 + $0x3a0] sm:$0xff] }
 0x133   : > { %v5728_v49 = vpop.eup %4393  ;;  %4413 = vtanh.f32 %v735_v39  ;;  %v740_v3 = vpop.f32.mrb[16].mxu0  ;;  %v4028_v34 = vld [vmem:[%s5915_s4 + $0x3c0] sm:$0xff] }
 0x134   : > { %v5733_v52 = vpop.eup %4395  ;;  %4415 = vtanh.f32 %v837_v41  ;;  %v842_v53 = vpop.f32.mrb[16].mxu1  ;;  %v4084_v54 = vpack.c.bf16 %v5728_v49, %v5711_v24  ;;  %v741_v57 = vadd.f32 %v740_v3, %v5578_v15  ;;  %v981_v24 = vld [vmem:[#allocation4 + $0x30] sm:$0xff]  ;;  %v983_v49 = vld [vmem:[#allocation4 + $0x40] sm:$0xff] }
 0x135   : > { %v4398_v56 = vpop.eup %4397  ;;  %4417 = vtanh.f32 %v737_v46  ;;  %v843_v59 = vadd.f32 %v842_v53, %v5694_v58  ;;  %v742_v60 = vpop.f32.mrb[17].mxu0  ;;  %v4082_v63 = vpack.c.bf16 %v5733_v52, %v5719_v33  ;;  %3237 = vperm.xlu1 %4360, %v4025_v50   ;;  %v984_v33 = vld [vmem:[#allocation4 + $0x48] sm:$0xff]  ;;  %v986_v52 = vld [vmem:[#allocation4 + $0x58] sm:$0xff] }
 0x136   : > { %v844_v61 = vpop.f32.mrb[17].mxu1  ;;  %v4400_v0 = vpop.eup %4399  ;;  %4419 = vtanh.f32 %v839_v48  ;;  %v743_v5 = vadd.f32 %v742_v60, %v5578_v15  ;;  %v4052_v9 = vpack.c.bf16 %v4398_v56, %v4390_v38  ;;  %3232 = vperm.xlu0 %4359, %v4024_v12  }
 0x137   : > { %v845_v6 = vadd.f32 %v844_v61, %v5694_v58  ;;  %v5746_v4 = vpop.eup %4401  ;;  %v5748_v10 = vpop.permute.xlu0 %1147  ;;  %4421 = vtanh.f32 %v741_v57  ;;  %v4050_v2 = vpack.c.bf16 %v4400_v0, %v4392_v43  ;;  %v4026_v58 = vld [vmem:[%s5915_s4 + $0x3b0] sm:$0xff]  ;;  %v3698_v57 = vld [vmem:[#allocation3] sm:$0x1] }
 0x138   : > { %v5753_v14 = vpop.eup %4403  ;;  %v5755_v55 = vpop.permute.xlu1 %1152  ;;  %4423 = vtanh.f32 %v843_v59 }
 0x139   : > { %v746_v15 = vpop.f32.mrb[18].mxu0  ;;  %v4406_v18 = vpop.eup %4405  ;;  %4425 = vtanh.f32 %v743_v5  ;;  %4051 = vmatprep.subr.bf16.mxu1 %v4050_v2  ;;  %3247 = vperm.xlu1 %4360, %v4027_v13  }
 0x13a   : > { %v747_v20 = vadd.f32 %v746_v15, %v5580_v16  ;;  %v748_v21 = vpop.f32.mrb[19].mxu0  ;;  %v4408_v23 = vpop.eup %4407  ;;  %4427 = vtanh.f32 %v845_v6  ;;  %4053 = vmatpush1.bf16.msra.mxu1 %v4052_v9  ;;  %3242 = vperm.xlu0 %4359, %v4026_v58  }
 0x13b   : > { %v749_v28 = vadd.f32 %v748_v21, %v5580_v16  ;;  %v5762_v30 = vpop.eup %4409  ;;  %v752_v62 = vpop.f32.mrb[20].mxu0 }
 0x13c   : > { %4429 = vtanh.f32 %v747_v20  ;;  %v5767_v8 = vpop.eup %4411  ;;  %v4088_v16 = vpack.c.bf16 %v5762_v30, %v5746_v4  ;;  %v5774_v39 = vpop.permute.xlu0 %1157  ;;  %v753_v41 = vadd.f32 %v752_v62, %v5588_v19  ;;  %v987_v4 = vld [vmem:[#allocation4 + $0x60] sm:$0xff]  ;;  %v989_v30 = vld [vmem:[#allocation4 + $0x70] sm:$0xff] }
 0x13d   : > { %4431 = vtanh.f32 %v749_v28  ;;  %v4414_v38 = vpop.eup %4413  ;;  %v754_v37 = vpop.f32.mrb[21].mxu0  ;;  %v4086_v42 = vpack.c.bf16 %v5767_v8, %v5753_v14  ;;  %v990_v14 = vld [vmem:[#allocation4 + $0x78] sm:$0xff]  ;;  %v992_v8 = vld [vmem:[#allocation4 + $0x88] sm:$0xff] }
 0x13e   : > { %v5779_v43 = vpop.eup %4415  ;;  %v5781_v46 = vpop.permute.xlu1 %1162  ;;  %v755_v48 = vadd.f32 %v754_v37, %v5588_v19  ;;  %3257 = vperm.xlu1 %4360, %v4029_v31   ;;  %v4056_v50 = vpack.c.bf16 %v4414_v38, %v4406_v18  ;;  %3252 = vperm.xlu0 %4359, %v4028_v34   ;;  %4433 = vtanh.f32 %v753_v41 }
 0x13f   : > { %v4418_v3 = vpop.eup %4417  ;;  %v758_v12 = vpop.f32.mrb[22].mxu0 }
 0x140   : > { %v5784_v53 = vpop.eup %4419  ;;  %v4054_v56 = vpack.c.bf16 %v4418_v3, %v4408_v23  ;;  %v759_v60 = vadd.f32 %v758_v12, %v5596_v22  ;;  %v760_v61 = vpop.f32.mrb[23].mxu0  ;;  %4435 = vtanh.f32 %v755_v48 }
 0x141   : > { %v4422_v59 = vpop.eup %4421  ;;  %v761_v5 = vadd.f32 %v760_v61, %v5596_v22  ;;  %v5790_v6 = vpop.permute.xlu0 %1167  ;;  %v795_v61 = vadd.f32 %v5640_v40, %v5632_v36 }
 0x142   : > { %v5787_v0 = vpop.eup %4423  ;;  %4055 = vmatprep.subr.bf16.mxu1 %v4054_v56  ;;  %4437 = vtanh.f32 %v759_v60  ;;  %3701 = vperm.xlu0 %4359, %v3698_v57  }
 0x143   : > { %v4426_v19 = vpop.eup %4425  ;;  %4057 = vmatpush1.bf16.msra.mxu1 %v4056_v50  ;;  %v4092_v9 = vpack.c.bf16 %v5787_v0, %v5779_v43  ;;  %4439 = vtanh.f32 %v761_v5  ;;  %v764_v13 = vpop.f32.mrb[24].mxu0  ;;  %v993_v43 = vld [vmem:[#allocation4 + $0x90] sm:$0xff]  ;;  %v995_v0 = vld [vmem:[#allocation4 + $0xa0] sm:$0xff] }
 0x144   : > { %v5794_v2 = vpop.eup %4427  ;;  %v765_v58 = vadd.f32 %v764_v13, %v5604_v25  ;;  %v766_v18 = vpop.f32.mrb[25].mxu0 }
 0x145   : > { %v4090_v22 = vpack.c.bf16 %v5794_v2, %v5784_v53  ;;  %v767_v21 = vadd.f32 %v766_v18, %v5604_v25  ;;  %v996_v53 = vld [vmem:[#allocation4 + $0xa8] sm:$0xff]  ;;  %v997_v2 = vld [vmem:[#allocation4 + $0xb0] sm:$0xff] }
 0x146   : > { %v4430_v15 = vpop.eup %4429  ;;  %4441 = vtanh.f32 %v765_v58 }
 0x147   : > { %v4432_v20 = vpop.eup %4431  ;;  %v4060_v23 = vpack.c.bf16 %v4430_v15, %v4422_v59  ;;  %v770_v31 = vpop.f32.mrb[26].mxu0  ;;  %4443 = vtanh.f32 %v767_v21 }
 0x148   : > { %v4058_v28 = vpack.c.bf16 %v4432_v20, %v4426_v19  ;;  %v771_v62 = vadd.f32 %v770_v31, %v5606_v26  ;;  %v772_v34 = vpop.f32.mrb[27].mxu0  ;;  %v4434_v41 = vpop.eup %4433  ;;  %v797_v19 = vadd.f32 %v5644_v44, %v5632_v36 }
 0x149   : > { %v773_v38 = vadd.f32 %v772_v34, %v5606_v26 }
 0x14a   : > { %4059 = vmatprep.subr.bf16.mxu1 %v4058_v28  ;;  %4445 = vtanh.f32 %v771_v62  ;;  %v4436_v37 = vpop.eup %4435 }
 0x14b   : > { %4061 = vmatpush1.bf16.msra.mxu1 %v4060_v23  ;;  %4447 = vtanh.f32 %v773_v38  ;;  %v776_v48 = vpop.f32.mrb[28].mxu0 }
 0x14c   : > { %v4438_v50 = vpop.eup %4437  ;;  %v777_v25 = vadd.f32 %v776_v48, %v5614_v29  ;;  %v778_v3 = vpop.f32.mrb[29].mxu0 }
 0x14d   : > { %v4440_v12 = vpop.eup %4439  ;;  %v779_v56 = vadd.f32 %v778_v3, %v5614_v29  ;;  %v4064_v57 = vpack.c.bf16 %v4438_v50, %v4434_v41  ;;  %v999_v3 = vld [vmem:[#allocation4 + $0xc0] sm:$0xff] }
 0x14e   : > { %v4062_v59 = vpack.c.bf16 %v4440_v12, %v4436_v37  ;;  %4449 = vtanh.f32 %v777_v25  ;;  %v1002_v12 = vld [vmem:[#allocation4 + $0xd8] sm:$0xff] }
 0x14f   : > { %v782_v60 = vpop.f32.mrb[30].mxu0  ;;  %4451 = vtanh.f32 %v779_v56  ;;  %v1001_v56 = vld [vmem:[#allocation4 + $0xd0] sm:$0xff] }
 0x150   : > { %v783_v26 = vadd.f32 %v782_v60, %v5622_v32  ;;  %v784_v5 = vpop.f32.mrb[31].mxu0  ;;  %4063 = vmatprep.subr.bf16.mxu1 %v4062_v59  ;;  %v4442_v15 = vpop.eup %4441  ;;  %v1003_v59 = vld [vmem:[#allocation4 + $0xe0] sm:$0xff]  ;;  %v1006_v60 = vld [vmem:[#allocation4 + $0xf8] sm:$0xff] }
 0x151   : > { %v785_v13 = vadd.f32 %v784_v5, %v5622_v32  ;;  %4065 = vmatpush1.bf16.msra.mxu1 %v4064_v57  ;;  %v4444_v29 = vpop.eup %4443  ;;  %v1004_v57 = vld [vmem:[#allocation4 + $0xe8] sm:$0xff]  ;;  %v848_v5 = vpop.f32.mrb[18].mxu1 }
 0x152   : > { %4453 = vtanh.f32 %v783_v26  ;;  %v1008_v26 = vld [vmem:[#allocation4 + $0x108] sm:$0xff] }
 0x153   : > { %4455 = vtanh.f32 %v785_v13  ;;  %v788_v58 = vpop.f32.mrb[32].mxu0  ;;  %v1007_v13 = vld [vmem:[#allocation4 + $0x100] sm:$0xff] }
 0x154   : > { %v4446_v18 = vpop.eup %4445  ;;  %4457 = vtanh.f32 %v795_v61  ;;  %v789_v40 = vadd.f32 %v788_v58, %v5630_v35  ;;  %v790_v20 = vpop.f32.mrb[33].mxu0  ;;  %v1005_v61 = vld [vmem:[#allocation4 + $0xf0] sm:$0xff] }
 0x155   : > { %v4448_v21 = vpop.eup %4447  ;;  %4459 = vtanh.f32 %v797_v19  ;;  %v791_v23 = vadd.f32 %v790_v20, %v5630_v35  ;;  %v4068_v28 = vpack.c.bf16 %v4446_v18, %v4442_v15  ;;  %v849_v19 = vpop.f32.mrb[19].mxu1  ;;  %v1010_v15 = vld [vmem:[#allocation4 + $0x118] sm:$0xff]  ;;  %v1009_v18 = vld [vmem:[#allocation4 + $0x110] sm:$0xff] }
 0x156   : > { %4461 = vtanh.f32 %v789_v40  ;;  %v4066_v36 = vpack.c.bf16 %v4448_v21, %v4444_v29  ;;  %v852_v29 = vpop.f32.mrb[20].mxu1  ;;  %v1012_v40 = vld [vmem:[#allocation4 + $0x128] sm:$0xff] }
 0x157   : > { %4463 = vtanh.f32 %v791_v23  ;;  %v853_v58 = vpop.f32.mrb[21].mxu1  ;;  %v1011_v23 = vld [vmem:[#allocation4 + $0x120] sm:$0xff] }
 0x158   : > { %4067 = vmatprep.subr.bf16.mxu1 %v4066_v36  ;;  %v4450_v32 = vpop.eup %4449  ;;  %v856_v20 = vpop.f32.mrb[22].mxu1 }
 0x159   : > { %4069 = vmatpush1.bf16.msra.mxu1 %v4068_v28  ;;  %v4452_v44 = vpop.eup %4451  ;;  %v857_v21 = vpop.f32.mrb[23].mxu1  ;;  %v1014_v28 = vld [vmem:[#allocation4 + $0x138] sm:$0xff] }
 0x15a   : > { %v860_v36 = vpop.f32.mrb[24].mxu1 }
 0x15c   : > { %v4454_v31 = vpop.eup %4453 }
 0x15d   : > { %v4456_v62 = vpop.eup %4455  ;;  %v4072_v34 = vpack.c.bf16 %v4454_v31, %v4450_v32  ;;  %v861_v32 = vpop.f32.mrb[25].mxu1  ;;  %v1016_v31 = vld [vmem:[#allocation4 + $0x148] sm:$0xff] }
 0x15e   : > { %v4458_v38 = vpop.eup %4457  ;;  %v4070_v41 = vpack.c.bf16 %v4456_v62, %v4452_v44  ;;  %v1013_v44 = vld [vmem:[#allocation4 + $0x130] sm:$0xff]  ;;  %v864_v62 = vpop.f32.mrb[26].mxu1 }
 0x15f   : > { %v4460_v37 = vpop.eup %4459  ;;  %v1178_v62 = vpop.permute.xlu0 %1177 }
 0x160   : > { %v4462_v48 = vpop.eup %4461  ;;  %4071 = vmatprep.subr.bf16.mxu1 %v4070_v41  ;;  %v1018_v41 = vld [vmem:[#allocation4 + $0x158] sm:$0xff] }
 0x161   : > { %v4464_v50 = vpop.eup %4463  ;;  %4073 = vmatpush1.bf16.msra.mxu1 %v4072_v34  ;;  %v4076_v25 = vpack.c.bf16 %v4458_v38, %v4462_v48  ;;  %v865_v34 = vpop.f32.mrb[27].mxu1  ;;  %v1015_v38 = vld [vmem:[#allocation4 + $0x140] sm:$0xff] }
 0x162   : > { %v4074_v35 = vpack.c.bf16 %v4460_v37, %v4464_v50  ;;  %v1017_v50 = vld [vmem:[#allocation4 + $0x150] sm:$0xff] }
 0x164   : > { %4075 = vmatprep.subr.bf16.mxu1 %v4074_v35  ;;  %v1019_v35 = vld [vmem:[#allocation4 + $0x160] sm:$0xff] }
 0x165   : > { %4077 = vmatpush1.bf16.msra.mxu1 %v4076_v25  ;;  %v868_v37 = vpop.f32.mrb[28].mxu1  ;;  %v1020_v25 = vld [vmem:[#allocation4 + $0x168] sm:$0xff] }
 0x166   : > { %4079 = vmatprep.subr.bf16.mxu1 %v4078_v17  ;;  %v982_v17 = vld [vmem:[#allocation4 + $0x38] sm:$0xff]  ;;  %v869_v48 = vpop.f32.mrb[29].mxu1 }
 0x169   : > { %4081 = vmatpush1.bf16.msra.mxu1 %v4080_v11  ;;  %v979_v11 = vld [vmem:[#allocation4 + $0x20] sm:$0xff] }
 0x16a   : > { %4083 = vmatprep.subr.bf16.mxu1 %v4082_v63  ;;  %v988_v63 = vld [vmem:[#allocation4 + $0x68] sm:$0xff] }
 0x16d   : > { %4085 = vmatpush1.bf16.msra.mxu1 %v4084_v54  ;;  %v985_v54 = vld [vmem:[#allocation4 + $0x50] sm:$0xff] }
 0x16e   : > { %4087 = vmatprep.subr.bf16.mxu1 %v4086_v42  ;;  %v994_v42 = vld [vmem:[#allocation4 + $0x98] sm:$0xff] }
 0x171   : > { %4089 = vmatpush1.bf16.msra.mxu1 %v4088_v16  ;;  %v991_v16 = vld [vmem:[#allocation4 + $0x80] sm:$0xff] }
 0x172   : > { %4091 = vmatprep.subr.bf16.mxu1 %v4090_v22  ;;  %v1000_v22 = vld [vmem:[#allocation4 + $0xc8] sm:$0xff] }
 0x175   : > { %4093 = vmatpush1.bf16.msra.mxu1 %v4092_v9  ;;  %v998_v9 = vld [vmem:[#allocation4 + $0xb8] sm:$0xff] }
 0x178   : > { %1354 = vmatmul.mubr.f32.vlgmr.msra.gmra.mrb[30].mxu1 %v975_v47  ;;  %v1022_v47 = vld [vmem:[#allocation4 + $0x178] sm:$0xff] }
 0x179   : > { %1359 = vmatprep.mubr.f32.mxu1 %v978_v51  ;;  %v1021_v51 = vld [vmem:[#allocation4 + $0x170] sm:$0xff] }
 0x17c   : > { %1360 = vmatmul.mubr.f32.gmra.mrb[32].mxu1 %v977_v1  ;;  %v1024_v1 = vld [vmem:[#allocation4 + $0x188] sm:$0xff] }
 0x17d   : > { %1365 = vmatprep.mubr.f32.mxu1 %v980_v7  ;;  %v1023_v7 = vld [vmem:[#allocation4 + $0x180] sm:$0xff] }
 0x180   : > { %1366 = vmatmul.mubr.f32.gmra.mrb[34].mxu1 %v979_v11  ;;  %v1026_v11 = vld [vmem:[#allocation4 + $0x198] sm:$0xff] }
 0x181   : > { %1371 = vmatprep.mubr.f32.mxu1 %v982_v17  ;;  %v1025_v17 = vld [vmem:[#allocation4 + $0x190] sm:$0xff] }
 0x184   : > { %1372 = vmatmul.mubr.f32.gmra.mrb[36].mxu1 %v981_v24  ;;  %v1640_v24 = vld [vmem:[#allocation4 + $0x208] sm:$0xff] }
 0x185   : > { %1377 = vmatprep.mubr.f32.mxu1 %v984_v33  ;;  %2018 = vmatprep.mubr.f32.mxu0 %v1640_v24  ;;  %v1188_v24 = vpop.permute.xlu0 %1187 }
 0x188   : > { %1378 = vmatmul.mubr.f32.gmra.mrb[38].mxu1 %v983_v49 }
 0x189   : > { %1383 = vmatprep.mubr.f32.mxu1 %v986_v52 }
 0x18c   : > { %1384 = vmatmul.mubr.f32.gmra.mrb[40].mxu1 %v985_v54 }
 0x18d   : > { %1389 = vmatprep.mubr.f32.mxu1 %v988_v63 }
 0x190   : > { %1390 = vmatmul.mubr.f32.gmra.mrb[42].mxu1 %v987_v4 }
 0x191   : > { %1395 = vmatprep.mubr.f32.mxu1 %v990_v14 }
 0x194   : > { %1396 = vmatmul.mubr.f32.gmra.mrb[44].mxu1 %v989_v30 }
 0x195   : > { %1401 = vmatprep.mubr.f32.mxu1 %v992_v8 }
 0x198   : > { %1402 = vmatmul.mubr.f32.gmra.mrb[46].mxu1 %v991_v16 }
 0x199   : > { %1407 = vmatprep.mubr.f32.mxu1 %v994_v42 }
 0x19c   : > { %1408 = vmatmul.mubr.f32.gmra.mrb[48].mxu1 %v993_v43 }
 0x19d   : > { %1413 = vmatprep.mubr.f32.mxu1 %v996_v53 }
 0x1a0   : > { %1414 = vmatmul.mubr.f32.gmra.mrb[50].mxu1 %v995_v0 }
 0x1a1   : > { %1419 = vmatprep.mubr.f32.mxu1 %v998_v9 }
 0x1a4   : > { %1420 = vmatmul.mubr.f32.gmra.mrb[52].mxu1 %v997_v2 }
 0x1a5   : > { %1425 = vmatprep.mubr.f32.mxu1 %v1000_v22 }
 0x1a8   : > { %1426 = vmatmul.mubr.f32.gmra.mrb[54].mxu1 %v999_v3 }
 0x1a9   : > { %1431 = vmatprep.mubr.f32.mxu1 %v1002_v12 }
 0x1ac   : > { %1432 = vmatmul.mubr.f32.gmra.mrb[56].mxu1 %v1001_v56 }
 0x1ad   : > { %1437 = vmatprep.mubr.f32.mxu1 %v1004_v57 }
 0x1b0   : > { %1438 = vmatmul.mubr.f32.gmra.mrb[58].mxu1 %v1003_v59 }
 0x1b1   : > { %1443 = vmatprep.mubr.f32.mxu1 %v1006_v60 }
 0x1b4   : > { %1444 = vmatmul.mubr.f32.gmra.mrb[60].mxu1 %v1005_v61 }
 0x1b5   : > { %1449 = vmatprep.mubr.f32.mxu1 %v1008_v26 }
 0x1b8   : > { %1450 = vmatmul.mubr.f32.gmra.mrb[62].mxu1 %v1007_v13 }
 0x1b9   : > { %1455 = vmatprep.mubr.f32.mxu1 %v1010_v15 }
 0x1bc   : > { %1456 = vmatmul.mubr.f32.gmra.mrb[64].mxu1 %v1009_v18 }
 0x1bd   : > { %1461 = vmatprep.mubr.f32.mxu1 %v1012_v40 }
 0x1c0   : > { %1462 = vmatmul.mubr.f32.gmra.mrb[66].mxu1 %v1011_v23  ;;  %v1173_v23 = vpop.permute.xlu1 %1172 }
 0x1c1   : > { %1467 = vmatprep.mubr.f32.mxu1 %v1014_v28 }
 0x1c4   : > { %1468 = vmatmul.mubr.f32.gmra.mrb[68].mxu1 %v1013_v44 }
 0x1c5   : > { %1473 = vmatprep.mubr.f32.mxu1 %v1016_v31 }
 0x1c8   : > { %1474 = vmatmul.mubr.f32.gmra.mrb[70].mxu1 %v1015_v38 }
 0x1c9   : > { %1479 = vmatprep.mubr.f32.mxu1 %v1018_v41 }
 0x1cc   : > { %1480 = vmatmul.mubr.f32.gmra.mrb[72].mxu1 %v1017_v50 }
 0x1cd   : > { %1485 = vmatprep.mubr.f32.mxu1 %v1020_v25 }
 0x1d0   : > { %1486 = vmatmul.mubr.f32.gmra.mrb[74].mxu1 %v1019_v35  ;;  %v1183_v35 = vpop.permute.xlu1 %1182 }
 0x1d1   : > { %1491 = vmatprep.mubr.f32.mxu1 %v1022_v47 }
 0x1d4   : > { %1492 = vmatmul.mubr.f32.gmra.mrb[76].mxu1 %v1021_v51 }
 0x1d5   : > { %1497 = vmatprep.mubr.f32.mxu1 %v1024_v1 }
 0x1d8   : > { %1498 = vmatmul.mubr.f32.gmra.mrb[78].mxu1 %v1023_v7 }
 0x1d9   : > { %1503 = vmatprep.mubr.f32.mxu1 %v1026_v11 }
 0x1dc   : > { %1504 = vmatmul.mubr.f32.gmra.mrb[80].mxu1 %v1025_v17 }
 0x24b   : > { %v1355_v33 = vpop.f32.mrb[30].mxu1 }
 0x24c   : > { %v1356_v49 = vadd.f32 %v1355_v33, %v5713_v27  ;;  %v1357_v52 = vpop.f32.mrb[31].mxu1 }
 0x24d   : > { %v1358_v54 = vadd.f32 %v1357_v52, %v5713_v27 }
 0x24e   : > { %4465 = vtanh.f32 %v1356_v49 }
 0x24f   : > { %v1361_v63 = vpop.f32.mrb[32].mxu1  ;;  %4467 = vtanh.f32 %v1358_v54 }
 0x250   : > { %v1362_v4 = vadd.f32 %v1361_v63, %v5725_v45  ;;  %v1363_v14 = vpop.f32.mrb[33].mxu1 }
 0x251   : > { %v1364_v30 = vadd.f32 %v1363_v14, %v5725_v45 }
 0x252   : > { %4469 = vtanh.f32 %v1362_v4 }
 0x253   : > { %4471 = vtanh.f32 %v1364_v30  ;;  %v1367_v8 = vpop.f32.mrb[34].mxu1 }
 0x254   : > { %v1368_v16 = vadd.f32 %v1367_v8, %v5748_v10  ;;  %v1369_v42 = vpop.f32.mrb[35].mxu1  ;;  %v1193_v8 = vpop.permute.xlu1 %1192 }
 0x255   : > { %v1370_v43 = vadd.f32 %v1369_v42, %v5748_v10 }
 0x256   : > { %4473 = vtanh.f32 %v1368_v16 }
 0x257   : > { %v1373_v53 = vpop.f32.mrb[36].mxu1  ;;  %4475 = vtanh.f32 %v1370_v43 }
 0x258   : > { %v1374_v27 = vadd.f32 %v1373_v53, %v5755_v55  ;;  %v1375_v0 = vpop.f32.mrb[37].mxu1  ;;  %v4466_v2 = vpop.eup %4465 }
 0x259   : > { %v1376_v9 = vadd.f32 %v1375_v0, %v5755_v55  ;;  %v4468_v22 = vpop.eup %4467 }
 0x25a   : > { %4477 = vtanh.f32 %v1374_v27 }
 0x25b   : > { %4479 = vtanh.f32 %v1376_v9  ;;  %v1379_v45 = vpop.f32.mrb[38].mxu1  ;;  %v1198_v9 = vpop.permute.xlu0 %1197 }
 0x25c   : > { %v4470_v3 = vpop.eup %4469  ;;  %v1380_v12 = vadd.f32 %v1379_v45, %v5774_v39  ;;  %v1381_v56 = vpop.f32.mrb[39].mxu1 }
 0x25d   : > { %v4472_v57 = vpop.eup %4471  ;;  %v1382_v10 = vadd.f32 %v1381_v56, %v5774_v39  ;;  %v4096_v59 = vpack.c.bf16 %v4470_v3, %v4466_v2 }
 0x25e   : > { %v4094_v60 = vpack.c.bf16 %v4472_v57, %v4468_v22  ;;  %4481 = vtanh.f32 %v1380_v12 }
 0x25f   : > { %v1385_v61 = vpop.f32.mrb[40].mxu1  ;;  %4483 = vtanh.f32 %v1382_v10 }
 0x260   : > { %v1386_v26 = vadd.f32 %v1385_v61, %v5781_v46  ;;  %v1387_v5 = vpop.f32.mrb[41].mxu1  ;;  %4095 = vmatprep.subr.bf16.mxu0 %v4094_v60  ;;  %v4474_v19 = vpop.eup %4473 }
 0x261   : > { %v1388_v55 = vadd.f32 %v1387_v5, %v5781_v46  ;;  %4097 = vmatpush1.bf16.msra.mxu0 %v4096_v59  ;;  %v4476_v13 = vpop.eup %4475  ;;  %v1203_v59 = vpop.permute.xlu1 %1202 }
 0x262   : > { %4485 = vtanh.f32 %v1386_v26 }
 0x263   : > { %4487 = vtanh.f32 %v1388_v55  ;;  %v1391_v15 = vpop.f32.mrb[42].mxu1 }
 0x264   : > { %v4478_v29 = vpop.eup %4477  ;;  %v1392_v39 = vadd.f32 %v1391_v15, %v5790_v6  ;;  %v1393_v58 = vpop.f32.mrb[43].mxu1 }
 0x265   : > { %v4480_v18 = vpop.eup %4479  ;;  %v1394_v40 = vadd.f32 %v1393_v58, %v5790_v6  ;;  %v4100_v20 = vpack.c.bf16 %v4478_v29, %v4474_v19 }
 0x266   : > { %v4098_v21 = vpack.c.bf16 %v4480_v18, %v4476_v13  ;;  %4489 = vtanh.f32 %v1392_v39  ;;  %v1208_v13 = vpop.permute.xlu0 %1207 }
 0x267   : > { %v1397_v28 = vpop.f32.mrb[44].mxu1  ;;  %4491 = vtanh.f32 %v1394_v40 }
 0x268   : > { %v1398_v36 = vadd.f32 %v1397_v28, %v1173_v23  ;;  %v1399_v46 = vpop.f32.mrb[45].mxu1  ;;  %4099 = vmatprep.subr.bf16.mxu0 %v4098_v21  ;;  %v4482_v44 = vpop.eup %4481 }
 0x269   : > { %v1400_v32 = vadd.f32 %v1399_v46, %v1173_v23  ;;  %4101 = vmatpush1.bf16.msra.mxu0 %v4100_v20  ;;  %v4484_v31 = vpop.eup %4483  ;;  %v1213_v23 = vpop.permute.xlu1 %1212 }
 0x26a   : > { %4493 = vtanh.f32 %v1398_v36 }
 0x26b   : > { %4495 = vtanh.f32 %v1400_v32  ;;  %v1403_v34 = vpop.f32.mrb[46].mxu1 }
 0x26c   : > { %v4486_v38 = vpop.eup %4485  ;;  %v1404_v41 = vadd.f32 %v1403_v34, %v1178_v62  ;;  %v1405_v6 = vpop.f32.mrb[47].mxu1 }
 0x26d   : > { %v4488_v37 = vpop.eup %4487  ;;  %v1406_v48 = vadd.f32 %v1405_v6, %v1178_v62  ;;  %v4104_v50 = vpack.c.bf16 %v4486_v38, %v4482_v44  ;;  %v1218_v62 = vpop.permute.xlu0 %1217 }
 0x26e   : > { %v4102_v25 = vpack.c.bf16 %v4488_v37, %v4484_v31  ;;  %4497 = vtanh.f32 %v1404_v41 }
 0x26f   : > { %v1409_v47 = vpop.f32.mrb[48].mxu1  ;;  %4499 = vtanh.f32 %v1406_v48 }
 0x270   : > { %v1410_v51 = vadd.f32 %v1409_v47, %v1183_v35  ;;  %v1411_v1 = vpop.f32.mrb[49].mxu1  ;;  %4103 = vmatprep.subr.bf16.mxu0 %v4102_v25  ;;  %v4490_v11 = vpop.eup %4489 }
 0x271   : > { %v1412_v7 = vadd.f32 %v1411_v1, %v1183_v35  ;;  %4105 = vmatpush1.bf16.msra.mxu0 %v4104_v50  ;;  %v4492_v17 = vpop.eup %4491  ;;  %v1223_v35 = vpop.permute.xlu1 %1222 }
 0x272   : > { %4501 = vtanh.f32 %v1410_v51 }
 0x273   : > { %4503 = vtanh.f32 %v1412_v7  ;;  %v1415_v33 = vpop.f32.mrb[50].mxu1 }
 0x274   : > { %v4494_v49 = vpop.eup %4493  ;;  %v1416_v52 = vadd.f32 %v1415_v33, %v1188_v24  ;;  %v1417_v54 = vpop.f32.mrb[51].mxu1 }
 0x275   : > { %v4496_v63 = vpop.eup %4495  ;;  %v1418_v4 = vadd.f32 %v1417_v54, %v1188_v24  ;;  %v4108_v14 = vpack.c.bf16 %v4494_v49, %v4490_v11  ;;  %v1228_v24 = vpop.permute.xlu0 %1227 }
 0x276   : > { %v4106_v30 = vpack.c.bf16 %v4496_v63, %v4492_v17  ;;  %4505 = vtanh.f32 %v1416_v52 }
 0x277   : > { %v1421_v16 = vpop.f32.mrb[52].mxu1  ;;  %4507 = vtanh.f32 %v1418_v4 }
 0x278   : > { %v1422_v42 = vadd.f32 %v1421_v16, %v1193_v8  ;;  %v1423_v43 = vpop.f32.mrb[53].mxu1  ;;  %4107 = vmatprep.subr.bf16.mxu0 %v4106_v30  ;;  %v4498_v27 = vpop.eup %4497 }
 0x279   : > { %v1424_v53 = vadd.f32 %v1423_v43, %v1193_v8  ;;  %4109 = vmatpush1.bf16.msra.mxu0 %v4108_v14  ;;  %v4500_v0 = vpop.eup %4499  ;;  %v1233_v8 = vpop.permute.xlu1 %1232 }
 0x27a   : > { %4509 = vtanh.f32 %v1422_v42 }
 0x27b   : > { %4511 = vtanh.f32 %v1424_v53  ;;  %v1427_v2 = vpop.f32.mrb[54].mxu1 }
 0x27c   : > { %v4502_v22 = vpop.eup %4501  ;;  %v1428_v45 = vadd.f32 %v1427_v2, %v1198_v9  ;;  %v1429_v3 = vpop.f32.mrb[55].mxu1 }
 0x27d   : > { %v4504_v12 = vpop.eup %4503  ;;  %v1430_v56 = vadd.f32 %v1429_v3, %v1198_v9  ;;  %v4112_v57 = vpack.c.bf16 %v4502_v22, %v4498_v27  ;;  %v1238_v9 = vpop.permute.xlu0 %1237 }
 0x27e   : > { %v4110_v10 = vpack.c.bf16 %v4504_v12, %v4500_v0  ;;  %4513 = vtanh.f32 %v1428_v45 }
 0x27f   : > { %v1433_v60 = vpop.f32.mrb[56].mxu1  ;;  %4515 = vtanh.f32 %v1430_v56 }
 0x280   : > { %v1434_v61 = vadd.f32 %v1433_v60, %v1203_v59  ;;  %v1435_v26 = vpop.f32.mrb[57].mxu1  ;;  %4111 = vmatprep.subr.bf16.mxu0 %v4110_v10  ;;  %v4506_v55 = vpop.eup %4505 }
 0x281   : > { %v1436_v5 = vadd.f32 %v1435_v26, %v1203_v59  ;;  %4113 = vmatpush1.bf16.msra.mxu0 %v4112_v57  ;;  %v4508_v19 = vpop.eup %4507  ;;  %v1243_v59 = vpop.permute.xlu1 %1242 }
 0x282   : > { %4517 = vtanh.f32 %v1434_v61 }
 0x283   : > { %4519 = vtanh.f32 %v1436_v5  ;;  %v1439_v15 = vpop.f32.mrb[58].mxu1 }
 0x284   : > { %v4510_v29 = vpop.eup %4509  ;;  %v1440_v39 = vadd.f32 %v1439_v15, %v1208_v13  ;;  %v1441_v58 = vpop.f32.mrb[59].mxu1 }
 0x285   : > { %v4512_v18 = vpop.eup %4511  ;;  %v1442_v40 = vadd.f32 %v1441_v58, %v1208_v13  ;;  %v4116_v20 = vpack.c.bf16 %v4510_v29, %v4506_v55  ;;  %v1248_v13 = vpop.permute.xlu0 %1247 }
 0x286   : > { %v4114_v21 = vpack.c.bf16 %v4512_v18, %v4508_v19  ;;  %4521 = vtanh.f32 %v1440_v39 }
 0x287   : > { %v1445_v28 = vpop.f32.mrb[60].mxu1  ;;  %4523 = vtanh.f32 %v1442_v40 }
 0x288   : > { %v1446_v36 = vadd.f32 %v1445_v28, %v1213_v23  ;;  %v1447_v46 = vpop.f32.mrb[61].mxu1  ;;  %4115 = vmatprep.subr.bf16.mxu0 %v4114_v21  ;;  %v4514_v44 = vpop.eup %4513 }
 0x289   : > { %v1448_v32 = vadd.f32 %v1447_v46, %v1213_v23  ;;  %4117 = vmatpush1.bf16.msra.mxu0 %v4116_v20  ;;  %v4516_v31 = vpop.eup %4515  ;;  %v1253_v23 = vpop.permute.xlu1 %1252 }
 0x28a   : > { %4525 = vtanh.f32 %v1446_v36 }
 0x28b   : > { %4527 = vtanh.f32 %v1448_v32  ;;  %v1451_v34 = vpop.f32.mrb[62].mxu1 }
 0x28c   : > { %v4518_v38 = vpop.eup %4517  ;;  %v1452_v41 = vadd.f32 %v1451_v34, %v1218_v62  ;;  %v1453_v6 = vpop.f32.mrb[63].mxu1 }
 0x28d   : > { %v4520_v37 = vpop.eup %4519  ;;  %v1454_v48 = vadd.f32 %v1453_v6, %v1218_v62  ;;  %v4120_v50 = vpack.c.bf16 %v4518_v38, %v4514_v44  ;;  %v1258_v62 = vpop.permute.xlu0 %1257 }
 0x28e   : > { %v4118_v25 = vpack.c.bf16 %v4520_v37, %v4516_v31  ;;  %4529 = vtanh.f32 %v1452_v41 }
 0x28f   : > { %v1457_v47 = vpop.f32.mrb[64].mxu1  ;;  %4531 = vtanh.f32 %v1454_v48 }
 0x290   : > { %v1458_v51 = vadd.f32 %v1457_v47, %v1223_v35  ;;  %v1459_v1 = vpop.f32.mrb[65].mxu1  ;;  %4119 = vmatprep.subr.bf16.mxu0 %v4118_v25  ;;  %v4522_v11 = vpop.eup %4521 }
 0x291   : > { %v1460_v7 = vadd.f32 %v1459_v1, %v1223_v35  ;;  %4121 = vmatpush1.bf16.msra.mxu0 %v4120_v50  ;;  %v4524_v17 = vpop.eup %4523  ;;  %v1263_v35 = vpop.permute.xlu1 %1262 }
 0x292   : > { %4533 = vtanh.f32 %v1458_v51 }
 0x293   : > { %4535 = vtanh.f32 %v1460_v7  ;;  %v1463_v33 = vpop.f32.mrb[66].mxu1 }
 0x294   : > { %v4526_v49 = vpop.eup %4525  ;;  %v1464_v52 = vadd.f32 %v1463_v33, %v1228_v24  ;;  %v1465_v54 = vpop.f32.mrb[67].mxu1 }
 0x295   : > { %v4528_v63 = vpop.eup %4527  ;;  %v1466_v4 = vadd.f32 %v1465_v54, %v1228_v24  ;;  %v4124_v14 = vpack.c.bf16 %v4526_v49, %v4522_v11 }
 0x296   : > { %v4122_v30 = vpack.c.bf16 %v4528_v63, %v4524_v17  ;;  %4537 = vtanh.f32 %v1464_v52 }
 0x297   : > { %v1469_v16 = vpop.f32.mrb[68].mxu1  ;;  %4539 = vtanh.f32 %v1466_v4 }
 0x298   : > { %v1470_v42 = vadd.f32 %v1469_v16, %v1233_v8  ;;  %v1471_v43 = vpop.f32.mrb[69].mxu1  ;;  %4123 = vmatprep.subr.bf16.mxu0 %v4122_v30  ;;  %v4530_v27 = vpop.eup %4529  ;;  %v1639_v16 = vld [vmem:[#allocation4 + $0x200] sm:$0xff] }
 0x299   : > { %v1472_v53 = vadd.f32 %v1471_v43, %v1233_v8  ;;  %4125 = vmatpush1.bf16.msra.mxu0 %v4124_v14  ;;  %v4532_v0 = vpop.eup %4531  ;;  %v1641_v43 = vld [vmem:[#allocation4 + $0x210] sm:$0xff] }
 0x29a   : > { %4541 = vtanh.f32 %v1470_v42  ;;  %v1642_v42 = vld [vmem:[#allocation4 + $0x218] sm:$0xff] }
 0x29b   : > { %4543 = vtanh.f32 %v1472_v53  ;;  %v1475_v2 = vpop.f32.mrb[70].mxu1  ;;  %v1644_v53 = vld [vmem:[#allocation4 + $0x228] sm:$0xff] }
 0x29c   : > { %v4534_v22 = vpop.eup %4533  ;;  %v1476_v45 = vadd.f32 %v1475_v2, %v1238_v9  ;;  %v1477_v3 = vpop.f32.mrb[71].mxu1  ;;  %v1648_v2 = vld [vmem:[#allocation4 + $0x248] sm:$0xff] }
 0x29d   : > { %v4536_v12 = vpop.eup %4535  ;;  %v1478_v56 = vadd.f32 %v1477_v3, %v1238_v9  ;;  %v4128_v57 = vpack.c.bf16 %v4534_v22, %v4530_v27  ;;  %v1643_v27 = vld [vmem:[#allocation4 + $0x220] sm:$0xff]  ;;  %v1645_v9 = vld [vmem:[#allocation4 + $0x230] sm:$0xff] }
 0x29e   : > { %v4126_v10 = vpack.c.bf16 %v4536_v12, %v4532_v0  ;;  %4545 = vtanh.f32 %v1476_v45  ;;  %v1646_v0 = vld [vmem:[#allocation4 + $0x238] sm:$0xff]  ;;  %v1647_v22 = vld [vmem:[#allocation4 + $0x240] sm:$0xff]  ;;  %v1649_v3 = vld [vmem:[#allocation4 + $0x250] sm:$0xff] }
 0x29f   : > { %v1481_v60 = vpop.f32.mrb[72].mxu1  ;;  %4547 = vtanh.f32 %v1478_v56  ;;  %v1650_v45 = vld [vmem:[#allocation4 + $0x258] sm:$0xff]  ;;  %v1652_v12 = vld [vmem:[#allocation4 + $0x268] sm:$0xff]  ;;  %v1651_v56 = vld [vmem:[#allocation4 + $0x260] sm:$0xff] }
 0x2a0   : > { %v1482_v61 = vadd.f32 %v1481_v60, %v1243_v59  ;;  %v1483_v26 = vpop.f32.mrb[73].mxu1  ;;  %4127 = vmatprep.subr.bf16.mxu0 %v4126_v10  ;;  %v4538_v55 = vpop.eup %4537  ;;  %v1653_v10 = vld [vmem:[#allocation4 + $0x270] sm:$0xff]  ;;  %v1655_v60 = vld [vmem:[#allocation4 + $0x280] sm:$0xff] }
 0x2a1   : > { %v1484_v5 = vadd.f32 %v1483_v26, %v1243_v59  ;;  %4129 = vmatpush1.bf16.msra.mxu0 %v4128_v57  ;;  %v4540_v19 = vpop.eup %4539  ;;  %v1654_v57 = vld [vmem:[#allocation4 + $0x278] sm:$0xff]  ;;  %v1656_v59 = vld [vmem:[#allocation4 + $0x288] sm:$0xff]  ;;  %v1657_v26 = vld [vmem:[#allocation4 + $0x290] sm:$0xff] }
 0x2a2   : > { %4549 = vtanh.f32 %v1482_v61  ;;  %v1658_v61 = vld [vmem:[#allocation4 + $0x298] sm:$0xff] }
 0x2a3   : > { %4551 = vtanh.f32 %v1484_v5  ;;  %v1487_v15 = vpop.f32.mrb[74].mxu1  ;;  %v1660_v5 = vld [vmem:[#allocation4 + $0x2a8] sm:$0xff] }
 0x2a4   : > { %v4542_v29 = vpop.eup %4541  ;;  %v1488_v39 = vadd.f32 %v1487_v15, %v1248_v13  ;;  %v1489_v58 = vpop.f32.mrb[75].mxu1  ;;  %v1664_v15 = vld [vmem:[#allocation4 + $0x2c8] sm:$0xff] }
 0x2a5   : > { %v4544_v18 = vpop.eup %4543  ;;  %v1490_v40 = vadd.f32 %v1489_v58, %v1248_v13  ;;  %v4132_v20 = vpack.c.bf16 %v4542_v29, %v4538_v55  ;;  %v1659_v55 = vld [vmem:[#allocation4 + $0x2a0] sm:$0xff]  ;;  %v1661_v13 = vld [vmem:[#allocation4 + $0x2b0] sm:$0xff] }
 0x2a6   : > { %v4130_v21 = vpack.c.bf16 %v4544_v18, %v4540_v19  ;;  %4553 = vtanh.f32 %v1488_v39  ;;  %v1662_v19 = vld [vmem:[#allocation4 + $0x2b8] sm:$0xff]  ;;  %v1663_v29 = vld [vmem:[#allocation4 + $0x2c0] sm:$0xff]  ;;  %v1665_v58 = vld [vmem:[#allocation4 + $0x2d0] sm:$0xff] }
 0x2a7   : > { %v1493_v28 = vpop.f32.mrb[76].mxu1  ;;  %4555 = vtanh.f32 %v1490_v40  ;;  %v1666_v39 = vld [vmem:[#allocation4 + $0x2d8] sm:$0xff]  ;;  %v1668_v18 = vld [vmem:[#allocation4 + $0x2e8] sm:$0xff]  ;;  %v1667_v40 = vld [vmem:[#allocation4 + $0x2e0] sm:$0xff] }
 0x2a8   : > { %v1494_v36 = vadd.f32 %v1493_v28, %v1253_v23  ;;  %v1495_v46 = vpop.f32.mrb[77].mxu1  ;;  %4131 = vmatprep.subr.bf16.mxu0 %v4130_v21  ;;  %v4546_v44 = vpop.eup %4545  ;;  %v1669_v21 = vld [vmem:[#allocation4 + $0x2f0] sm:$0xff]  ;;  %v1671_v28 = vld [vmem:[#allocation4 + $0x300] sm:$0xff] }
 0x2a9   : > { %v1496_v32 = vadd.f32 %v1495_v46, %v1253_v23  ;;  %4133 = vmatpush1.bf16.msra.mxu0 %v4132_v20  ;;  %v4548_v31 = vpop.eup %4547  ;;  %v1670_v20 = vld [vmem:[#allocation4 + $0x2f8] sm:$0xff]  ;;  %v1672_v23 = vld [vmem:[#allocation4 + $0x308] sm:$0xff]  ;;  %v1673_v46 = vld [vmem:[#allocation4 + $0x310] sm:$0xff] }
 0x2aa   : > { %4557 = vtanh.f32 %v1494_v36  ;;  %v1674_v36 = vld [vmem:[#allocation4 + $0x318] sm:$0xff] }
 0x2ab   : > { %4559 = vtanh.f32 %v1496_v32  ;;  %v1499_v34 = vpop.f32.mrb[78].mxu1  ;;  %v1676_v32 = vld [vmem:[#allocation4 + $0x328] sm:$0xff] }
 0x2ac   : > { %v4550_v38 = vpop.eup %4549  ;;  %v1500_v41 = vadd.f32 %v1499_v34, %v1258_v62  ;;  %v1501_v6 = vpop.f32.mrb[79].mxu1  ;;  %v1680_v34 = vld [vmem:[#allocation4 + $0x348] sm:$0xff] }
 0x2ad   : > { %v4552_v37 = vpop.eup %4551  ;;  %v1502_v48 = vadd.f32 %v1501_v6, %v1258_v62  ;;  %v4136_v50 = vpack.c.bf16 %v4550_v38, %v4546_v44  ;;  %v1675_v44 = vld [vmem:[#allocation4 + $0x320] sm:$0xff]  ;;  %v1677_v62 = vld [vmem:[#allocation4 + $0x330] sm:$0xff] }
 0x2ae   : > { %v4134_v25 = vpack.c.bf16 %v4552_v37, %v4548_v31  ;;  %4561 = vtanh.f32 %v1500_v41  ;;  %v1678_v31 = vld [vmem:[#allocation4 + $0x338] sm:$0xff]  ;;  %v1679_v38 = vld [vmem:[#allocation4 + $0x340] sm:$0xff]  ;;  %v1681_v6 = vld [vmem:[#allocation4 + $0x350] sm:$0xff] }
 0x2af   : > { %v1505_v47 = vpop.f32.mrb[80].mxu1  ;;  %4563 = vtanh.f32 %v1502_v48  ;;  %v1682_v41 = vld [vmem:[#allocation4 + $0x358] sm:$0xff]  ;;  %v1684_v37 = vld [vmem:[#allocation4 + $0x368] sm:$0xff]  ;;  %v1683_v48 = vld [vmem:[#allocation4 + $0x360] sm:$0xff] }
 0x2b0   : > { %v1506_v51 = vadd.f32 %v1505_v47, %v1263_v35  ;;  %v1507_v1 = vpop.f32.mrb[81].mxu1  ;;  %4135 = vmatprep.subr.bf16.mxu0 %v4134_v25  ;;  %v4554_v11 = vpop.eup %4553  ;;  %v1685_v25 = vld [vmem:[#allocation4 + $0x370] sm:$0xff]  ;;  %v1687_v47 = vld [vmem:[#allocation4 + $0x380] sm:$0xff] }
 0x2b1   : > { %v1508_v7 = vadd.f32 %v1507_v1, %v1263_v35  ;;  %4137 = vmatpush1.bf16.msra.mxu0 %v4136_v50  ;;  %v4556_v17 = vpop.eup %4555  ;;  %v1686_v50 = vld [vmem:[#allocation4 + $0x378] sm:$0xff]  ;;  %v1688_v35 = vld [vmem:[#allocation4 + $0x388] sm:$0xff]  ;;  %v1689_v1 = vld [vmem:[#allocation4 + $0x390] sm:$0xff] }
 0x2b2   : > { %4565 = vtanh.f32 %v1506_v51  ;;  %v1690_v51 = vld [vmem:[#allocation4 + $0x398] sm:$0xff] }
 0x2b3   : > { %4567 = vtanh.f32 %v1508_v7  ;;  %v1028_v7 = vld [vmem:[#allocation4 + $0x1a8] sm:$0xff] }
 0x2b4   : > { %v4558_v24 = vpop.eup %4557  ;;  %1509 = vmatprep.mubr.f32.mxu1 %v1028_v7 }
 0x2b5   : > { %v4560_v33 = vpop.eup %4559  ;;  %v4140_v49 = vpack.c.bf16 %v4558_v24, %v4554_v11  ;;  %v1027_v11 = vld [vmem:[#allocation4 + $0x1a0] sm:$0xff]  ;;  %v1029_v24 = vld [vmem:[#allocation4 + $0x1b0] sm:$0xff] }
 0x2b6   : > { %v4138_v52 = vpack.c.bf16 %v4560_v33, %v4556_v17  ;;  %1510 = vmatmul.mubr.f32.gmra.mrb[82].mxu1 %v1027_v11  ;;  %v1030_v17 = vld [vmem:[#allocation4 + $0x1b8] sm:$0xff]  ;;  %v1032_v33 = vld [vmem:[#allocation4 + $0x1c8] sm:$0xff] }
 0x2b7   : > { %1513 = vmatprep.mubr.f32.mxu1 %v1030_v17 }
 0x2b8   : > { %4139 = vmatprep.subr.bf16.mxu0 %v4138_v52  ;;  %v4562_v54 = vpop.eup %4561  ;;  %v1034_v52 = vld [vmem:[#allocation4 + $0x1d8] sm:$0xff] }
 0x2b9   : > { %4141 = vmatpush1.bf16.msra.mxu0 %v4140_v49  ;;  %v4564_v63 = vpop.eup %4563  ;;  %v1031_v49 = vld [vmem:[#allocation4 + $0x1c0] sm:$0xff] }
 0x2ba   : > { %1514 = vmatmul.mubr.f32.gmra.mrb[84].mxu1 %v1029_v24 }
 0x2bb   : > { %1517 = vmatprep.mubr.f32.mxu1 %v1032_v33 }
 0x2bc   : > { %v4566_v4 = vpop.eup %4565 }
 0x2bd   : > { %v4568_v14 = vpop.eup %4567  ;;  %v4144_v30 = vpack.c.bf16 %v4566_v4, %v4562_v54  ;;  %v1033_v54 = vld [vmem:[#allocation4 + $0x1d0] sm:$0xff]  ;;  %v1035_v4 = vld [vmem:[#allocation4 + $0x1e0] sm:$0xff] }
 0x2be   : > { %v4142_v8 = vpack.c.bf16 %v4568_v14, %v4564_v63  ;;  %1518 = vmatmul.mubr.f32.gmra.mrb[86].mxu1 %v1031_v49  ;;  %v1036_v63 = vld [vmem:[#allocation4 + $0x1e8] sm:$0xff]  ;;  %v1038_v14 = vld [vmem:[#allocation4 + $0x1f8] sm:$0xff] }
 0x2bf   : > { %1521 = vmatprep.mubr.f32.mxu1 %v1034_v52 }
 0x2c0   : > { %4143 = vmatprep.subr.bf16.mxu0 %v4142_v8  ;;  %v2305_v8 = vld [vmem:[#allocation4 + $0x408] sm:$0xff] }
 0x2c1   : > { %4145 = vmatpush1.bf16.msra.mxu0 %v4144_v30  ;;  %v1037_v30 = vld [vmem:[#allocation4 + $0x1f0] sm:$0xff] }
 0x2c2   : > { %1522 = vmatmul.mubr.f32.gmra.mrb[88].mxu1 %v1033_v54 }
 0x2c3   : > { %1525 = vmatprep.mubr.f32.mxu1 %v1036_v63 }
 0x2c4   : > { %2019 = vmatmul.mubr.f32.vlgmr.msra.gmra.mrb[34].mxu0 %v1639_v16  ;;  %v1803_v16 = vpop.permute.xlu0 %1802 }
 0x2c5   : > { %2024 = vmatprep.mubr.f32.mxu0 %v1642_v42 }
 0x2c6   : > { %1526 = vmatmul.mubr.f32.gmra.mrb[90].mxu1 %v1035_v4 }
 0x2c7   : > { %1529 = vmatprep.mubr.f32.mxu1 %v1038_v14 }
 0x2c8   : > { %2025 = vmatmul.mubr.f32.gmra.mrb[36].mxu0 %v1641_v43 }
 0x2c9   : > { %2030 = vmatprep.mubr.f32.mxu0 %v1644_v53 }
 0x2ca   : > { %1530 = vmatmul.mubr.f32.gmra.mrb[92].mxu1 %v1037_v30 }
 0x2cb   : > { %2683 = vmatprep.mubr.f32.mxu1 %v2305_v8 }
 0x2cc   : > { %2031 = vmatmul.mubr.f32.gmra.mrb[38].mxu0 %v1643_v27 }
 0x2cd   : > { %2036 = vmatprep.mubr.f32.mxu0 %v1646_v0  ;;  %v1808_v0 = vpop.permute.xlu1 %1807 }
 0x2d0   : > { %2037 = vmatmul.mubr.f32.gmra.mrb[40].mxu0 %v1645_v9 }
 0x2d1   : > { %2042 = vmatprep.mubr.f32.mxu0 %v1648_v2 }
 0x2d4   : > { %2043 = vmatmul.mubr.f32.gmra.mrb[42].mxu0 %v1647_v22 }
 0x2d5   : > { %2048 = vmatprep.mubr.f32.mxu0 %v1650_v45 }
 0x2d8   : > { %2049 = vmatmul.mubr.f32.gmra.mrb[44].mxu0 %v1649_v3  ;;  %v1813_v3 = vpop.permute.xlu0 %1812 }
 0x2d9   : > { %2054 = vmatprep.mubr.f32.mxu0 %v1652_v12 }
 0x2dc   : > { %2055 = vmatmul.mubr.f32.gmra.mrb[46].mxu0 %v1651_v56 }
 0x2dd   : > { %2060 = vmatprep.mubr.f32.mxu0 %v1654_v57 }
 0x2e0   : > { %2061 = vmatmul.mubr.f32.gmra.mrb[48].mxu0 %v1653_v10 }
 0x2e1   : > { %2066 = vmatprep.mubr.f32.mxu0 %v1656_v59  ;;  %v1818_v59 = vpop.permute.xlu1 %1817 }
 0x2e4   : > { %2067 = vmatmul.mubr.f32.gmra.mrb[50].mxu0 %v1655_v60 }
 0x2e5   : > { %2072 = vmatprep.mubr.f32.mxu0 %v1658_v61 }
 0x2e8   : > { %2073 = vmatmul.mubr.f32.gmra.mrb[52].mxu0 %v1657_v26 }
 0x2e9   : > { %2078 = vmatprep.mubr.f32.mxu0 %v1660_v5 }
 0x2ec   : > { %2079 = vmatmul.mubr.f32.gmra.mrb[54].mxu0 %v1659_v55 }
 0x2ed   : > { %2084 = vmatprep.mubr.f32.mxu0 %v1662_v19 }
 0x2f0   : > { %2085 = vmatmul.mubr.f32.gmra.mrb[56].mxu0 %v1661_v13  ;;  %v1823_v13 = vpop.permute.xlu0 %1822 }
 0x2f1   : > { %2090 = vmatprep.mubr.f32.mxu0 %v1664_v15 }
 0x2f4   : > { %2091 = vmatmul.mubr.f32.gmra.mrb[58].mxu0 %v1663_v29 }
 0x2f5   : > { %2096 = vmatprep.mubr.f32.mxu0 %v1666_v39 }
 0x2f8   : > { %2097 = vmatmul.mubr.f32.gmra.mrb[60].mxu0 %v1665_v58 }
 0x2f9   : > { %2102 = vmatprep.mubr.f32.mxu0 %v1668_v18 }
 0x2fc   : > { %2103 = vmatmul.mubr.f32.gmra.mrb[62].mxu0 %v1667_v40 }
 0x2fd   : > { %2108 = vmatprep.mubr.f32.mxu0 %v1670_v20 }
 0x300   : > { %2109 = vmatmul.mubr.f32.gmra.mrb[64].mxu0 %v1669_v21 }
 0x301   : > { %2114 = vmatprep.mubr.f32.mxu0 %v1672_v23  ;;  %v1828_v23 = vpop.permute.xlu1 %1827 }
 0x304   : > { %2115 = vmatmul.mubr.f32.gmra.mrb[66].mxu0 %v1671_v28 }
 0x305   : > { %2120 = vmatprep.mubr.f32.mxu0 %v1674_v36 }
 0x308   : > { %2121 = vmatmul.mubr.f32.gmra.mrb[68].mxu0 %v1673_v46 }
 0x309   : > { %2126 = vmatprep.mubr.f32.mxu0 %v1676_v32 }
 0x30c   : > { %2127 = vmatmul.mubr.f32.gmra.mrb[70].mxu0 %v1675_v44 }
 0x30d   : > { %2132 = vmatprep.mubr.f32.mxu0 %v1678_v31 }
 0x310   : > { %2133 = vmatmul.mubr.f32.gmra.mrb[72].mxu0 %v1677_v62  ;;  %v1833_v62 = vpop.permute.xlu0 %1832 }
 0x311   : > { %2138 = vmatprep.mubr.f32.mxu0 %v1680_v34 }
 0x314   : > { %2139 = vmatmul.mubr.f32.gmra.mrb[74].mxu0 %v1679_v38  ;;  %v1843_v24 = vpop.permute.xlu0 %1842 }
 0x315   : > { %2144 = vmatprep.mubr.f32.mxu0 %v1682_v41 }
 0x318   : > { %2145 = vmatmul.mubr.f32.gmra.mrb[76].mxu0 %v1681_v6 }
 0x319   : > { %2150 = vmatprep.mubr.f32.mxu0 %v1684_v37 }
 0x31c   : > { %2151 = vmatmul.mubr.f32.gmra.mrb[78].mxu0 %v1683_v48 }
 0x31d   : > { %2156 = vmatprep.mubr.f32.mxu0 %v1686_v50 }
 0x320   : > { %2157 = vmatmul.mubr.f32.gmra.mrb[80].mxu0 %v1685_v25 }
 0x321   : > { %2162 = vmatprep.mubr.f32.mxu0 %v1688_v35  ;;  %v1838_v35 = vpop.permute.xlu1 %1837 }
 0x324   : > { %2163 = vmatmul.mubr.f32.gmra.mrb[82].mxu0 %v1687_v47 }
 0x325   : > { %2168 = vmatprep.mubr.f32.mxu0 %v1690_v51  ;;  %v1848_v8 = vpop.permute.xlu1 %1847 }
 0x328   : > { %2169 = vmatmul.mubr.f32.gmra.mrb[84].mxu0 %v1689_v1 }
 0x397   : > { %v2020_v42 = vpop.f32.mrb[34].mxu0 }
 0x398   : > { %v2021_v43 = vadd.f32 %v2020_v42, %v1803_v16  ;;  %v2022_v53 = vpop.f32.mrb[35].mxu0 }
 0x399   : > { %v2023_v27 = vadd.f32 %v2022_v53, %v1803_v16 }
 0x39a   : > { %4569 = vtanh.f32 %v2021_v43 }
 0x39b   : > { %v2026_v9 = vpop.f32.mrb[36].mxu0  ;;  %4571 = vtanh.f32 %v2023_v27 }
 0x39c   : > { %v2027_v2 = vadd.f32 %v2026_v9, %v1808_v0  ;;  %v2028_v22 = vpop.f32.mrb[37].mxu0  ;;  %v1853_v9 = vpop.permute.xlu0 %1852 }
 0x39d   : > { %v2029_v45 = vadd.f32 %v2028_v22, %v1808_v0 }
 0x39e   : > { %4573 = vtanh.f32 %v2027_v2 }
 0x39f   : > { %4575 = vtanh.f32 %v2029_v45  ;;  %v2032_v12 = vpop.f32.mrb[38].mxu0 }
 0x3a0   : > { %v2033_v56 = vadd.f32 %v2032_v12, %v1813_v3  ;;  %v2034_v57 = vpop.f32.mrb[39].mxu0 }
 0x3a1   : > { %v2035_v10 = vadd.f32 %v2034_v57, %v1813_v3 }
 0x3a2   : > { %4577 = vtanh.f32 %v2033_v56 }
 0x3a3   : > { %v2038_v60 = vpop.f32.mrb[40].mxu0  ;;  %4579 = vtanh.f32 %v2035_v10 }
 0x3a4   : > { %v2039_v61 = vadd.f32 %v2038_v60, %v1818_v59  ;;  %v2040_v26 = vpop.f32.mrb[41].mxu0  ;;  %v4570_v55 = vpop.eup %4569 }
 0x3a5   : > { %v2041_v5 = vadd.f32 %v2040_v26, %v1818_v59  ;;  %v4572_v19 = vpop.eup %4571  ;;  %v1858_v59 = vpop.permute.xlu1 %1857 }
 0x3a6   : > { %4581 = vtanh.f32 %v2039_v61 }
 0x3a7   : > { %4583 = vtanh.f32 %v2041_v5  ;;  %v2044_v15 = vpop.f32.mrb[42].mxu0 }
 0x3a8   : > { %v4574_v29 = vpop.eup %4573  ;;  %v2045_v39 = vadd.f32 %v2044_v15, %v1823_v13  ;;  %v2046_v58 = vpop.f32.mrb[43].mxu0 }
 0x3a9   : > { %v4576_v18 = vpop.eup %4575  ;;  %v2047_v40 = vadd.f32 %v2046_v58, %v1823_v13  ;;  %v4148_v20 = vpack.c.bf16 %v4574_v29, %v4570_v55  ;;  %v1863_v13 = vpop.permute.xlu0 %1862 }
 0x3aa   : > { %v4146_v21 = vpack.c.bf16 %v4576_v18, %v4572_v19  ;;  %4585 = vtanh.f32 %v2045_v39 }
 0x3ab   : > { %v2050_v28 = vpop.f32.mrb[44].mxu0  ;;  %4587 = vtanh.f32 %v2047_v40 }
 0x3ac   : > { %v2051_v36 = vadd.f32 %v2050_v28, %v1828_v23  ;;  %v2052_v46 = vpop.f32.mrb[45].mxu0  ;;  %4147 = vmatprep.subr.bf16.mxu1 %v4146_v21  ;;  %v4578_v44 = vpop.eup %4577 }
 0x3ad   : > { %v2053_v32 = vadd.f32 %v2052_v46, %v1828_v23  ;;  %4149 = vmatpush1.bf16.msra.mxu1 %v4148_v20  ;;  %v4580_v31 = vpop.eup %4579  ;;  %v1868_v23 = vpop.permute.xlu1 %1867 }
 0x3ae   : > { %4589 = vtanh.f32 %v2051_v36 }
 0x3af   : > { %4591 = vtanh.f32 %v2053_v32  ;;  %v2056_v34 = vpop.f32.mrb[46].mxu0 }
 0x3b0   : > { %v4582_v38 = vpop.eup %4581  ;;  %v2057_v41 = vadd.f32 %v2056_v34, %v1833_v62  ;;  %v2058_v6 = vpop.f32.mrb[47].mxu0 }
 0x3b1   : > { %v4584_v37 = vpop.eup %4583  ;;  %v2059_v48 = vadd.f32 %v2058_v6, %v1833_v62  ;;  %v4152_v50 = vpack.c.bf16 %v4582_v38, %v4578_v44  ;;  %v1873_v62 = vpop.permute.xlu0 %1872 }
 0x3b2   : > { %v4150_v25 = vpack.c.bf16 %v4584_v37, %v4580_v31  ;;  %4593 = vtanh.f32 %v2057_v41 }
 0x3b3   : > { %v2062_v47 = vpop.f32.mrb[48].mxu0  ;;  %4595 = vtanh.f32 %v2059_v48 }
 0x3b4   : > { %v2063_v51 = vadd.f32 %v2062_v47, %v1838_v35  ;;  %v2064_v1 = vpop.f32.mrb[49].mxu0  ;;  %4151 = vmatprep.subr.bf16.mxu1 %v4150_v25  ;;  %v4586_v11 = vpop.eup %4585 }
 0x3b5   : > { %v2065_v7 = vadd.f32 %v2064_v1, %v1838_v35  ;;  %4153 = vmatpush1.bf16.msra.mxu1 %v4152_v50  ;;  %v4588_v17 = vpop.eup %4587  ;;  %v1878_v35 = vpop.permute.xlu1 %1877 }
 0x3b6   : > { %4597 = vtanh.f32 %v2063_v51 }
 0x3b7   : > { %4599 = vtanh.f32 %v2065_v7  ;;  %v2068_v33 = vpop.f32.mrb[50].mxu0 }
 0x3b8   : > { %v4590_v49 = vpop.eup %4589  ;;  %v2069_v52 = vadd.f32 %v2068_v33, %v1843_v24  ;;  %v2070_v54 = vpop.f32.mrb[51].mxu0 }
 0x3b9   : > { %v4592_v63 = vpop.eup %4591  ;;  %v2071_v4 = vadd.f32 %v2070_v54, %v1843_v24  ;;  %v4156_v14 = vpack.c.bf16 %v4590_v49, %v4586_v11  ;;  %v1883_v24 = vpop.permute.xlu0 %1882 }
 0x3ba   : > { %v4154_v30 = vpack.c.bf16 %v4592_v63, %v4588_v17  ;;  %4601 = vtanh.f32 %v2069_v52 }
 0x3bb   : > { %v2074_v16 = vpop.f32.mrb[52].mxu0  ;;  %4603 = vtanh.f32 %v2071_v4 }
 0x3bc   : > { %v2075_v42 = vadd.f32 %v2074_v16, %v1848_v8  ;;  %v2076_v43 = vpop.f32.mrb[53].mxu0  ;;  %4155 = vmatprep.subr.bf16.mxu1 %v4154_v30  ;;  %v4594_v27 = vpop.eup %4593 }
 0x3bd   : > { %v2077_v53 = vadd.f32 %v2076_v43, %v1848_v8  ;;  %4157 = vmatpush1.bf16.msra.mxu1 %v4156_v14  ;;  %v4596_v0 = vpop.eup %4595  ;;  %v1888_v8 = vpop.permute.xlu1 %1887 }
 0x3be   : > { %4605 = vtanh.f32 %v2075_v42 }
 0x3bf   : > { %4607 = vtanh.f32 %v2077_v53  ;;  %v2080_v2 = vpop.f32.mrb[54].mxu0 }
 0x3c0   : > { %v4598_v22 = vpop.eup %4597  ;;  %v2081_v45 = vadd.f32 %v2080_v2, %v1853_v9  ;;  %v2082_v3 = vpop.f32.mrb[55].mxu0 }
 0x3c1   : > { %v4600_v12 = vpop.eup %4599  ;;  %v2083_v56 = vadd.f32 %v2082_v3, %v1853_v9  ;;  %v4160_v57 = vpack.c.bf16 %v4598_v22, %v4594_v27  ;;  %v1893_v9 = vpop.permute.xlu0 %1892 }
 0x3c2   : > { %v4158_v10 = vpack.c.bf16 %v4600_v12, %v4596_v0  ;;  %4609 = vtanh.f32 %v2081_v45 }
 0x3c3   : > { %v2086_v60 = vpop.f32.mrb[56].mxu0  ;;  %4611 = vtanh.f32 %v2083_v56 }
 0x3c4   : > { %v2087_v61 = vadd.f32 %v2086_v60, %v1858_v59  ;;  %v2088_v26 = vpop.f32.mrb[57].mxu0  ;;  %4159 = vmatprep.subr.bf16.mxu1 %v4158_v10  ;;  %v4602_v55 = vpop.eup %4601 }
 0x3c5   : > { %v2089_v5 = vadd.f32 %v2088_v26, %v1858_v59  ;;  %4161 = vmatpush1.bf16.msra.mxu1 %v4160_v57  ;;  %v4604_v19 = vpop.eup %4603  ;;  %v1898_v59 = vpop.permute.xlu1 %1897 }
 0x3c6   : > { %4613 = vtanh.f32 %v2087_v61 }
 0x3c7   : > { %4615 = vtanh.f32 %v2089_v5  ;;  %v2092_v15 = vpop.f32.mrb[58].mxu0 }
 0x3c8   : > { %v4606_v29 = vpop.eup %4605  ;;  %v2093_v39 = vadd.f32 %v2092_v15, %v1863_v13  ;;  %v2094_v58 = vpop.f32.mrb[59].mxu0 }
 0x3c9   : > { %v4608_v18 = vpop.eup %4607  ;;  %v2095_v40 = vadd.f32 %v2094_v58, %v1863_v13  ;;  %v4164_v20 = vpack.c.bf16 %v4606_v29, %v4602_v55  ;;  %v1903_v13 = vpop.permute.xlu0 %1902 }
 0x3ca   : > { %v4162_v21 = vpack.c.bf16 %v4608_v18, %v4604_v19  ;;  %4617 = vtanh.f32 %v2093_v39 }
 0x3cb   : > { %v2098_v28 = vpop.f32.mrb[60].mxu0  ;;  %4619 = vtanh.f32 %v2095_v40 }
 0x3cc   : > { %v2099_v36 = vadd.f32 %v2098_v28, %v1868_v23  ;;  %v2100_v46 = vpop.f32.mrb[61].mxu0  ;;  %4163 = vmatprep.subr.bf16.mxu1 %v4162_v21  ;;  %v4610_v44 = vpop.eup %4609 }
 0x3cd   : > { %v2101_v32 = vadd.f32 %v2100_v46, %v1868_v23  ;;  %4165 = vmatpush1.bf16.msra.mxu1 %v4164_v20  ;;  %v4612_v31 = vpop.eup %4611  ;;  %v1908_v23 = vpop.permute.xlu1 %1907 }
 0x3ce   : > { %4621 = vtanh.f32 %v2099_v36 }
 0x3cf   : > { %4623 = vtanh.f32 %v2101_v32  ;;  %v2104_v34 = vpop.f32.mrb[62].mxu0 }
 0x3d0   : > { %v4614_v38 = vpop.eup %4613  ;;  %v2105_v41 = vadd.f32 %v2104_v34, %v1873_v62  ;;  %v2106_v6 = vpop.f32.mrb[63].mxu0 }
 0x3d1   : > { %v4616_v37 = vpop.eup %4615  ;;  %v2107_v48 = vadd.f32 %v2106_v6, %v1873_v62  ;;  %v4168_v50 = vpack.c.bf16 %v4614_v38, %v4610_v44  ;;  %v1913_v62 = vpop.permute.xlu0 %1912 }
 0x3d2   : > { %v4166_v25 = vpack.c.bf16 %v4616_v37, %v4612_v31  ;;  %4625 = vtanh.f32 %v2105_v41 }
 0x3d3   : > { %v2110_v47 = vpop.f32.mrb[64].mxu0  ;;  %4627 = vtanh.f32 %v2107_v48 }
 0x3d4   : > { %v2111_v51 = vadd.f32 %v2110_v47, %v1878_v35  ;;  %v2112_v1 = vpop.f32.mrb[65].mxu0  ;;  %4167 = vmatprep.subr.bf16.mxu1 %v4166_v25  ;;  %v4618_v11 = vpop.eup %4617 }
 0x3d5   : > { %v2113_v7 = vadd.f32 %v2112_v1, %v1878_v35  ;;  %4169 = vmatpush1.bf16.msra.mxu1 %v4168_v50  ;;  %v4620_v17 = vpop.eup %4619  ;;  %v1918_v35 = vpop.permute.xlu1 %1917 }
 0x3d6   : > { %4629 = vtanh.f32 %v2111_v51 }
 0x3d7   : > { %4631 = vtanh.f32 %v2113_v7  ;;  %v2116_v33 = vpop.f32.mrb[66].mxu0 }
 0x3d8   : > { %v4622_v49 = vpop.eup %4621  ;;  %v2117_v52 = vadd.f32 %v2116_v33, %v1883_v24  ;;  %v2118_v54 = vpop.f32.mrb[67].mxu0 }
 0x3d9   : > { %v4624_v63 = vpop.eup %4623  ;;  %v2119_v4 = vadd.f32 %v2118_v54, %v1883_v24  ;;  %v4172_v14 = vpack.c.bf16 %v4622_v49, %v4618_v11  ;;  %v1923_v24 = vpop.permute.xlu0 %1922 }
 0x3da   : > { %v4170_v30 = vpack.c.bf16 %v4624_v63, %v4620_v17  ;;  %4633 = vtanh.f32 %v2117_v52 }
 0x3db   : > { %v2122_v16 = vpop.f32.mrb[68].mxu0  ;;  %4635 = vtanh.f32 %v2119_v4 }
 0x3dc   : > { %v2123_v42 = vadd.f32 %v2122_v16, %v1888_v8  ;;  %v2124_v43 = vpop.f32.mrb[69].mxu0  ;;  %4171 = vmatprep.subr.bf16.mxu1 %v4170_v30  ;;  %v4626_v27 = vpop.eup %4625 }
 0x3dd   : > { %v2125_v53 = vadd.f32 %v2124_v43, %v1888_v8  ;;  %4173 = vmatpush1.bf16.msra.mxu1 %v4172_v14  ;;  %v4628_v0 = vpop.eup %4627  ;;  %v1928_v8 = vpop.permute.xlu1 %1927 }
 0x3de   : > { %4637 = vtanh.f32 %v2123_v42 }
 0x3df   : > { %4639 = vtanh.f32 %v2125_v53  ;;  %v2128_v2 = vpop.f32.mrb[70].mxu0 }
 0x3e0   : > { %v4630_v22 = vpop.eup %4629  ;;  %v2129_v45 = vadd.f32 %v2128_v2, %v1893_v9  ;;  %v2130_v3 = vpop.f32.mrb[71].mxu0 }
 0x3e1   : > { %v4632_v12 = vpop.eup %4631  ;;  %v2131_v56 = vadd.f32 %v2130_v3, %v1893_v9  ;;  %v4176_v57 = vpack.c.bf16 %v4630_v22, %v4626_v27 }
 0x3e2   : > { %v4174_v10 = vpack.c.bf16 %v4632_v12, %v4628_v0  ;;  %4641 = vtanh.f32 %v2129_v45 }
 0x3e3   : > { %v2134_v60 = vpop.f32.mrb[72].mxu0  ;;  %4643 = vtanh.f32 %v2131_v56 }
 0x3e4   : > { %v2135_v61 = vadd.f32 %v2134_v60, %v1898_v59  ;;  %v2136_v26 = vpop.f32.mrb[73].mxu0  ;;  %4175 = vmatprep.subr.bf16.mxu1 %v4174_v10  ;;  %v4634_v55 = vpop.eup %4633  ;;  %v2304_v60 = vld [vmem:[#allocation4 + $0x400] sm:$0xff] }
 0x3e5   : > { %v2137_v5 = vadd.f32 %v2136_v26, %v1898_v59  ;;  %4177 = vmatpush1.bf16.msra.mxu1 %v4176_v57  ;;  %v4636_v19 = vpop.eup %4635  ;;  %v2306_v26 = vld [vmem:[#allocation4 + $0x410] sm:$0xff] }
 0x3e6   : > { %4645 = vtanh.f32 %v2135_v61  ;;  %v2307_v61 = vld [vmem:[#allocation4 + $0x418] sm:$0xff] }
 0x3e7   : > { %4647 = vtanh.f32 %v2137_v5  ;;  %v2140_v15 = vpop.f32.mrb[74].mxu0  ;;  %v2309_v5 = vld [vmem:[#allocation4 + $0x428] sm:$0xff] }
 0x3e8   : > { %v4638_v29 = vpop.eup %4637  ;;  %v2141_v39 = vadd.f32 %v2140_v15, %v1903_v13  ;;  %v2142_v58 = vpop.f32.mrb[75].mxu0  ;;  %v2313_v15 = vld [vmem:[#allocation4 + $0x448] sm:$0xff] }
 0x3e9   : > { %v4640_v18 = vpop.eup %4639  ;;  %v2143_v40 = vadd.f32 %v2142_v58, %v1903_v13  ;;  %v4180_v20 = vpack.c.bf16 %v4638_v29, %v4634_v55  ;;  %v2308_v55 = vld [vmem:[#allocation4 + $0x420] sm:$0xff]  ;;  %v2310_v13 = vld [vmem:[#allocation4 + $0x430] sm:$0xff] }
 0x3ea   : > { %v4178_v21 = vpack.c.bf16 %v4640_v18, %v4636_v19  ;;  %4649 = vtanh.f32 %v2141_v39  ;;  %v2311_v19 = vld [vmem:[#allocation4 + $0x438] sm:$0xff]  ;;  %v2312_v29 = vld [vmem:[#allocation4 + $0x440] sm:$0xff]  ;;  %v2314_v58 = vld [vmem:[#allocation4 + $0x450] sm:$0xff] }
 0x3eb   : > { %v2146_v28 = vpop.f32.mrb[76].mxu0  ;;  %4651 = vtanh.f32 %v2143_v40  ;;  %v2315_v39 = vld [vmem:[#allocation4 + $0x458] sm:$0xff]  ;;  %v2317_v18 = vld [vmem:[#allocation4 + $0x468] sm:$0xff]  ;;  %v2316_v40 = vld [vmem:[#allocation4 + $0x460] sm:$0xff] }
 0x3ec   : > { %v2147_v36 = vadd.f32 %v2146_v28, %v1908_v23  ;;  %v2148_v46 = vpop.f32.mrb[77].mxu0  ;;  %4179 = vmatprep.subr.bf16.mxu1 %v4178_v21  ;;  %v4642_v44 = vpop.eup %4641  ;;  %v2318_v21 = vld [vmem:[#allocation4 + $0x470] sm:$0xff]  ;;  %v2320_v28 = vld [vmem:[#allocation4 + $0x480] sm:$0xff] }
 0x3ed   : > { %v2149_v32 = vadd.f32 %v2148_v46, %v1908_v23  ;;  %4181 = vmatpush1.bf16.msra.mxu1 %v4180_v20  ;;  %v4644_v31 = vpop.eup %4643  ;;  %v2319_v20 = vld [vmem:[#allocation4 + $0x478] sm:$0xff]  ;;  %v2321_v23 = vld [vmem:[#allocation4 + $0x488] sm:$0xff]  ;;  %v2322_v46 = vld [vmem:[#allocation4 + $0x490] sm:$0xff] }
 0x3ee   : > { %4653 = vtanh.f32 %v2147_v36  ;;  %v2323_v36 = vld [vmem:[#allocation4 + $0x498] sm:$0xff] }
 0x3ef   : > { %4655 = vtanh.f32 %v2149_v32  ;;  %v2152_v34 = vpop.f32.mrb[78].mxu0  ;;  %v2325_v32 = vld [vmem:[#allocation4 + $0x4a8] sm:$0xff] }
 0x3f0   : > { %v4646_v38 = vpop.eup %4645  ;;  %v2153_v41 = vadd.f32 %v2152_v34, %v1913_v62  ;;  %v2154_v6 = vpop.f32.mrb[79].mxu0  ;;  %v2329_v34 = vld [vmem:[#allocation4 + $0x4c8] sm:$0xff] }
 0x3f1   : > { %v4648_v37 = vpop.eup %4647  ;;  %v2155_v48 = vadd.f32 %v2154_v6, %v1913_v62  ;;  %v4184_v50 = vpack.c.bf16 %v4646_v38, %v4642_v44  ;;  %v2324_v44 = vld [vmem:[#allocation4 + $0x4a0] sm:$0xff]  ;;  %v2326_v62 = vld [vmem:[#allocation4 + $0x4b0] sm:$0xff] }
 0x3f2   : > { %v4182_v25 = vpack.c.bf16 %v4648_v37, %v4644_v31  ;;  %4657 = vtanh.f32 %v2153_v41  ;;  %v2327_v31 = vld [vmem:[#allocation4 + $0x4b8] sm:$0xff]  ;;  %v2328_v38 = vld [vmem:[#allocation4 + $0x4c0] sm:$0xff]  ;;  %v2330_v6 = vld [vmem:[#allocation4 + $0x4d0] sm:$0xff] }
 0x3f3   : > { %v2158_v47 = vpop.f32.mrb[80].mxu0  ;;  %4659 = vtanh.f32 %v2155_v48  ;;  %v2331_v41 = vld [vmem:[#allocation4 + $0x4d8] sm:$0xff]  ;;  %v2333_v37 = vld [vmem:[#allocation4 + $0x4e8] sm:$0xff]  ;;  %v2332_v48 = vld [vmem:[#allocation4 + $0x4e0] sm:$0xff] }
 0x3f4   : > { %v2159_v51 = vadd.f32 %v2158_v47, %v1918_v35  ;;  %v2160_v1 = vpop.f32.mrb[81].mxu0  ;;  %4183 = vmatprep.subr.bf16.mxu1 %v4182_v25  ;;  %v4650_v11 = vpop.eup %4649  ;;  %v2334_v25 = vld [vmem:[#allocation4 + $0x4f0] sm:$0xff] }
 0x3f5   : > { %v2161_v7 = vadd.f32 %v2160_v1, %v1918_v35  ;;  %4185 = vmatpush1.bf16.msra.mxu1 %v4184_v50  ;;  %v4652_v17 = vpop.eup %4651  ;;  %v2335_v50 = vld [vmem:[#allocation4 + $0x4f8] sm:$0xff]  ;;  %v2337_v35 = vld [vmem:[#allocation4 + $0x508] sm:$0xff]  ;;  %v1511_v47 = vpop.f32.mrb[82].mxu1 }
 0x3f6   : > { %4661 = vtanh.f32 %v2159_v51  ;;  %v2336_v51 = vld [vmem:[#allocation4 + $0x500] sm:$0xff]  ;;  %v1512_v1 = vpop.f32.mrb[83].mxu1 }
 0x3f7   : > { %4663 = vtanh.f32 %v2161_v7  ;;  %v2164_v33 = vpop.f32.mrb[82].mxu0  ;;  %v2339_v7 = vld [vmem:[#allocation4 + $0x518] sm:$0xff] }
 0x3f8   : > { %v4654_v49 = vpop.eup %4653  ;;  %v2165_v52 = vadd.f32 %v2164_v33, %v1923_v24  ;;  %v2166_v54 = vpop.f32.mrb[83].mxu0  ;;  %v2341_v33 = vld [vmem:[#allocation4 + $0x528] sm:$0xff] }
 0x3f9   : > { %v4656_v63 = vpop.eup %4655  ;;  %v2167_v4 = vadd.f32 %v2166_v54, %v1923_v24  ;;  %v4188_v14 = vpack.c.bf16 %v4654_v49, %v4650_v11  ;;  %v1515_v11 = vpop.f32.mrb[84].mxu1 }
 0x3fa   : > { %v4186_v30 = vpack.c.bf16 %v4656_v63, %v4652_v17  ;;  %4665 = vtanh.f32 %v2165_v52  ;;  %v2338_v17 = vld [vmem:[#allocation4 + $0x510] sm:$0xff]  ;;  %v1516_v24 = vpop.f32.mrb[85].mxu1  ;;  %v2340_v52 = vld [vmem:[#allocation4 + $0x520] sm:$0xff]  ;;  %v2343_v63 = vld [vmem:[#allocation4 + $0x538] sm:$0xff] }
 0x3fb   : > { %v2170_v16 = vpop.f32.mrb[84].mxu0  ;;  %4667 = vtanh.f32 %v2167_v4  ;;  %v1519_v49 = vpop.f32.mrb[86].mxu1 }
 0x3fc   : > { %v2171_v42 = vadd.f32 %v2170_v16, %v1928_v8  ;;  %v2172_v43 = vpop.f32.mrb[85].mxu0  ;;  %4187 = vmatprep.subr.bf16.mxu1 %v4186_v30  ;;  %v4658_v27 = vpop.eup %4657 }
 0x3fd   : > { %v2173_v53 = vadd.f32 %v2172_v43, %v1928_v8  ;;  %4189 = vmatpush1.bf16.msra.mxu1 %v4188_v14  ;;  %v4660_v0 = vpop.eup %4659  ;;  %v1520_v54 = vpop.f32.mrb[87].mxu1  ;;  %v2342_v14 = vld [vmem:[#allocation4 + $0x530] sm:$0xff]  ;;  %v2345_v8 = vld [vmem:[#allocation4 + $0x548] sm:$0xff] }
 0x3fe   : > { %4669 = vtanh.f32 %v2171_v42  ;;  %v1523_v4 = vpop.f32.mrb[88].mxu1  ;;  %v2344_v42 = vld [vmem:[#allocation4 + $0x540] sm:$0xff] }
 0x3ff   : > { %4671 = vtanh.f32 %v2173_v53  ;;  %v1524_v30 = vpop.f32.mrb[89].mxu1  ;;  %v2347_v53 = vld [vmem:[#allocation4 + $0x558] sm:$0xff] }
 0x400   : > { %v4662_v9 = vpop.eup %4661  ;;  %v1527_v16 = vpop.f32.mrb[90].mxu1 }
 0x401   : > { %v4664_v2 = vpop.eup %4663  ;;  %v4192_v22 = vpack.c.bf16 %v4662_v9, %v4658_v27  ;;  %v1528_v43 = vpop.f32.mrb[91].mxu1 }
 0x402   : > { %v4190_v45 = vpack.c.bf16 %v4664_v2, %v4660_v0  ;;  %v1531_v27 = vpop.f32.mrb[92].mxu1  ;;  %v2346_v0 = vld [vmem:[#allocation4 + $0x550] sm:$0xff]  ;;  %v2349_v2 = vld [vmem:[#allocation4 + $0x568] sm:$0xff] }
 0x403   : > { %v1532_v9 = vpop.f32.mrb[93].mxu1 }
 0x404   : > { %4191 = vmatprep.subr.bf16.mxu1 %v4190_v45  ;;  %v4666_v3 = vpop.eup %4665  ;;  %v2351_v45 = vld [vmem:[#allocation4 + $0x578] sm:$0xff] }
 0x405   : > { %4193 = vmatpush1.bf16.msra.mxu1 %v4192_v22  ;;  %v4668_v12 = vpop.eup %4667  ;;  %v2348_v22 = vld [vmem:[#allocation4 + $0x560] sm:$0xff] }
 0x408   : > { %v4670_v56 = vpop.eup %4669 }
 0x409   : > { %v4672_v57 = vpop.eup %4671  ;;  %v4196_v10 = vpack.c.bf16 %v4670_v56, %v4666_v3  ;;  %v2350_v3 = vld [vmem:[#allocation4 + $0x570] sm:$0xff]  ;;  %v2352_v56 = vld [vmem:[#allocation4 + $0x580] sm:$0xff] }
 0x40a   : > { %v4194_v59 = vpack.c.bf16 %v4672_v57, %v4668_v12  ;;  %v2353_v12 = vld [vmem:[#allocation4 + $0x588] sm:$0xff]  ;;  %v2355_v57 = vld [vmem:[#allocation4 + $0x598] sm:$0xff] }
 0x40c   : > { %4195 = vmatprep.subr.bf16.mxu1 %v4194_v59  ;;  %v1692_v59 = vld [vmem:[#allocation4 + $0x3a8] sm:$0xff] }
 0x40d   : > { %4197 = vmatpush1.bf16.msra.mxu1 %v4196_v10  ;;  %v2354_v10 = vld [vmem:[#allocation4 + $0x590] sm:$0xff]  ;;  %2174 = vmatprep.mubr.f32.mxu0 %v1692_v59 }
 0x410   : > { %2684 = vmatmul.mubr.f32.vlgmr.msra.gmra.mrb[94].mxu1 %v2304_v60  ;;  %v1691_v60 = vld [vmem:[#allocation4 + $0x3a0] sm:$0xff] }
 0x411   : > { %2689 = vmatprep.mubr.f32.mxu1 %v2307_v61  ;;  %2175 = vmatmul.mubr.f32.gmra.mrb[86].mxu0 %v1691_v60  ;;  %v1694_v61 = vld [vmem:[#allocation4 + $0x3b8] sm:$0xff] }
 0x412   : > { %2178 = vmatprep.mubr.f32.mxu0 %v1694_v61 }
 0x414   : > { %2690 = vmatmul.mubr.f32.gmra.mrb[96].mxu1 %v2306_v26  ;;  %v1693_v26 = vld [vmem:[#allocation4 + $0x3b0] sm:$0xff] }
 0x415   : > { %2695 = vmatprep.mubr.f32.mxu1 %v2309_v5  ;;  %2179 = vmatmul.mubr.f32.gmra.mrb[88].mxu0 %v1693_v26  ;;  %v1696_v5 = vld [vmem:[#allocation4 + $0x3c8] sm:$0xff] }
 0x416   : > { %2182 = vmatprep.mubr.f32.mxu0 %v1696_v5 }
 0x418   : > { %2696 = vmatmul.mubr.f32.gmra.mrb[98].mxu1 %v2308_v55  ;;  %v1695_v55 = vld [vmem:[#allocation4 + $0x3c0] sm:$0xff] }
 0x419   : > { %2701 = vmatprep.mubr.f32.mxu1 %v2311_v19  ;;  %v1698_v19 = vld [vmem:[#allocation4 + $0x3d8] sm:$0xff]  ;;  %2183 = vmatmul.mubr.f32.gmra.mrb[90].mxu0 %v1695_v55 }
 0x41a   : > { %2186 = vmatprep.mubr.f32.mxu0 %v1698_v19 }
 0x41c   : > { %2702 = vmatmul.mubr.f32.gmra.mrb[100].mxu1 %v2310_v13  ;;  %v1697_v13 = vld [vmem:[#allocation4 + $0x3d0] sm:$0xff] }
 0x41d   : > { %2707 = vmatprep.mubr.f32.mxu1 %v2313_v15  ;;  %2187 = vmatmul.mubr.f32.gmra.mrb[92].mxu0 %v1697_v13  ;;  %v1700_v15 = vld [vmem:[#allocation4 + $0x3e8] sm:$0xff] }
 0x41e   : > { %2190 = vmatprep.mubr.f32.mxu0 %v1700_v15 }
 0x420   : > { %2708 = vmatmul.mubr.f32.gmra.mrb[102].mxu1 %v2312_v29  ;;  %v1699_v29 = vld [vmem:[#allocation4 + $0x3e0] sm:$0xff] }
 0x421   : > { %2713 = vmatprep.mubr.f32.mxu1 %v2315_v39  ;;  %v1702_v39 = vld [vmem:[#allocation4 + $0x3f8] sm:$0xff]  ;;  %2191 = vmatmul.mubr.f32.gmra.mrb[94].mxu0 %v1699_v29 }
 0x422   : > { %2194 = vmatprep.mubr.f32.mxu0 %v1702_v39 }
 0x424   : > { %2714 = vmatmul.mubr.f32.gmra.mrb[104].mxu1 %v2314_v58  ;;  %v1701_v58 = vld [vmem:[#allocation4 + $0x3f0] sm:$0xff] }
 0x425   : > { %2719 = vmatprep.mubr.f32.mxu1 %v2317_v18  ;;  %2195 = vmatmul.mubr.f32.gmra.mrb[96].mxu0 %v1701_v58  ;;  %v2970_v18 = vld [vmem:[#allocation4 + $0x608] sm:$0xff] }
 0x426   : > { %3348 = vmatprep.mubr.f32.mxu0 %v2970_v18 }
 0x428   : > { %2720 = vmatmul.mubr.f32.gmra.mrb[106].mxu1 %v2316_v40  ;;  %v2468_v40 = vpop.permute.xlu0 %2467 }
 0x429   : > { %2725 = vmatprep.mubr.f32.mxu1 %v2319_v20 }
 0x42c   : > { %2726 = vmatmul.mubr.f32.gmra.mrb[108].mxu1 %v2318_v21 }
 0x42d   : > { %2731 = vmatprep.mubr.f32.mxu1 %v2321_v23 }
 0x430   : > { %2732 = vmatmul.mubr.f32.gmra.mrb[110].mxu1 %v2320_v28 }
 0x431   : > { %2737 = vmatprep.mubr.f32.mxu1 %v2323_v36  ;;  %v2473_v36 = vpop.permute.xlu1 %2472 }
 0x434   : > { %2738 = vmatmul.mubr.f32.gmra.mrb[112].mxu1 %v2322_v46 }
 0x435   : > { %2743 = vmatprep.mubr.f32.mxu1 %v2325_v32 }
 0x438   : > { %2744 = vmatmul.mubr.f32.gmra.mrb[114].mxu1 %v2324_v44 }
 0x439   : > { %2749 = vmatprep.mubr.f32.mxu1 %v2327_v31 }
 0x43c   : > { %2750 = vmatmul.mubr.f32.gmra.mrb[116].mxu1 %v2326_v62  ;;  %v2478_v62 = vpop.permute.xlu0 %2477 }
 0x43d   : > { %2755 = vmatprep.mubr.f32.mxu1 %v2329_v34 }
 0x440   : > { %2756 = vmatmul.mubr.f32.gmra.mrb[118].mxu1 %v2328_v38  ;;  %v2488_v1 = vpop.permute.xlu0 %2487 }
 0x441   : > { %2761 = vmatprep.mubr.f32.mxu1 %v2331_v41 }
 0x444   : > { %2762 = vmatmul.mubr.f32.gmra.mrb[120].mxu1 %v2330_v6  ;;  %v2498_v43 = vpop.permute.xlu0 %2497 }
 0x445   : > { %2767 = vmatprep.mubr.f32.mxu1 %v2333_v37  ;;  %v2483_v37 = vpop.permute.xlu1 %2482 }
 0x448   : > { %2768 = vmatmul.mubr.f32.gmra.mrb[122].mxu1 %v2332_v48  ;;  %v2508_v26 = vpop.permute.xlu0 %2507 }
 0x449   : > { %2773 = vmatprep.mubr.f32.mxu1 %v2335_v50 }
 0x44c   : > { %2774 = vmatmul.mubr.f32.gmra.mrb[124].mxu1 %v2334_v25 }
 0x44d   : > { %2779 = vmatprep.mubr.f32.mxu1 %v2337_v35 }
 0x450   : > { %2780 = vmatmul.mubr.f32.gmra.mrb[126].mxu1 %v2336_v51 }
 0x451   : > { %2785 = vmatprep.mubr.f32.mxu1 %v2339_v7 }
 0x454   : > { %2786 = vmatmul.mubr.f32.gmra.mrb[128].mxu1 %v2338_v17 }
 0x455   : > { %2791 = vmatprep.mubr.f32.mxu1 %v2341_v33 }
 0x458   : > { %2792 = vmatmul.mubr.f32.gmra.mrb[130].mxu1 %v2340_v52 }
 0x459   : > { %2797 = vmatprep.mubr.f32.mxu1 %v2343_v63  ;;  %v2493_v63 = vpop.permute.xlu1 %2492 }
 0x45c   : > { %2798 = vmatmul.mubr.f32.gmra.mrb[132].mxu1 %v2342_v14 }
 0x45d   : > { %2803 = vmatprep.mubr.f32.mxu1 %v2345_v8 }
 0x460   : > { %2804 = vmatmul.mubr.f32.gmra.mrb[134].mxu1 %v2344_v42 }
 0x461   : > { %2809 = vmatprep.mubr.f32.mxu1 %v2347_v53 }
 0x464   : > { %2810 = vmatmul.mubr.f32.gmra.mrb[136].mxu1 %v2346_v0 }
 0x465   : > { %2815 = vmatprep.mubr.f32.mxu1 %v2349_v2 }
 0x468   : > { %2816 = vmatmul.mubr.f32.gmra.mrb[138].mxu1 %v2348_v22 }
 0x469   : > { %2821 = vmatprep.mubr.f32.mxu1 %v2351_v45 }
 0x46c   : > { %2822 = vmatmul.mubr.f32.gmra.mrb[140].mxu1 %v2350_v3 }
 0x46d   : > { %2827 = vmatprep.mubr.f32.mxu1 %v2353_v12  ;;  %v2503_v12 = vpop.permute.xlu1 %2502 }
 0x470   : > { %2828 = vmatmul.mubr.f32.gmra.mrb[142].mxu1 %v2352_v56 }
 0x471   : > { %2833 = vmatprep.mubr.f32.mxu1 %v2355_v57  ;;  %v2513_v18 = vpop.permute.xlu1 %2512 }
 0x474   : > { %2834 = vmatmul.mubr.f32.gmra.mrb[144].mxu1 %v2354_v10 }
 0x4e3   : > { %v2685_v20 = vpop.f32.mrb[94].mxu1 }
 0x4e4   : > { %v2686_v21 = vadd.f32 %v2685_v20, %v2468_v40  ;;  %v2687_v23 = vpop.f32.mrb[95].mxu1 }
 0x4e5   : > { %v2688_v28 = vadd.f32 %v2687_v23, %v2468_v40 }
 0x4e6   : > { %4673 = vtanh.f32 %v2686_v21 }
 0x4e7   : > { %v2691_v46 = vpop.f32.mrb[96].mxu1  ;;  %4675 = vtanh.f32 %v2688_v28 }
 0x4e8   : > { %v2692_v32 = vadd.f32 %v2691_v46, %v2473_v36  ;;  %v2693_v44 = vpop.f32.mrb[97].mxu1  ;;  %v2518_v46 = vpop.permute.xlu0 %2517 }
 0x4e9   : > { %v2694_v31 = vadd.f32 %v2693_v44, %v2473_v36 }
 0x4ea   : > { %4677 = vtanh.f32 %v2692_v32 }
 0x4eb   : > { %4679 = vtanh.f32 %v2694_v31  ;;  %v2697_v34 = vpop.f32.mrb[98].mxu1 }
 0x4ec   : > { %v2698_v38 = vadd.f32 %v2697_v34, %v2478_v62  ;;  %v2699_v41 = vpop.f32.mrb[99].mxu1 }
 0x4ed   : > { %v2700_v6 = vadd.f32 %v2699_v41, %v2478_v62 }
 0x4ee   : > { %4681 = vtanh.f32 %v2698_v38 }
 0x4ef   : > { %v2703_v48 = vpop.f32.mrb[100].mxu1  ;;  %4683 = vtanh.f32 %v2700_v6 }
 0x4f0   : > { %v2704_v50 = vadd.f32 %v2703_v48, %v2483_v37  ;;  %v2705_v25 = vpop.f32.mrb[101].mxu1  ;;  %v4674_v47 = vpop.eup %4673 }
 0x4f1   : > { %v2706_v35 = vadd.f32 %v2705_v25, %v2483_v37  ;;  %v4676_v51 = vpop.eup %4675  ;;  %v2523_v37 = vpop.permute.xlu1 %2522 }
 0x4f2   : > { %4685 = vtanh.f32 %v2704_v50 }
 0x4f3   : > { %4687 = vtanh.f32 %v2706_v35  ;;  %v2709_v7 = vpop.f32.mrb[102].mxu1 }
 0x4f4   : > { %v4678_v11 = vpop.eup %4677  ;;  %v2710_v17 = vadd.f32 %v2709_v7, %v2488_v1  ;;  %v2711_v24 = vpop.f32.mrb[103].mxu1 }
 0x4f5   : > { %v4680_v33 = vpop.eup %4679  ;;  %v2712_v49 = vadd.f32 %v2711_v24, %v2488_v1  ;;  %v4200_v52 = vpack.c.bf16 %v4678_v11, %v4674_v47  ;;  %v2528_v1 = vpop.permute.xlu0 %2527 }
 0x4f6   : > { %v4198_v54 = vpack.c.bf16 %v4680_v33, %v4676_v51  ;;  %4689 = vtanh.f32 %v2710_v17 }
 0x4f7   : > { %v2715_v4 = vpop.f32.mrb[104].mxu1  ;;  %4691 = vtanh.f32 %v2712_v49 }
 0x4f8   : > { %v2716_v14 = vadd.f32 %v2715_v4, %v2493_v63  ;;  %v2717_v30 = vpop.f32.mrb[105].mxu1  ;;  %4199 = vmatprep.subr.bf16.mxu0 %v4198_v54  ;;  %v4682_v16 = vpop.eup %4681 }
 0x4f9   : > { %v2718_v8 = vadd.f32 %v2717_v30, %v2493_v63  ;;  %4201 = vmatpush1.bf16.msra.mxu0 %v4200_v52  ;;  %v4684_v42 = vpop.eup %4683  ;;  %v2533_v63 = vpop.permute.xlu1 %2532 }
 0x4fa   : > { %4693 = vtanh.f32 %v2716_v14 }
 0x4fb   : > { %4695 = vtanh.f32 %v2718_v8  ;;  %v2721_v53 = vpop.f32.mrb[106].mxu1 }
 0x4fc   : > { %v4686_v27 = vpop.eup %4685  ;;  %v2722_v0 = vadd.f32 %v2721_v53, %v2498_v43  ;;  %v2723_v9 = vpop.f32.mrb[107].mxu1 }
 0x4fd   : > { %v4688_v2 = vpop.eup %4687  ;;  %v2724_v22 = vadd.f32 %v2723_v9, %v2498_v43  ;;  %v4204_v45 = vpack.c.bf16 %v4686_v27, %v4682_v16  ;;  %v2538_v43 = vpop.permute.xlu0 %2537 }
 0x4fe   : > { %v4202_v3 = vpack.c.bf16 %v4688_v2, %v4684_v42  ;;  %4697 = vtanh.f32 %v2722_v0 }
 0x4ff   : > { %v2727_v56 = vpop.f32.mrb[108].mxu1  ;;  %4699 = vtanh.f32 %v2724_v22 }
 0x500   : > { %v2728_v57 = vadd.f32 %v2727_v56, %v2503_v12  ;;  %v2729_v10 = vpop.f32.mrb[109].mxu1  ;;  %4203 = vmatprep.subr.bf16.mxu0 %v4202_v3  ;;  %v4690_v60 = vpop.eup %4689 }
 0x501   : > { %v2730_v59 = vadd.f32 %v2729_v10, %v2503_v12  ;;  %4205 = vmatpush1.bf16.msra.mxu0 %v4204_v45  ;;  %v4692_v61 = vpop.eup %4691  ;;  %v2543_v12 = vpop.permute.xlu1 %2542 }
 0x502   : > { %4701 = vtanh.f32 %v2728_v57 }
 0x503   : > { %4703 = vtanh.f32 %v2730_v59  ;;  %v2733_v5 = vpop.f32.mrb[110].mxu1 }
 0x504   : > { %v4694_v55 = vpop.eup %4693  ;;  %v2734_v19 = vadd.f32 %v2733_v5, %v2508_v26  ;;  %v2735_v13 = vpop.f32.mrb[111].mxu1 }
 0x505   : > { %v4696_v15 = vpop.eup %4695  ;;  %v2736_v29 = vadd.f32 %v2735_v13, %v2508_v26  ;;  %v4208_v39 = vpack.c.bf16 %v4694_v55, %v4690_v60  ;;  %v2548_v26 = vpop.permute.xlu0 %2547 }
 0x506   : > { %v4206_v58 = vpack.c.bf16 %v4696_v15, %v4692_v61  ;;  %4705 = vtanh.f32 %v2734_v19 }
 0x507   : > { %v2739_v40 = vpop.f32.mrb[112].mxu1  ;;  %4707 = vtanh.f32 %v2736_v29 }
 0x508   : > { %v2740_v20 = vadd.f32 %v2739_v40, %v2513_v18  ;;  %v2741_v21 = vpop.f32.mrb[113].mxu1  ;;  %4207 = vmatprep.subr.bf16.mxu0 %v4206_v58  ;;  %v4698_v28 = vpop.eup %4697 }
 0x509   : > { %v2742_v23 = vadd.f32 %v2741_v21, %v2513_v18  ;;  %4209 = vmatpush1.bf16.msra.mxu0 %v4208_v39  ;;  %v4700_v36 = vpop.eup %4699  ;;  %v2553_v18 = vpop.permute.xlu1 %2552 }
 0x50a   : > { %4709 = vtanh.f32 %v2740_v20 }
 0x50b   : > { %4711 = vtanh.f32 %v2742_v23  ;;  %v2745_v32 = vpop.f32.mrb[114].mxu1 }
 0x50c   : > { %v4702_v44 = vpop.eup %4701  ;;  %v2746_v31 = vadd.f32 %v2745_v32, %v2518_v46  ;;  %v2747_v62 = vpop.f32.mrb[115].mxu1 }
 0x50d   : > { %v4704_v34 = vpop.eup %4703  ;;  %v2748_v38 = vadd.f32 %v2747_v62, %v2518_v46  ;;  %v4212_v41 = vpack.c.bf16 %v4702_v44, %v4698_v28  ;;  %v2558_v46 = vpop.permute.xlu0 %2557 }
 0x50e   : > { %v4210_v6 = vpack.c.bf16 %v4704_v34, %v4700_v36  ;;  %4713 = vtanh.f32 %v2746_v31 }
 0x50f   : > { %v2751_v48 = vpop.f32.mrb[116].mxu1  ;;  %4715 = vtanh.f32 %v2748_v38 }
 0x510   : > { %v2752_v50 = vadd.f32 %v2751_v48, %v2523_v37  ;;  %v2753_v25 = vpop.f32.mrb[117].mxu1  ;;  %4211 = vmatprep.subr.bf16.mxu0 %v4210_v6  ;;  %v4706_v47 = vpop.eup %4705 }
 0x511   : > { %v2754_v35 = vadd.f32 %v2753_v25, %v2523_v37  ;;  %4213 = vmatpush1.bf16.msra.mxu0 %v4212_v41  ;;  %v4708_v51 = vpop.eup %4707  ;;  %v2563_v37 = vpop.permute.xlu1 %2562 }
 0x512   : > { %4717 = vtanh.f32 %v2752_v50 }
 0x513   : > { %4719 = vtanh.f32 %v2754_v35  ;;  %v2757_v7 = vpop.f32.mrb[118].mxu1 }
 0x514   : > { %v4710_v11 = vpop.eup %4709  ;;  %v2758_v17 = vadd.f32 %v2757_v7, %v2528_v1  ;;  %v2759_v24 = vpop.f32.mrb[119].mxu1 }
 0x515   : > { %v4712_v33 = vpop.eup %4711  ;;  %v2760_v49 = vadd.f32 %v2759_v24, %v2528_v1  ;;  %v4216_v52 = vpack.c.bf16 %v4710_v11, %v4706_v47  ;;  %v2568_v1 = vpop.permute.xlu0 %2567 }
 0x516   : > { %v4214_v54 = vpack.c.bf16 %v4712_v33, %v4708_v51  ;;  %4721 = vtanh.f32 %v2758_v17 }
 0x517   : > { %v2763_v4 = vpop.f32.mrb[120].mxu1  ;;  %4723 = vtanh.f32 %v2760_v49 }
 0x518   : > { %v2764_v14 = vadd.f32 %v2763_v4, %v2533_v63  ;;  %v2765_v30 = vpop.f32.mrb[121].mxu1  ;;  %4215 = vmatprep.subr.bf16.mxu0 %v4214_v54  ;;  %v4714_v16 = vpop.eup %4713 }
 0x519   : > { %v2766_v8 = vadd.f32 %v2765_v30, %v2533_v63  ;;  %4217 = vmatpush1.bf16.msra.mxu0 %v4216_v52  ;;  %v4716_v42 = vpop.eup %4715  ;;  %v2573_v63 = vpop.permute.xlu1 %2572 }
 0x51a   : > { %4725 = vtanh.f32 %v2764_v14 }
 0x51b   : > { %4727 = vtanh.f32 %v2766_v8  ;;  %v2769_v53 = vpop.f32.mrb[122].mxu1 }
 0x51c   : > { %v4718_v27 = vpop.eup %4717  ;;  %v2770_v0 = vadd.f32 %v2769_v53, %v2538_v43  ;;  %v2771_v9 = vpop.f32.mrb[123].mxu1 }
 0x51d   : > { %v4720_v2 = vpop.eup %4719  ;;  %v2772_v22 = vadd.f32 %v2771_v9, %v2538_v43  ;;  %v4220_v45 = vpack.c.bf16 %v4718_v27, %v4714_v16  ;;  %v2578_v43 = vpop.permute.xlu0 %2577 }
 0x51e   : > { %v4218_v3 = vpack.c.bf16 %v4720_v2, %v4716_v42  ;;  %4729 = vtanh.f32 %v2770_v0 }
 0x51f   : > { %v2775_v56 = vpop.f32.mrb[124].mxu1  ;;  %4731 = vtanh.f32 %v2772_v22 }
 0x520   : > { %v2776_v57 = vadd.f32 %v2775_v56, %v2543_v12  ;;  %v2777_v10 = vpop.f32.mrb[125].mxu1  ;;  %4219 = vmatprep.subr.bf16.mxu0 %v4218_v3  ;;  %v4722_v60 = vpop.eup %4721 }
 0x521   : > { %v2778_v59 = vadd.f32 %v2777_v10, %v2543_v12  ;;  %4221 = vmatpush1.bf16.msra.mxu0 %v4220_v45  ;;  %v4724_v61 = vpop.eup %4723  ;;  %v2583_v12 = vpop.permute.xlu1 %2582 }
 0x522   : > { %4733 = vtanh.f32 %v2776_v57 }
 0x523   : > { %4735 = vtanh.f32 %v2778_v59  ;;  %v2781_v5 = vpop.f32.mrb[126].mxu1 }
 0x524   : > { %v4726_v55 = vpop.eup %4725  ;;  %v2782_v19 = vadd.f32 %v2781_v5, %v2548_v26  ;;  %v2783_v13 = vpop.f32.mrb[127].mxu1 }
 0x525   : > { %v4728_v15 = vpop.eup %4727  ;;  %v2784_v29 = vadd.f32 %v2783_v13, %v2548_v26  ;;  %v4224_v39 = vpack.c.bf16 %v4726_v55, %v4722_v60  ;;  %v2588_v26 = vpop.permute.xlu0 %2587 }
 0x526   : > { %v4222_v58 = vpack.c.bf16 %v4728_v15, %v4724_v61  ;;  %4737 = vtanh.f32 %v2782_v19 }
 0x527   : > { %v2787_v40 = vpop.f32.mrb[128].mxu1  ;;  %4739 = vtanh.f32 %v2784_v29 }
 0x528   : > { %v2788_v20 = vadd.f32 %v2787_v40, %v2553_v18  ;;  %v2789_v21 = vpop.f32.mrb[129].mxu1  ;;  %4223 = vmatprep.subr.bf16.mxu0 %v4222_v58  ;;  %v4730_v28 = vpop.eup %4729 }
 0x529   : > { %v2790_v23 = vadd.f32 %v2789_v21, %v2553_v18  ;;  %4225 = vmatpush1.bf16.msra.mxu0 %v4224_v39  ;;  %v4732_v36 = vpop.eup %4731  ;;  %v2593_v18 = vpop.permute.xlu1 %2592 }
 0x52a   : > { %4741 = vtanh.f32 %v2788_v20 }
 0x52b   : > { %4743 = vtanh.f32 %v2790_v23  ;;  %v2793_v32 = vpop.f32.mrb[130].mxu1 }
 0x52c   : > { %v4734_v44 = vpop.eup %4733  ;;  %v2794_v31 = vadd.f32 %v2793_v32, %v2558_v46  ;;  %v2795_v62 = vpop.f32.mrb[131].mxu1 }
 0x52d   : > { %v4736_v34 = vpop.eup %4735  ;;  %v2796_v38 = vadd.f32 %v2795_v62, %v2558_v46  ;;  %v4228_v41 = vpack.c.bf16 %v4734_v44, %v4730_v28 }
 0x52e   : > { %v4226_v6 = vpack.c.bf16 %v4736_v34, %v4732_v36  ;;  %4745 = vtanh.f32 %v2794_v31 }
 0x52f   : > { %v2799_v48 = vpop.f32.mrb[132].mxu1  ;;  %4747 = vtanh.f32 %v2796_v38 }
 0x530   : > { %v2800_v50 = vadd.f32 %v2799_v48, %v2563_v37  ;;  %v2801_v25 = vpop.f32.mrb[133].mxu1  ;;  %4227 = vmatprep.subr.bf16.mxu0 %v4226_v6  ;;  %v4738_v47 = vpop.eup %4737  ;;  %v2969_v48 = vld [vmem:[#allocation4 + $0x600] sm:$0xff] }
 0x531   : > { %v2802_v35 = vadd.f32 %v2801_v25, %v2563_v37  ;;  %4229 = vmatpush1.bf16.msra.mxu0 %v4228_v41  ;;  %v4740_v51 = vpop.eup %4739  ;;  %v2971_v25 = vld [vmem:[#allocation4 + $0x610] sm:$0xff] }
 0x532   : > { %4749 = vtanh.f32 %v2800_v50  ;;  %v2972_v50 = vld [vmem:[#allocation4 + $0x618] sm:$0xff] }
 0x533   : > { %4751 = vtanh.f32 %v2802_v35  ;;  %v2805_v7 = vpop.f32.mrb[134].mxu1  ;;  %v2974_v35 = vld [vmem:[#allocation4 + $0x628] sm:$0xff] }
 0x534   : > { %v4742_v11 = vpop.eup %4741  ;;  %v2806_v17 = vadd.f32 %v2805_v7, %v2568_v1  ;;  %v2807_v24 = vpop.f32.mrb[135].mxu1  ;;  %v2978_v7 = vld [vmem:[#allocation4 + $0x648] sm:$0xff] }
 0x535   : > { %v4744_v33 = vpop.eup %4743  ;;  %v2808_v49 = vadd.f32 %v2807_v24, %v2568_v1  ;;  %v4232_v52 = vpack.c.bf16 %v4742_v11, %v4738_v47  ;;  %v2973_v47 = vld [vmem:[#allocation4 + $0x620] sm:$0xff]  ;;  %v2975_v1 = vld [vmem:[#allocation4 + $0x630] sm:$0xff] }
 0x536   : > { %v4230_v54 = vpack.c.bf16 %v4744_v33, %v4740_v51  ;;  %4753 = vtanh.f32 %v2806_v17  ;;  %v2976_v51 = vld [vmem:[#allocation4 + $0x638] sm:$0xff]  ;;  %v2977_v11 = vld [vmem:[#allocation4 + $0x640] sm:$0xff]  ;;  %v2979_v24 = vld [vmem:[#allocation4 + $0x650] sm:$0xff] }
 0x537   : > { %v2811_v4 = vpop.f32.mrb[136].mxu1  ;;  %4755 = vtanh.f32 %v2808_v49  ;;  %v2980_v17 = vld [vmem:[#allocation4 + $0x658] sm:$0xff]  ;;  %v2982_v33 = vld [vmem:[#allocation4 + $0x668] sm:$0xff]  ;;  %v2981_v49 = vld [vmem:[#allocation4 + $0x660] sm:$0xff] }
 0x538   : > { %v2812_v14 = vadd.f32 %v2811_v4, %v2573_v63  ;;  %v2813_v30 = vpop.f32.mrb[137].mxu1  ;;  %4231 = vmatprep.subr.bf16.mxu0 %v4230_v54  ;;  %v4746_v16 = vpop.eup %4745  ;;  %v2983_v54 = vld [vmem:[#allocation4 + $0x670] sm:$0xff]  ;;  %v2985_v4 = vld [vmem:[#allocation4 + $0x680] sm:$0xff] }
 0x539   : > { %v2814_v8 = vadd.f32 %v2813_v30, %v2573_v63  ;;  %4233 = vmatpush1.bf16.msra.mxu0 %v4232_v52  ;;  %v4748_v42 = vpop.eup %4747  ;;  %v2984_v52 = vld [vmem:[#allocation4 + $0x678] sm:$0xff]  ;;  %v2986_v63 = vld [vmem:[#allocation4 + $0x688] sm:$0xff]  ;;  %v2987_v30 = vld [vmem:[#allocation4 + $0x690] sm:$0xff] }
 0x53a   : > { %4757 = vtanh.f32 %v2812_v14  ;;  %v2988_v14 = vld [vmem:[#allocation4 + $0x698] sm:$0xff] }
 0x53b   : > { %4759 = vtanh.f32 %v2814_v8  ;;  %v2817_v53 = vpop.f32.mrb[138].mxu1  ;;  %v2990_v8 = vld [vmem:[#allocation4 + $0x6a8] sm:$0xff] }
 0x53c   : > { %v4750_v27 = vpop.eup %4749  ;;  %v2818_v0 = vadd.f32 %v2817_v53, %v2578_v43  ;;  %v2819_v9 = vpop.f32.mrb[139].mxu1  ;;  %v2994_v53 = vld [vmem:[#allocation4 + $0x6c8] sm:$0xff] }
 0x53d   : > { %v4752_v2 = vpop.eup %4751  ;;  %v2820_v22 = vadd.f32 %v2819_v9, %v2578_v43  ;;  %v4236_v45 = vpack.c.bf16 %v4750_v27, %v4746_v16  ;;  %v2989_v16 = vld [vmem:[#allocation4 + $0x6a0] sm:$0xff]  ;;  %v2991_v43 = vld [vmem:[#allocation4 + $0x6b0] sm:$0xff] }
 0x53e   : > { %v4234_v3 = vpack.c.bf16 %v4752_v2, %v4748_v42  ;;  %4761 = vtanh.f32 %v2818_v0  ;;  %v2992_v42 = vld [vmem:[#allocation4 + $0x6b8] sm:$0xff]  ;;  %v2993_v27 = vld [vmem:[#allocation4 + $0x6c0] sm:$0xff]  ;;  %v2995_v9 = vld [vmem:[#allocation4 + $0x6d0] sm:$0xff] }
 0x53f   : > { %v2823_v56 = vpop.f32.mrb[140].mxu1  ;;  %4763 = vtanh.f32 %v2820_v22  ;;  %v2996_v0 = vld [vmem:[#allocation4 + $0x6d8] sm:$0xff]  ;;  %v2998_v2 = vld [vmem:[#allocation4 + $0x6e8] sm:$0xff]  ;;  %v2997_v22 = vld [vmem:[#allocation4 + $0x6e0] sm:$0xff] }
 0x540   : > { %v2824_v57 = vadd.f32 %v2823_v56, %v2583_v12  ;;  %v2825_v10 = vpop.f32.mrb[141].mxu1  ;;  %4235 = vmatprep.subr.bf16.mxu0 %v4234_v3  ;;  %v4754_v60 = vpop.eup %4753  ;;  %v2999_v3 = vld [vmem:[#allocation4 + $0x6f0] sm:$0xff] }
 0x541   : > { %v2826_v59 = vadd.f32 %v2825_v10, %v2583_v12  ;;  %4237 = vmatpush1.bf16.msra.mxu0 %v4236_v45  ;;  %v4756_v61 = vpop.eup %4755  ;;  %v3000_v45 = vld [vmem:[#allocation4 + $0x6f8] sm:$0xff]  ;;  %v3002_v12 = vld [vmem:[#allocation4 + $0x708] sm:$0xff]  ;;  %v2176_v56 = vpop.f32.mrb[86].mxu0 }
 0x542   : > { %4765 = vtanh.f32 %v2824_v57  ;;  %v3001_v57 = vld [vmem:[#allocation4 + $0x700] sm:$0xff]  ;;  %v2177_v10 = vpop.f32.mrb[87].mxu0  ;;  %v3031_v56 = vld [vmem:[#allocation4 + $0x7f0] sm:$0xff] }
 0x543   : > { %4767 = vtanh.f32 %v2826_v59  ;;  %v2829_v5 = vpop.f32.mrb[142].mxu1  ;;  %v3004_v59 = vld [vmem:[#allocation4 + $0x718] sm:$0xff] }
 0x544   : > { %v4758_v55 = vpop.eup %4757  ;;  %v2830_v19 = vadd.f32 %v2829_v5, %v2588_v26  ;;  %v2831_v13 = vpop.f32.mrb[143].mxu1  ;;  %v3006_v5 = vld [vmem:[#allocation4 + $0x728] sm:$0xff] }
 0x545   : > { %v4760_v15 = vpop.eup %4759  ;;  %v2832_v29 = vadd.f32 %v2831_v13, %v2588_v26  ;;  %v4240_v39 = vpack.c.bf16 %v4758_v55, %v4754_v60  ;;  %v2180_v60 = vpop.f32.mrb[88].mxu0 }
 0x546   : > { %v4238_v58 = vpack.c.bf16 %v4760_v15, %v4756_v61  ;;  %4769 = vtanh.f32 %v2830_v19  ;;  %v3003_v61 = vld [vmem:[#allocation4 + $0x710] sm:$0xff]  ;;  %v2181_v26 = vpop.f32.mrb[89].mxu0  ;;  %v3005_v19 = vld [vmem:[#allocation4 + $0x720] sm:$0xff]  ;;  %v3008_v15 = vld [vmem:[#allocation4 + $0x738] sm:$0xff] }
 0x547   : > { %v2835_v40 = vpop.f32.mrb[144].mxu1  ;;  %4771 = vtanh.f32 %v2832_v29  ;;  %v2184_v55 = vpop.f32.mrb[90].mxu0 }
 0x548   : > { %v2836_v20 = vadd.f32 %v2835_v40, %v2593_v18  ;;  %v2837_v21 = vpop.f32.mrb[145].mxu1  ;;  %4239 = vmatprep.subr.bf16.mxu0 %v4238_v58  ;;  %v4762_v28 = vpop.eup %4761 }
 0x549   : > { %v2838_v23 = vadd.f32 %v2837_v21, %v2593_v18  ;;  %4241 = vmatpush1.bf16.msra.mxu0 %v4240_v39  ;;  %v4764_v36 = vpop.eup %4763  ;;  %v2185_v13 = vpop.f32.mrb[91].mxu0  ;;  %v3007_v39 = vld [vmem:[#allocation4 + $0x730] sm:$0xff]  ;;  %v3010_v18 = vld [vmem:[#allocation4 + $0x748] sm:$0xff] }
 0x54a   : > { %4773 = vtanh.f32 %v2836_v20  ;;  %v2188_v29 = vpop.f32.mrb[92].mxu0  ;;  %v3009_v20 = vld [vmem:[#allocation4 + $0x740] sm:$0xff] }
 0x54b   : > { %4775 = vtanh.f32 %v2838_v23  ;;  %v2189_v58 = vpop.f32.mrb[93].mxu0  ;;  %v3012_v23 = vld [vmem:[#allocation4 + $0x758] sm:$0xff] }
 0x54c   : > { %v4766_v46 = vpop.eup %4765  ;;  %v2192_v40 = vpop.f32.mrb[94].mxu0 }
 0x54d   : > { %v4768_v32 = vpop.eup %4767  ;;  %v4244_v44 = vpack.c.bf16 %v4766_v46, %v4762_v28  ;;  %v2193_v21 = vpop.f32.mrb[95].mxu0 }
 0x54e   : > { %v4242_v31 = vpack.c.bf16 %v4768_v32, %v4764_v36  ;;  %v2196_v28 = vpop.f32.mrb[96].mxu0  ;;  %v3011_v36 = vld [vmem:[#allocation4 + $0x750] sm:$0xff]  ;;  %v3014_v32 = vld [vmem:[#allocation4 + $0x768] sm:$0xff] }
 0x54f   : > { %v2197_v46 = vpop.f32.mrb[97].mxu0 }
 0x550   : > { %4243 = vmatprep.subr.bf16.mxu0 %v4242_v31  ;;  %v4770_v62 = vpop.eup %4769  ;;  %v3016_v31 = vld [vmem:[#allocation4 + $0x778] sm:$0xff] }
 0x551   : > { %4245 = vmatpush1.bf16.msra.mxu0 %v4244_v44  ;;  %v4772_v34 = vpop.eup %4771  ;;  %v3013_v44 = vld [vmem:[#allocation4 + $0x760] sm:$0xff] }
 0x554   : > { %v4774_v38 = vpop.eup %4773 }
 0x555   : > { %v4776_v41 = vpop.eup %4775  ;;  %v4248_v6 = vpack.c.bf16 %v4774_v38, %v4770_v62  ;;  %v3015_v62 = vld [vmem:[#allocation4 + $0x770] sm:$0xff]  ;;  %v3017_v38 = vld [vmem:[#allocation4 + $0x780] sm:$0xff] }
 0x556   : > { %v4246_v37 = vpack.c.bf16 %v4776_v41, %v4772_v34  ;;  %v3018_v34 = vld [vmem:[#allocation4 + $0x788] sm:$0xff]  ;;  %v3020_v41 = vld [vmem:[#allocation4 + $0x798] sm:$0xff] }
 0x558   : > { %4247 = vmatprep.subr.bf16.mxu0 %v4246_v37  ;;  %v2357_v37 = vld [vmem:[#allocation4 + $0x5a8] sm:$0xff] }
 0x559   : > { %4249 = vmatpush1.bf16.msra.mxu0 %v4248_v6  ;;  %v3019_v6 = vld [vmem:[#allocation4 + $0x790] sm:$0xff]  ;;  %2839 = vmatprep.mubr.f32.mxu1 %v2357_v37 }
 0x55c   : > { %3349 = vmatmul.mubr.f32.vlgmr.msra.gmra.mrb[98].mxu0 %v2969_v48  ;;  %v2356_v48 = vld [vmem:[#allocation4 + $0x5a0] sm:$0xff] }
 0x55d   : > { %3354 = vmatprep.mubr.f32.mxu0 %v2972_v50  ;;  %2840 = vmatmul.mubr.f32.gmra.mrb[146].mxu1 %v2356_v48  ;;  %v2359_v50 = vld [vmem:[#allocation4 + $0x5b8] sm:$0xff] }
 0x55e   : > { %2843 = vmatprep.mubr.f32.mxu1 %v2359_v50 }
 0x560   : > { %3355 = vmatmul.mubr.f32.gmra.mrb[100].mxu0 %v2971_v25  ;;  %v2358_v25 = vld [vmem:[#allocation4 + $0x5b0] sm:$0xff] }
 0x561   : > { %3360 = vmatprep.mubr.f32.mxu0 %v2974_v35  ;;  %2844 = vmatmul.mubr.f32.gmra.mrb[148].mxu1 %v2358_v25  ;;  %v2361_v35 = vld [vmem:[#allocation4 + $0x5c8] sm:$0xff] }
 0x562   : > { %2847 = vmatprep.mubr.f32.mxu1 %v2361_v35 }
 0x564   : > { %3361 = vmatmul.mubr.f32.gmra.mrb[102].mxu0 %v2973_v47  ;;  %v2360_v47 = vld [vmem:[#allocation4 + $0x5c0] sm:$0xff] }
 0x565   : > { %3366 = vmatprep.mubr.f32.mxu0 %v2976_v51  ;;  %v2363_v51 = vld [vmem:[#allocation4 + $0x5d8] sm:$0xff]  ;;  %2848 = vmatmul.mubr.f32.gmra.mrb[150].mxu1 %v2360_v47 }
 0x566   : > { %2851 = vmatprep.mubr.f32.mxu1 %v2363_v51 }
 0x568   : > { %3367 = vmatmul.mubr.f32.gmra.mrb[104].mxu0 %v2975_v1  ;;  %v2362_v1 = vld [vmem:[#allocation4 + $0x5d0] sm:$0xff] }
 0x569   : > { %3372 = vmatprep.mubr.f32.mxu0 %v2978_v7  ;;  %2852 = vmatmul.mubr.f32.gmra.mrb[152].mxu1 %v2362_v1  ;;  %v2365_v7 = vld [vmem:[#allocation4 + $0x5e8] sm:$0xff] }
 0x56a   : > { %2855 = vmatprep.mubr.f32.mxu1 %v2365_v7 }
 0x56c   : > { %3373 = vmatmul.mubr.f32.gmra.mrb[106].mxu0 %v2977_v11  ;;  %v2364_v11 = vld [vmem:[#allocation4 + $0x5e0] sm:$0xff] }
 0x56d   : > { %3378 = vmatprep.mubr.f32.mxu0 %v2980_v17  ;;  %v3022_v17 = vld [vmem:[#allocation4 + $0x7a8] sm:$0xff]  ;;  %2856 = vmatmul.mubr.f32.gmra.mrb[154].mxu1 %v2364_v11 }
 0x570   : > { %3379 = vmatmul.mubr.f32.gmra.mrb[108].mxu0 %v2979_v24  ;;  %v3021_v24 = vld [vmem:[#allocation4 + $0x7a0] sm:$0xff] }
 0x571   : > { %3384 = vmatprep.mubr.f32.mxu0 %v2982_v33  ;;  %v3704_v33 = vlaneseq }
 0x573   : > { %vm3810_vm1 = vcmp.lt.s32.totalorder %v3704_v33, 256 }
 0x574   : > { %3385 = vmatmul.mubr.f32.gmra.mrb[110].mxu0 %v2981_v49  ;;  %v2367_v49 = vld [vmem:[#allocation4 + $0x5f8] sm:$0xff] }
 0x575   : > { %3390 = vmatprep.mubr.f32.mxu0 %v2984_v52  ;;  %v3024_v52 = vld [vmem:[#allocation4 + $0x7b8] sm:$0xff]  ;;  %2859 = vmatprep.mubr.f32.mxu1 %v2367_v49 }
 0x578   : > { %3391 = vmatmul.mubr.f32.gmra.mrb[112].mxu0 %v2983_v54  ;;  %v2366_v54 = vld [vmem:[#allocation4 + $0x5f0] sm:$0xff] }
 0x579   : > { %3396 = vmatprep.mubr.f32.mxu0 %v2986_v63  ;;  %v3023_v63 = vld [vmem:[#allocation4 + $0x7b0] sm:$0xff]  ;;  %2860 = vmatmul.mubr.f32.gmra.mrb[156].mxu1 %v2366_v54 }
 0x57c   : > { %3397 = vmatmul.mubr.f32.gmra.mrb[114].mxu0 %v2985_v4  ;;  %v5851_v4 = vshrl.u32 %v3704_v33, 7 }
 0x57d   : > { %3402 = vmatprep.mubr.f32.mxu0 %v2988_v14  ;;  %v5856_v14 = vld [vmem:[%s5916_s5] sm:$0x3] }
 0x580   : > { %3403 = vmatmul.mubr.f32.gmra.mrb[116].mxu0 %v2987_v30  ;;  %v3715_v30 = vsub.s32 1, %v5851_v4 }
 0x581   : > { %3408 = vmatprep.mubr.f32.mxu0 %v2990_v8  ;;  %v3026_v8 = vld [vmem:[#allocation4 + $0x7c8] sm:$0xff] }
 0x584   : > { %3409 = vmatmul.mubr.f32.gmra.mrb[118].mxu0 %v2989_v16  ;;  %v3025_v16 = vld [vmem:[#allocation4 + $0x7c0] sm:$0xff] }
 0x585   : > { %3414 = vmatprep.mubr.f32.mxu0 %v2992_v42  ;;  %v3716_v42 = vrot.slane %v5856_v14, %v3715_v30 }
 0x587   : > { %3783 = vmatprep.mubr.f32.mxu1 %v3716_v42 }
 0x588   : > { %3415 = vmatmul.mubr.f32.gmra.mrb[120].mxu0 %v2991_v43  ;;  %v3028_v43 = vld [vmem:[#allocation4 + $0x7d8] sm:$0xff] }
 0x589   : > { %3420 = vmatprep.mubr.f32.mxu0 %v2994_v53  ;;  %v3027_v53 = vld [vmem:[#allocation4 + $0x7d0] sm:$0xff] }
 0x58c   : > { %3421 = vmatmul.mubr.f32.gmra.mrb[122].mxu0 %v2993_v27  ;;  %v3030_v27 = vld [vmem:[#allocation4 + $0x7e8] sm:$0xff] }
 0x58d   : > { %3426 = vmatprep.mubr.f32.mxu0 %v2996_v0  ;;  %v3029_v0 = vld [vmem:[#allocation4 + $0x7e0] sm:$0xff] }
 0x590   : > { %3427 = vmatmul.mubr.f32.gmra.mrb[124].mxu0 %v2995_v9  ;;  %v3032_v9 = vld [vmem:[#allocation4 + $0x7f8] sm:$0xff] }
 0x591   : > { %3432 = vmatprep.mubr.f32.mxu0 %v2998_v2  ;;  %v3133_v2 = vpop.permute.xlu0 %3132 }
 0x594   : > { %3433 = vmatmul.mubr.f32.gmra.mrb[126].mxu0 %v2997_v22 }
 0x595   : > { %3438 = vmatprep.mubr.f32.mxu0 %v3000_v45  ;;  %v3143_v26 = vpop.permute.xlu0 %3142 }
 0x598   : > { %3439 = vmatmul.mubr.f32.gmra.mrb[128].mxu0 %v2999_v3 }
 0x599   : > { %3444 = vmatprep.mubr.f32.mxu0 %v3002_v12  ;;  %v3153_v21 = vpop.permute.xlu0 %3152 }
 0x59c   : > { %3445 = vmatmul.mubr.f32.gmra.mrb[130].mxu0 %v3001_v57  ;;  %v3138_v57 = vpop.permute.xlu1 %3137 }
 0x59d   : > { %3450 = vmatprep.mubr.f32.mxu0 %v3004_v59  ;;  %v3163_v25 = vpop.permute.xlu0 %3162 }
 0x5a0   : > { %3451 = vmatmul.mubr.f32.gmra.mrb[132].mxu0 %v3003_v61 }
 0x5a1   : > { %3456 = vmatprep.mubr.f32.mxu0 %v3006_v5  ;;  %v3173_v42 = vpop.permute.xlu0 %3172 }
 0x5a4   : > { %3457 = vmatmul.mubr.f32.gmra.mrb[134].mxu0 %v3005_v19 }
 0x5a5   : > { %3462 = vmatprep.mubr.f32.mxu0 %v3008_v15  ;;  %v3148_v15 = vpop.permute.xlu1 %3147 }
 0x5a8   : > { %3463 = vmatmul.mubr.f32.gmra.mrb[136].mxu0 %v3007_v39 }
 0x5a9   : > { %3468 = vmatprep.mubr.f32.mxu0 %v3010_v18 }
 0x5ac   : > { %3469 = vmatmul.mubr.f32.gmra.mrb[138].mxu0 %v3009_v20 }
 0x5ad   : > { %3474 = vmatprep.mubr.f32.mxu0 %v3012_v23 }
 0x5b0   : > { %3475 = vmatmul.mubr.f32.gmra.mrb[140].mxu0 %v3011_v36 }
 0x5b1   : > { %3480 = vmatprep.mubr.f32.mxu0 %v3014_v32 }
 0x5b4   : > { %3481 = vmatmul.mubr.f32.gmra.mrb[142].mxu0 %v3013_v44 }
 0x5b5   : > { %3486 = vmatprep.mubr.f32.mxu0 %v3016_v31 }
 0x5b8   : > { %3487 = vmatmul.mubr.f32.gmra.mrb[144].mxu0 %v3015_v62 }
 0x5b9   : > { %3492 = vmatprep.mubr.f32.mxu0 %v3018_v34  ;;  %v3158_v34 = vpop.permute.xlu1 %3157 }
 0x5bc   : > { %3493 = vmatmul.mubr.f32.gmra.mrb[146].mxu0 %v3017_v38 }
 0x5bd   : > { %3498 = vmatprep.mubr.f32.mxu0 %v3020_v41  ;;  %v3168_v49 = vpop.permute.xlu1 %3167 }
 0x5c0   : > { %3499 = vmatmul.mubr.f32.gmra.mrb[148].mxu0 %v3019_v6 }
 0x5c1   : > { %3504 = vmatprep.mubr.f32.mxu0 %v3022_v17 }
 0x5c4   : > { %3505 = vmatmul.mubr.f32.gmra.mrb[150].mxu0 %v3021_v24 }
 0x5c5   : > { %3508 = vmatprep.mubr.f32.mxu0 %v3024_v52 }
 0x5c8   : > { %3509 = vmatmul.mubr.f32.gmra.mrb[152].mxu0 %v3023_v63 }
 0x5c9   : > { %3512 = vmatprep.mubr.f32.mxu0 %v3026_v8 }
 0x5cc   : > { %3513 = vmatmul.mubr.f32.gmra.mrb[154].mxu0 %v3025_v16 }
 0x5cd   : > { %3516 = vmatprep.mubr.f32.mxu0 %v3028_v43 }
 0x5d0   : > { %3517 = vmatmul.mubr.f32.gmra.mrb[156].mxu0 %v3027_v53 }
 0x5d1   : > { %3520 = vmatprep.mubr.f32.mxu0 %v3030_v27 }
 0x5d4   : > { %3521 = vmatmul.mubr.f32.gmra.mrb[158].mxu0 %v3029_v0 }
 0x5d5   : > { %3524 = vmatprep.mubr.f32.mxu0 %v3032_v9 }
 0x5d8   : > { %3525 = vmatmul.mubr.f32.gmra.mrb[160].mxu0 %v3031_v56 }
 0x62f   : > { %v3350_v22 = vpop.f32.mrb[98].mxu0 }
 0x630   : > { %v3351_v45 = vadd.f32 %v3350_v22, %v3133_v2  ;;  %v3352_v3 = vpop.f32.mrb[99].mxu0 }
 0x631   : > { %v3353_v12 = vadd.f32 %v3352_v3, %v3133_v2  ;;  %v3178_v3 = vpop.permute.xlu1 %3177 }
 0x632   : > { %4777 = vtanh.f32 %v3351_v45 }
 0x633   : > { %v3356_v10 = vpop.f32.mrb[100].mxu0  ;;  %4779 = vtanh.f32 %v3353_v12 }
 0x634   : > { %v3357_v59 = vadd.f32 %v3356_v10, %v3138_v57  ;;  %v3358_v60 = vpop.f32.mrb[101].mxu0 }
 0x635   : > { %v3359_v61 = vadd.f32 %v3358_v60, %v3138_v57 }
 0x636   : > { %4781 = vtanh.f32 %v3357_v59 }
 0x637   : > { %4783 = vtanh.f32 %v3359_v61  ;;  %v3362_v5 = vpop.f32.mrb[102].mxu0  ;;  %v3183_v61 = vpop.permute.xlu0 %3182 }
 0x638   : > { %v3363_v55 = vadd.f32 %v3362_v5, %v3143_v26  ;;  %v3364_v19 = vpop.f32.mrb[103].mxu0 }
 0x639   : > { %v3365_v13 = vadd.f32 %v3364_v19, %v3143_v26 }
 0x63a   : > { %4785 = vtanh.f32 %v3363_v55 }
 0x63b   : > { %v3368_v29 = vpop.f32.mrb[104].mxu0  ;;  %4787 = vtanh.f32 %v3365_v13 }
 0x63c   : > { %v3369_v39 = vadd.f32 %v3368_v29, %v3148_v15  ;;  %v3370_v58 = vpop.f32.mrb[105].mxu0  ;;  %v4778_v40 = vpop.eup %4777 }
 0x63d   : > { %v3371_v18 = vadd.f32 %v3370_v58, %v3148_v15  ;;  %v4780_v20 = vpop.eup %4779  ;;  %v3188_v58 = vpop.permute.xlu1 %3187 }
 0x63e   : > { %4789 = vtanh.f32 %v3369_v39 }
 0x63f   : > { %4791 = vtanh.f32 %v3371_v18  ;;  %v3374_v23 = vpop.f32.mrb[106].mxu0 }
 0x640   : > { %v4782_v28 = vpop.eup %4781  ;;  %v3375_v36 = vadd.f32 %v3374_v23, %v3153_v21  ;;  %v3376_v46 = vpop.f32.mrb[107].mxu0 }
 0x641   : > { %v4784_v32 = vpop.eup %4783  ;;  %v3377_v44 = vadd.f32 %v3376_v46, %v3153_v21  ;;  %v4252_v31 = vpack.c.bf16 %v4782_v28, %v4778_v40 }
 0x642   : > { %v4250_v62 = vpack.c.bf16 %v4784_v32, %v4780_v20  ;;  %4793 = vtanh.f32 %v3375_v36  ;;  %v3193_v36 = vpop.permute.xlu0 %3192 }
 0x643   : > { %v3380_v38 = vpop.f32.mrb[108].mxu0  ;;  %4795 = vtanh.f32 %v3377_v44 }
 0x644   : > { %v3381_v41 = vadd.f32 %v3380_v38, %v3158_v34  ;;  %v3382_v6 = vpop.f32.mrb[109].mxu0  ;;  %4251 = vmatprep.subr.bf16.mxu1 %v4250_v62  ;;  %v4786_v48 = vpop.eup %4785 }
 0x645   : > { %v3383_v37 = vadd.f32 %v3382_v6, %v3158_v34  ;;  %4253 = vmatpush1.bf16.msra.mxu1 %v4252_v31  ;;  %v4788_v50 = vpop.eup %4787  ;;  %v3198_v6 = vpop.permute.xlu1 %3197 }
 0x646   : > { %4797 = vtanh.f32 %v3381_v41 }
 0x647   : > { %4799 = vtanh.f32 %v3383_v37  ;;  %v3386_v35 = vpop.f32.mrb[110].mxu0 }
 0x648   : > { %v4790_v47 = vpop.eup %4789  ;;  %v3387_v51 = vadd.f32 %v3386_v35, %v3163_v25  ;;  %v3388_v1 = vpop.f32.mrb[111].mxu0 }
 0x649   : > { %v4792_v7 = vpop.eup %4791  ;;  %v3389_v11 = vadd.f32 %v3388_v1, %v3163_v25  ;;  %v4256_v17 = vpack.c.bf16 %v4790_v47, %v4786_v48 }
 0x64a   : > { %v4254_v24 = vpack.c.bf16 %v4792_v7, %v4788_v50  ;;  %4801 = vtanh.f32 %v3387_v51  ;;  %v3203_v51 = vpop.permute.xlu0 %3202 }
 0x64b   : > { %v3392_v52 = vpop.f32.mrb[112].mxu0  ;;  %4803 = vtanh.f32 %v3389_v11 }
 0x64c   : > { %v3393_v54 = vadd.f32 %v3392_v52, %v3168_v49  ;;  %v3394_v63 = vpop.f32.mrb[113].mxu0  ;;  %4255 = vmatprep.subr.bf16.mxu1 %v4254_v24  ;;  %v4794_v8 = vpop.eup %4793 }
 0x64d   : > { %v3395_v30 = vadd.f32 %v3394_v63, %v3168_v49  ;;  %4257 = vmatpush1.bf16.msra.mxu1 %v4256_v17  ;;  %v4796_v16 = vpop.eup %4795  ;;  %v3208_v63 = vpop.permute.xlu1 %3207 }
 0x64e   : > { %4805 = vtanh.f32 %v3393_v54 }
 0x64f   : > { %4807 = vtanh.f32 %v3395_v30  ;;  %v3398_v43 = vpop.f32.mrb[114].mxu0 }
 0x650   : > { %v4798_v53 = vpop.eup %4797  ;;  %v3399_v27 = vadd.f32 %v3398_v43, %v3173_v42  ;;  %v3400_v0 = vpop.f32.mrb[115].mxu0 }
 0x651   : > { %v4800_v9 = vpop.eup %4799  ;;  %v3401_v2 = vadd.f32 %v3400_v0, %v3173_v42  ;;  %v4260_v22 = vpack.c.bf16 %v4798_v53, %v4794_v8 }
 0x652   : > { %v4258_v45 = vpack.c.bf16 %v4800_v9, %v4796_v16  ;;  %4809 = vtanh.f32 %v3399_v27  ;;  %v3213_v27 = vpop.permute.xlu0 %3212 }
 0x653   : > { %v3404_v12 = vpop.f32.mrb[116].mxu0  ;;  %4811 = vtanh.f32 %v3401_v2 }
 0x654   : > { %v3405_v56 = vadd.f32 %v3404_v12, %v3178_v3  ;;  %v3406_v57 = vpop.f32.mrb[117].mxu0  ;;  %4259 = vmatprep.subr.bf16.mxu1 %v4258_v45  ;;  %v4802_v59 = vpop.eup %4801 }
 0x655   : > { %v3407_v10 = vadd.f32 %v3406_v57, %v3178_v3  ;;  %4261 = vmatpush1.bf16.msra.mxu1 %v4260_v22  ;;  %v4804_v60 = vpop.eup %4803  ;;  %v3218_v57 = vpop.permute.xlu1 %3217 }
 0x656   : > { %4813 = vtanh.f32 %v3405_v56 }
 0x657   : > { %4815 = vtanh.f32 %v3407_v10  ;;  %v3410_v26 = vpop.f32.mrb[118].mxu0 }
 0x658   : > { %v4806_v5 = vpop.eup %4805  ;;  %v3411_v55 = vadd.f32 %v3410_v26, %v3183_v61  ;;  %v3412_v19 = vpop.f32.mrb[119].mxu0 }
 0x659   : > { %v4808_v13 = vpop.eup %4807  ;;  %v3413_v15 = vadd.f32 %v3412_v19, %v3183_v61  ;;  %v4264_v29 = vpack.c.bf16 %v4806_v5, %v4802_v59 }
 0x65a   : > { %v4262_v39 = vpack.c.bf16 %v4808_v13, %v4804_v60  ;;  %4817 = vtanh.f32 %v3411_v55  ;;  %v3223_v55 = vpop.permute.xlu0 %3222 }
 0x65b   : > { %v3416_v18 = vpop.f32.mrb[120].mxu0  ;;  %4819 = vtanh.f32 %v3413_v15 }
 0x65c   : > { %v3417_v40 = vadd.f32 %v3416_v18, %v3188_v58  ;;  %v3418_v20 = vpop.f32.mrb[121].mxu0  ;;  %4263 = vmatprep.subr.bf16.mxu1 %v4262_v39  ;;  %v4810_v23 = vpop.eup %4809 }
 0x65d   : > { %v3419_v21 = vadd.f32 %v3418_v20, %v3188_v58  ;;  %4265 = vmatpush1.bf16.msra.mxu1 %v4264_v29  ;;  %v4812_v28 = vpop.eup %4811  ;;  %v3228_v20 = vpop.permute.xlu1 %3227 }
 0x65e   : > { %4821 = vtanh.f32 %v3417_v40 }
 0x65f   : > { %4823 = vtanh.f32 %v3419_v21  ;;  %v3422_v46 = vpop.f32.mrb[122].mxu0 }
 0x660   : > { %v4814_v32 = vpop.eup %4813  ;;  %v3423_v44 = vadd.f32 %v3422_v46, %v3193_v36  ;;  %v3424_v31 = vpop.f32.mrb[123].mxu0 }
 0x661   : > { %v4816_v62 = vpop.eup %4815  ;;  %v3425_v34 = vadd.f32 %v3424_v31, %v3193_v36  ;;  %v4268_v38 = vpack.c.bf16 %v4814_v32, %v4810_v23 }
 0x662   : > { %v4266_v41 = vpack.c.bf16 %v4816_v62, %v4812_v28  ;;  %4825 = vtanh.f32 %v3423_v44  ;;  %v3233_v44 = vpop.permute.xlu0 %3232 }
 0x663   : > { %v3428_v37 = vpop.f32.mrb[124].mxu0  ;;  %4827 = vtanh.f32 %v3425_v34 }
 0x664   : > { %v3429_v48 = vadd.f32 %v3428_v37, %v3198_v6  ;;  %v3430_v50 = vpop.f32.mrb[125].mxu0  ;;  %4267 = vmatprep.subr.bf16.mxu1 %v4266_v41  ;;  %v4818_v35 = vpop.eup %4817 }
 0x665   : > { %v3431_v25 = vadd.f32 %v3430_v50, %v3198_v6  ;;  %4269 = vmatpush1.bf16.msra.mxu1 %v4268_v38  ;;  %v4820_v47 = vpop.eup %4819  ;;  %v3238_v50 = vpop.permute.xlu1 %3237 }
 0x666   : > { %4829 = vtanh.f32 %v3429_v48 }
 0x667   : > { %4831 = vtanh.f32 %v3431_v25  ;;  %v3434_v1 = vpop.f32.mrb[126].mxu0 }
 0x668   : > { %v4822_v7 = vpop.eup %4821  ;;  %v3435_v11 = vadd.f32 %v3434_v1, %v3203_v51  ;;  %v3436_v17 = vpop.f32.mrb[127].mxu0 }
 0x669   : > { %v4824_v24 = vpop.eup %4823  ;;  %v3437_v49 = vadd.f32 %v3436_v17, %v3203_v51  ;;  %v4272_v52 = vpack.c.bf16 %v4822_v7, %v4818_v35 }
 0x66a   : > { %v4270_v54 = vpack.c.bf16 %v4824_v24, %v4820_v47  ;;  %4833 = vtanh.f32 %v3435_v11  ;;  %v3243_v11 = vpop.permute.xlu0 %3242 }
 0x66b   : > { %v3440_v30 = vpop.f32.mrb[128].mxu0  ;;  %4835 = vtanh.f32 %v3437_v49 }
 0x66c   : > { %v3441_v8 = vadd.f32 %v3440_v30, %v3208_v63  ;;  %v3442_v16 = vpop.f32.mrb[129].mxu0  ;;  %4271 = vmatprep.subr.bf16.mxu1 %v4270_v54  ;;  %v4826_v43 = vpop.eup %4825 }
 0x66d   : > { %v3443_v42 = vadd.f32 %v3442_v16, %v3208_v63  ;;  %4273 = vmatpush1.bf16.msra.mxu1 %v4272_v52  ;;  %v4828_v53 = vpop.eup %4827  ;;  %v3248_v16 = vpop.permute.xlu1 %3247 }
 0x66e   : > { %4837 = vtanh.f32 %v3441_v8 }
 0x66f   : > { %4839 = vtanh.f32 %v3443_v42  ;;  %v3446_v0 = vpop.f32.mrb[130].mxu0 }
 0x670   : > { %v4830_v9 = vpop.eup %4829  ;;  %v3447_v2 = vadd.f32 %v3446_v0, %v3213_v27  ;;  %v3448_v22 = vpop.f32.mrb[131].mxu0 }
 0x671   : > { %v4832_v45 = vpop.eup %4831  ;;  %v3449_v3 = vadd.f32 %v3448_v22, %v3213_v27  ;;  %v4276_v12 = vpack.c.bf16 %v4830_v9, %v4826_v43 }
 0x672   : > { %v4274_v56 = vpack.c.bf16 %v4832_v45, %v4828_v53  ;;  %4841 = vtanh.f32 %v3447_v2  ;;  %v3253_v2 = vpop.permute.xlu0 %3252 }
 0x673   : > { %v3452_v10 = vpop.f32.mrb[132].mxu0  ;;  %4843 = vtanh.f32 %v3449_v3 }
 0x674   : > { %v3453_v59 = vadd.f32 %v3452_v10, %v3218_v57  ;;  %v3454_v60 = vpop.f32.mrb[133].mxu0  ;;  %4275 = vmatprep.subr.bf16.mxu1 %v4274_v56  ;;  %v4834_v26 = vpop.eup %4833 }
 0x675   : > { %v3455_v61 = vadd.f32 %v3454_v60, %v3218_v57  ;;  %4277 = vmatpush1.bf16.msra.mxu1 %v4276_v12  ;;  %v4836_v5 = vpop.eup %4835  ;;  %v3258_v60 = vpop.permute.xlu1 %3257 }
 0x676   : > { %4845 = vtanh.f32 %v3453_v59 }
 0x677   : > { %4847 = vtanh.f32 %v3455_v61  ;;  %v3458_v19 = vpop.f32.mrb[134].mxu0 }
 0x678   : > { %v4838_v13 = vpop.eup %4837  ;;  %v3459_v15 = vadd.f32 %v3458_v19, %v3223_v55  ;;  %v3460_v29 = vpop.f32.mrb[135].mxu0 }
 0x679   : > { %v4840_v39 = vpop.eup %4839  ;;  %v3461_v58 = vadd.f32 %v3460_v29, %v3223_v55  ;;  %v4280_v18 = vpack.c.bf16 %v4838_v13, %v4834_v26 }
 0x67a   : > { %v4278_v40 = vpack.c.bf16 %v4840_v39, %v4836_v5  ;;  %4849 = vtanh.f32 %v3459_v15 }
 0x67b   : > { %v3464_v21 = vpop.f32.mrb[136].mxu0  ;;  %4851 = vtanh.f32 %v3461_v58 }
 0x67c   : > { %v3465_v23 = vadd.f32 %v3464_v21, %v3228_v20  ;;  %v3466_v28 = vpop.f32.mrb[137].mxu0  ;;  %4279 = vmatprep.subr.bf16.mxu1 %v4278_v40  ;;  %v4842_v46 = vpop.eup %4841 }
 0x67d   : > { %v3467_v36 = vadd.f32 %v3466_v28, %v3228_v20  ;;  %4281 = vmatpush1.bf16.msra.mxu1 %v4280_v18  ;;  %v4844_v32 = vpop.eup %4843  ;;  %v3706_v28 = vsub.s32 0, %v5851_v4 }
 0x67e   : > { %4853 = vtanh.f32 %v3465_v23 }
 0x67f   : > { %4855 = vtanh.f32 %v3467_v36  ;;  %v3470_v31 = vpop.f32.mrb[138].mxu0 }
 0x680   : > { %v4846_v62 = vpop.eup %4845  ;;  %v3471_v34 = vadd.f32 %v3470_v31, %v3233_v44  ;;  %v3472_v38 = vpop.f32.mrb[139].mxu0 }
 0x681   : > { %v4848_v41 = vpop.eup %4847  ;;  %v3473_v6 = vadd.f32 %v3472_v38, %v3233_v44  ;;  %v4284_v37 = vpack.c.bf16 %v4846_v62, %v4842_v46  ;;  %v3712_v46 = vrot.slane %v5856_v14, %v3706_v28 }
 0x682   : > { %v4282_v48 = vpack.c.bf16 %v4848_v41, %v4844_v32  ;;  %4857 = vtanh.f32 %v3471_v34  ;;  %v2841_v32 = vpop.f32.mrb[146].mxu1 }
 0x683   : > { %v3476_v25 = vpop.f32.mrb[140].mxu0  ;;  %4859 = vtanh.f32 %v3473_v6  ;;  %v2842_v44 = vpop.f32.mrb[147].mxu1 }
 0x684   : > { %v3477_v35 = vadd.f32 %v3476_v25, %v3238_v50  ;;  %v3478_v47 = vpop.f32.mrb[141].mxu0  ;;  %4283 = vmatprep.subr.bf16.mxu1 %v4282_v48  ;;  %v4850_v1 = vpop.eup %4849 }
 0x685   : > { %v3479_v51 = vadd.f32 %v3478_v47, %v3238_v50  ;;  %4285 = vmatpush1.bf16.msra.mxu1 %v4284_v37  ;;  %v4852_v7 = vpop.eup %4851  ;;  %v2845_v31 = vpop.f32.mrb[148].mxu1 }
 0x686   : > { %4861 = vtanh.f32 %v3477_v35  ;;  %v2846_v62 = vpop.f32.mrb[149].mxu1 }
 0x687   : > { %4863 = vtanh.f32 %v3479_v51  ;;  %v3482_v17 = vpop.f32.mrb[142].mxu0  ;;  %v2849_v34 = vpop.f32.mrb[150].mxu1 }
 0x688   : > { %v4854_v24 = vpop.eup %4853  ;;  %v3483_v49 = vadd.f32 %v3482_v17, %v3243_v11  ;;  %v3484_v52 = vpop.f32.mrb[143].mxu0 }
 0x689   : > { %v4856_v54 = vpop.eup %4855  ;;  %v3485_v63 = vadd.f32 %v3484_v52, %v3243_v11  ;;  %v4288_v30 = vpack.c.bf16 %v4854_v24, %v4850_v1  ;;  %v2850_v38 = vpop.f32.mrb[151].mxu1 }
 0x68a   : > { %v4286_v8 = vpack.c.bf16 %v4856_v54, %v4852_v7  ;;  %4865 = vtanh.f32 %v3483_v49  ;;  %v2853_v41 = vpop.f32.mrb[152].mxu1 }
 0x68b   : > { %v3488_v42 = vpop.f32.mrb[144].mxu0  ;;  %4867 = vtanh.f32 %v3485_v63  ;;  %v2854_v6 = vpop.f32.mrb[153].mxu1  ;;  %v4982_v63 = vmov 1966171168  }
 0x68c   : > { %v3489_v43 = vadd.f32 %v3488_v42, %v3248_v16  ;;  %v3490_v53 = vpop.f32.mrb[145].mxu0  ;;  %4287 = vmatprep.subr.bf16.mxu1 %v4286_v8  ;;  %v4858_v0 = vpop.eup %4857 }
 0x68d   : > { %v3491_v27 = vadd.f32 %v3490_v53, %v3248_v16  ;;  %4289 = vmatpush1.bf16.msra.mxu1 %v4288_v30  ;;  %v4860_v9 = vpop.eup %4859  ;;  %v2857_v48 = vpop.f32.mrb[154].mxu1  ;;  %v3794_v30 = vunpack.c.l.s4 %v4982_v63 }
 0x68e   : > { %4869 = vtanh.f32 %v3489_v43  ;;  %v2858_v25 = vpop.f32.mrb[155].mxu1  ;;  %v3702_v8 = vpop.permute.xlu0 %3701 }
 0x68f   : > { %4871 = vtanh.f32 %v3491_v27  ;;  %v3494_v22 = vpop.f32.mrb[146].mxu0  ;;  %v2861_v47 = vpop.f32.mrb[156].mxu1  ;;  %v3795_v16 = vunpack.c.0.s8 %v3794_v30  ;;  %v3707_v42 = vrot.slane %v3702_v8, %v3706_v28 }
 0x690   : > { %v4862_v45 = vpop.eup %4861  ;;  %v3495_v3 = vadd.f32 %v3494_v22, %v3253_v2  ;;  %v3496_v12 = vpop.f32.mrb[147].mxu0 }
 0x691   : > { %v4864_v56 = vpop.eup %4863  ;;  %v3497_v57 = vadd.f32 %v3496_v12, %v3253_v2  ;;  %v4292_v10 = vpack.c.bf16 %v4862_v45, %v4858_v0  ;;  %v2862_v14 = vpop.f32.mrb[157].mxu1 }
 0x692   : > { %v4290_v59 = vpack.c.bf16 %v4864_v56, %v4860_v9  ;;  %4873 = vtanh.f32 %v3495_v3  ;;  %v3798_v9 = vsub.s32 %v3795_v16, %v5851_v4 }
 0x693   : > { %v3500_v61 = vpop.f32.mrb[148].mxu0  ;;  %4875 = vtanh.f32 %v3497_v57 }
 0x694   : > { %v3501_v26 = vadd.f32 %v3500_v61, %v3258_v60  ;;  %v3502_v5 = vpop.f32.mrb[149].mxu0  ;;  %4291 = vmatprep.subr.bf16.mxu1 %v4290_v59  ;;  %v4866_v19 = vpop.eup %4865 }
 0x695   : > { %v3503_v55 = vadd.f32 %v3502_v5, %v3258_v60  ;;  %4293 = vmatpush1.bf16.msra.mxu1 %v4292_v10  ;;  %v4868_v13 = vpop.eup %4867 }
 0x696   : > { %4877 = vtanh.f32 %v3501_v26 }
 0x697   : > { %4879 = vtanh.f32 %v3503_v55  ;;  %v3506_v37 = vpop.f32.mrb[150].mxu0 }
 0x698   : > { %v4870_v15 = vpop.eup %4869  ;;  %v3507_v50 = vpop.f32.mrb[151].mxu0 }
 0x699   : > { %v4872_v29 = vpop.eup %4871  ;;  %v4296_v39 = vpack.c.bf16 %v4870_v15, %v4866_v19 }
 0x69a   : > { %v4294_v58 = vpack.c.bf16 %v4872_v29, %v4868_v13 }
 0x69b   : > { %v3510_v35 = vpop.f32.mrb[152].mxu0 }
 0x69c   : > { %4295 = vmatprep.subr.bf16.mxu1 %v4294_v58  ;;  %v4874_v18 = vpop.eup %4873  ;;  %v3511_v51 = vpop.f32.mrb[153].mxu0 }
 0x69d   : > { %4297 = vmatpush1.bf16.msra.mxu1 %v4296_v39  ;;  %v4876_v40 = vpop.eup %4875 }
 0x69f   : > { %v3514_v1 = vpop.f32.mrb[154].mxu0 }
 0x6a0   : > { %v4878_v20 = vpop.eup %4877  ;;  %v3515_v7 = vpop.f32.mrb[155].mxu0 }
 0x6a1   : > { %v4880_v21 = vpop.eup %4879  ;;  %v4300_v23 = vpack.c.bf16 %v4878_v20, %v4874_v18 }
 0x6a2   : > { %v4298_v36 = vpack.c.bf16 %v4880_v21, %v4876_v40 }
 0x6a3   : > { %v3518_v11 = vpop.f32.mrb[156].mxu0 }
 0x6a4   : > { %4299 = vmatprep.subr.bf16.mxu1 %v4298_v36  ;;  %v3519_v17 = vpop.f32.mrb[157].mxu0 }
 0x6a5   : > { %4301 = vmatpush1.bf16.msra.mxu1 %v4300_v23 }
 0x6a7   : > { %v3522_v24 = vpop.f32.mrb[158].mxu0 }
 0x6a8   : > { %3784 = vmatmul.mubr.f32.vlgmr.msra.gmra.mrb[158].mxu1 %v3712_v46  ;;  %v3523_v49 = vpop.f32.mrb[159].mxu0 }
 0x6ab   : > { %v3526_v52 = vpop.f32.mrb[160].mxu0 }
 0x6ac   : > { %v3527_v54 = vpop.f32.mrb[161].mxu0 }
 0x77b   : > { %v3785_v43 = vpop.f32.mrb[158].mxu1 }
 0x77c   : > { %v3786_v53 = vadd.f32 %v3785_v43, %v3707_v42  ;;  %v3787_v27 = vpop.f32.mrb[159].mxu1 }
 0x77d   : > { %v3788_v0 = vadd.f32 %v3787_v27, %v3707_v42 }
 0x77f   : > { %v3792_v2 = vcombine.low %v3786_v53, %v3788_v0 }
 0x781   : > { %v3799_v22 = vrot.slane %v3792_v2, %v3798_v9 }
 0x783   : > { %v3806_v45 = vrot.slane %v3799_v22, %v3798_v9 }
 0x785   : > { %3812 = vst.msk [vmem:[%s289_s19] sm:$0x3] %vm3810_vm1, %v3806_v45 }
 0x786   : > { %4922 = shalt.err (!%p4919_p7)
}
 0x787   : > { %s4923_s10 = scalar_lea.hbm %s5869_s23, 32  ;;  %s4927_s14 = scalar_lea.hbm %s5918_s7, 64 }
 0x788   : > { %p4924_p8 = scmp.ne.s32.totalorder %s5869_s23, %s4923_s10  ;;  %p4928_p1 = scmp.lt.u32.totalorder %s5869_s23, %s5918_s7 }
 0x789   : > { %p4929_p0 = scmp.lt.u32.totalorder %s4927_s14, %s4923_s10  ;;  %p4931_p6 = scmp.lt.u32.totalorder %s4923_s10, %s5869_s23 }
 0x78a   : > { %p4925_p11 = pnand %p4924_p8, %p5929_p9 }
 0x78b   : > { %p4930_p5 = por %p4929_p0, %p4928_p1 }
 0x78c   : > { %p4926_p13 = pneg %p4925_p11 }
 0x78d   : > { %p4932_p10 = por %p4931_p6, %p4930_p5 }
 0x78f   : > { %p4933_p12 = pnand %p4932_p10, %p4926_p13 }
 0x791   : > { %4936 = shalt.err (!%p4933_p12)
}
 0x792   : > { %4308 = dma.vmem_to_hbm [thread:$0]  (%p5929_p9), %s5871_s20, 32, %s5869_s23, %s3814_s24  }
 0x793 PF: > { %p4320_p2 = scmp.ge.s32.totalorder %s4975_s29, 2  ;;  %s3840_s19 = sand.u32 1, %s4963_s26  }
 0x794   : > { %p5930_p3 = scmp.ne.s32.totalorder %s5923_s13, 0  ;;  %s3841_s21 = scalar_lea.sflag [#allocation6], %s3840_s19 }
 0x796   : > { %p4315_p4 = pnand %p4320_p2, %p5930_p3 }
 0x798   : > { %4958 = dma.done.wait (!%p4315_p4), %s3841_s21, 32  }
 0x799   : > { %4960 = vsyncadd (!%p4315_p4), %s3841_s21, 4294967264  ;;  %p20_p7 = scmp.ge.s32.totalorder %s5052_s8, 4   ;;  %s5931_s26 = smov %s4967_s27 }
 0x79a   : > { %s5932_s27 = smov %s4971_s28  ;;  %s5933_s28 = smov %s5063_s11 }
 0x79b   : > { %s5934_s29 = smov %s5052_s8  ;;  %22 = sbr.rel (!%p20_p7) target bundleno = 7 (0x7), region = 94 }
 0x7a2   :  { %3846 = vsyncpa [#allocation5], 1 }
 0x7a3   :  { %3848 = vsyncpa [#allocation5 + $0x1], 1 }
 0x7a4   :  { %3849 = vsyncpa [#allocation6], 1 }
 0x7a5   :  { %3851 = vsyncpa [#allocation6 + $0x1], 1 }

</bundles_post_ra>
